<compile_context>
chip_gen: v5e
topology: v5e:2x2
jax: 0.10.0
libtpu: 0.0.40
codegen_flags: <defaults>
</compile_context>

<pallas_src>
import functools
import numpy as np

import jax
import jax.numpy as jnp
from jax import lax
from jax.experimental import pallas as pl
from jax.experimental.pallas import tpu as pltpu


# ----------------------------------------------------------------------------- helpers

def _gelu(x):
    # tanh-approximation GELU; the transcendental goes to the EUP slot.
    c = 0.7978845608028654  # sqrt(2/pi)
    return 0.5 * x * (1.0 + jnp.tanh(c * (x + 0.044715 * (x * x * x))))


def _ln(v, g, b):
    # LayerNorm(eps=1e-6) over the last axis, f32 statistics.
    mu = jnp.mean(v, axis=-1, keepdims=True)
    var = jnp.mean(jnp.square(v - mu), axis=-1, keepdims=True)
    return (v - mu) * lax.rsqrt(var + 1e-6) * g + b


# ----------------------------------------------------------------------------- fused kernel

def _block_kernel(x_ref, pc_ref, bqkv_ref, wqkv_ref, rpe_ref, wo_ref,
                  pch_ref, w1_ref, w2_ref, o_ref, ctx_ref,
                  *, H, W, C, CH, NH, HD, WS):
    """One batch element: x + attn(LN1(x)) -> x1; x1 + convMLP(LN2(x1)) -> out. All in VMEM."""
    N = H * W
    S = WS * WS
    NWH, NWW = H // WS, W // WS
    NWIN = NWH * NWW

    # ---- packed per-channel vectors (single DMA'd (8,C) / (15,CH) arrays) ----
    ln1_g, ln1_b = pc_ref[0:1, :], pc_ref[1:2, :]
    bo = pc_ref[2:3, :]
    ln2_g, ln2_b = pc_ref[3:4, :], pc_ref[4:5, :]
    b2 = pc_ref[5:6, :]
    bn3_s, bn3_t = pc_ref[6:7, :], pc_ref[7:8, :]
    dw_b = pch_ref[9:10, :]
    b1 = pch_ref[10:11, :]
    bn1_s, bn1_t = pch_ref[11:12, :], pch_ref[12:13, :]
    bn2_s, bn2_t = pch_ref[13:14, :], pch_ref[14:15, :]

    # native (C, N) block -> token-major (N, C); transpose stays in VMEM (no HBM pass).
    x_tok = x_ref[0].T                                                       # (N, C) f32

    # ======================= attention branch =======================
    xn = _ln(x_tok, ln1_g, ln1_b)
    # fused qkv projection; softmax scale is pre-folded into the Q columns of wqkv/bqkv.
    qkv = jnp.dot(xn.astype(jnp.bfloat16), wqkv_ref[...],
                  preferred_element_type=jnp.float32) + bqkv_ref[...]        # (N, 3C)

    # window partition (row-major tokens -> window-major) via static contiguous row slices.
    # TODO(synk): for large window counts express this via a window-row grid axis + BlockSpec.
    segs = []
    for wy in range(NWH):
        for wx in range(NWW):
            for i in range(WS):
                r0 = (wy * WS + i) * W + wx * WS
                segs.append(qkv[r0:r0 + WS, :])
    qkvw = jnp.concatenate(segs, axis=0).reshape(NWIN, S, 3 * C)             # (NWIN, S, 3C)

    # per-head attention, batched over windows; head outputs are written into the ctx scratch
    # at static column offsets (no minor-dim concatenate).
    for h in range(NH):
        qh = qkvw[:, :, h * HD:(h + 1) * HD]
        kh = qkvw[:, :, C + h * HD:C + (h + 1) * HD]
        vh = qkvw[:, :, 2 * C + h * HD:2 * C + (h + 1) * HD]

        sc = jnp.einsum('wqd,wkd->wqk', qh.astype(jnp.bfloat16), kh.astype(jnp.bfloat16),
                        preferred_element_type=jnp.float32) + rpe_ref[h]     # (NWIN, S, S)
        m = jnp.max(sc, axis=-1, keepdims=True)
        e = jnp.exp(sc - m)
        p = e * pl.reciprocal(jnp.sum(e, axis=-1, keepdims=True), approx=True)  # EUP reciprocal
        oh = jnp.einsum('wqk,wkd->wqd', p.astype(jnp.bfloat16), vh.astype(jnp.bfloat16),
                        preferred_element_type=jnp.float32)                  # (NWIN, S, HD)
        ctx_ref[:, h * HD:(h + 1) * HD] = oh.reshape(NWIN * S, HD)

    # output projection (one (N,C)x(C,C) bf16 matmul), rows still in window order.
    y = jnp.dot(ctx_ref[...].astype(jnp.bfloat16), wo_ref[...],
                preferred_element_type=jnp.float32) + bo                     # (N, C)

    # window un-partition back to row-major token order (static slices + one concatenate).
    rows = []
    for wy in range(NWH):
        for i in range(WS):
            for wx in range(NWW):
                widx = wy * NWW + wx
                rows.append(y[widx * S + i * WS: widx * S + (i + 1) * WS, :])
    attn_tok = jnp.concatenate(rows, axis=0)                                 # (N, C)

    x1 = x_tok + attn_tok                                                    # residual 1

    # ======================= conv-MLP branch (MlpDWBN) =======================
    xn2 = _ln(x1, ln2_g, ln2_b)

    # fc1 (1x1 conv) + BN1(eval) + GELU
    hfc = jnp.dot(xn2.astype(jnp.bfloat16), w1_ref[...],
                  preferred_element_type=jnp.float32) + b1
    hfc = _gelu(hfc * bn1_s + bn1_t)                                         # (N, CH) lane-dense

    # depthwise 3x3, padding=1: build a zero halo in H and W once, then 9 unmasked FMA taps.
    h3 = hfc.reshape(H, W, CH)
    zrow = jnp.zeros((1, W, CH), jnp.float32)
    hp = jnp.concatenate([zrow, h3, zrow], axis=0)                           # (H+2, W, CH)
    zcol = jnp.zeros((H + 2, 1, CH), jnp.float32)
    hp = jnp.concatenate([zcol, hp, zcol], axis=1)                           # (H+2, W+2, CH)

    acc = jnp.zeros((H, W, CH), jnp.float32)
    for k in range(9):
        dy, dx = k // 3, k % 3
        acc = acc + hp[dy:dy + H, dx:dx + W, :] * pch_ref[k:k + 1, :]        # unmasked VPU FMA
    hdw = acc.reshape(N, CH) + dw_b
    hdw = _gelu(hdw * bn2_s + bn2_t)                                         # BN2(eval) + GELU

    # fc2 (1x1 conv) + BN3(eval) + GELU
    o = jnp.dot(hdw.astype(jnp.bfloat16), w2_ref[...],
                preferred_element_type=jnp.float32) + b2
    o = _gelu(o * bn3_s + bn3_t)

    out_tok = x1 + o                                                         # residual 2
    o_ref[0] = out_tok.T                                                     # back to (C, N)


def _const_spec(shape):
    zeros = (0,) * len(shape)
    return pl.BlockSpec(shape, lambda b: zeros)   # constant block index -> fetched once


def fused_block(x_cn, p, *, H, W, C, CH, NH, HD, ws):
    B, _, N = x_cn.shape
    S = ws * ws
    kern = functools.partial(_block_kernel, H=H, W=W, C=C, CH=CH, NH=NH, HD=HD, WS=ws)
    return pl.pallas_call(
        kern,
        out_shape=jax.ShapeDtypeStruct((B, C, N), jnp.float32),
        grid=(B,),
        in_specs=[
            pl.BlockSpec((1, C, N), lambda b: (b, 0, 0)),   # x, native channel-major layout
            _const_spec((8, C)),                            # packed per-C vectors
            _const_spec((1, 3 * C)),                        # qkv bias (q-part pre-scaled)
            _const_spec((C, 3 * C)),                        # qkv weight (bf16, q-part pre-scaled)
            _const_spec((NH, S, S)),                        # relative position bias
            _const_spec((C, C)),                            # out proj weight (bf16)
            _const_spec((15, CH)),                          # packed per-CH vectors + dw taps
            _const_spec((C, CH)),                           # fc1 weight (bf16)
            _const_spec((CH, C)),                           # fc2 weight (bf16)
        ],
        out_specs=pl.BlockSpec((1, C, N), lambda b: (b, 0, 0)),
        scratch_shapes=[pltpu.VMEM((N, C), jnp.float32)],   # per-head context assembly
        compiler_params=pltpu.CompilerParams(
            dimension_semantics=("parallel",),              # megacore over batch on v7x
            vmem_limit_bytes=64 * 1024 * 1024,              # raise 16/32 MiB default scoped VMEM
        ),
    )(x_cn, p["pc"], p["bqkv"], p["wqkv"], p["rpe_bias"], p["wo"],
      p["pch"], p["w1"], p["w2"])


# ----------------------------------------------------------------------------- full forward

def general_transformer_block(x_nchw, params, *, num_heads, window_size):
    B, C, H, W = x_nchw.shape
    ws = window_size
    # TODO(synk): isa_local padding path (H/W not divisible by window_size) not implemented.
    assert H % ws == 0 and W % ws == 0 and C % num_heads == 0
    HD = C // num_heads
    CH = params["w1"].shape[1]

    x_cn = x_nchw.reshape(B, C, H * W)                       # free reshape, no transpose pass
    out = fused_block(x_cn, params, H=H, W=W, C=C, CH=CH, NH=num_heads, HD=HD, ws=ws)
    return out.reshape(B, C, H, W)


# ----------------------------------------------------------------------------- parameter setup

def build_rpe_bias(key, ws, nh):
    """Swin-style relative position bias table gathered into a dense (nh, S, S) bias."""
    table = 0.02 * jax.random.normal(key, ((2 * ws - 1) ** 2, nh), jnp.float32)
    coords = np.stack(np.meshgrid(np.arange(ws), np.arange(ws), indexing="ij"))   # (2, ws, ws)
    cf = coords.reshape(2, -1)
    rel = (cf[:, :, None] - cf[:, None, :]).transpose(1, 2, 0).astype(np.int64)   # (S, S, 2)
    rel[:, :, 0] += ws - 1
    rel[:, :, 1] += ws - 1
    rel[:, :, 0] *= 2 * ws - 1
    idx = rel.sum(-1)                                                             # (S, S)
    bias = table[jnp.asarray(idx)]                                                # (S, S, nh)
    return jnp.transpose(bias, (2, 0, 1))                                         # (nh, S, S)


def init_params(key, *, C, num_heads, window_size, mlp_ratio):
    ws = window_size
    CH = int(C * mlp_ratio)
    HD = C // num_heads
    scale = HD ** -0.5
    keys = iter(jax.random.split(key, 32))
    nxt = lambda: next(keys)
    nrm = lambda shape, s=0.02: s * jax.random.normal(nxt(), shape, jnp.float32)

    def bn_affine(dim):
        # eval-mode BN folded to y = x * scale + shift
        g = 1.0 + 0.1 * jax.random.normal(nxt(), (dim,), jnp.float32)
        b = 0.05 * jax.random.normal(nxt(), (dim,), jnp.float32)
        rm = 0.1 * jax.random.normal(nxt(), (dim,), jnp.float32)
        rv = jax.random.uniform(nxt(), (dim,), jnp.float32, minval=0.5, maxval=1.5)
        s = g / jnp.sqrt(rv + 1e-5)
        return s, b - rm * s

    # ---- attention params (softmax scale folded into the Q third) ----
    wqkv = nrm((C, 3 * C))
    bqkv = nrm((3 * C,), 0.01)
    wqkv = wqkv.at[:, :C].multiply(scale)
    bqkv = bqkv.at[:C].multiply(scale)
    wo = nrm((C, C))
    bo = nrm((C,), 0.01)

    # ---- MLP params ----
    w1 = nrm((C, CH))
    b1 = nrm((CH,), 0.01)
    bn1_s, bn1_t = bn_affine(CH)
    dw_w = nrm((9, CH), 0.1)                      # depthwise 3x3 taps, row-major (dy, dx)
    dw_b = nrm((CH,), 0.01)
    bn2_s, bn2_t = bn_affine(CH)
    w2 = nrm((CH, C))
    b2 = nrm((C,), 0.01)
    bn3_s, bn3_t = bn_affine(C)

    ln1_g = jnp.ones((C,), jnp.float32)
    ln1_b = jnp.zeros((C,), jnp.float32)
    ln2_g = jnp.ones((C,), jnp.float32)
    ln2_b = jnp.zeros((C,), jnp.float32)

    # packed per-channel vectors (one (8,C) and one (15,CH) input instead of 12 tiny ones).
    pc = jnp.stack([ln1_g, ln1_b, bo, ln2_g, ln2_b, b2, bn3_s, bn3_t], axis=0)       # (8, C)
    pch = jnp.concatenate(
        [dw_w, dw_b[None], b1[None], bn1_s[None], bn1_t[None], bn2_s[None], bn2_t[None]],
        axis=0)                                                                       # (15, CH)

    return {
        "pc": pc,
        "bqkv": bqkv.reshape(1, 3 * C),
        "wqkv": wqkv.astype(jnp.bfloat16),
        "rpe_bias": build_rpe_bias(nxt(), ws, num_heads),
        "wo": wo.astype(jnp.bfloat16),
        "pch": pch,
        "w1": w1.astype(jnp.bfloat16),
        "w2": w2.astype(jnp.bfloat16),
    }


# ----------------------------------------------------------------------------- main

if __name__ == "__main__":
    B, C, H, W = 2, 32, 8, 8
    num_heads, window_size, mlp_ratio = 4, 4, 4.0

    key = jax.random.PRNGKey(0)
    kx, kp = jax.random.split(key)
    params = init_params(kp, C=C, num_heads=num_heads, window_size=window_size,
                         mlp_ratio=mlp_ratio)
    x = jax.random.normal(kx, (B, C, H, W), jnp.float32)

    fwd = jax.jit(functools.partial(general_transformer_block,
                                    num_heads=num_heads, window_size=window_size))
    out = fwd(x, params)
    jax.block_until_ready(out)
    assert out.shape == (B, C, H, W) and out.dtype == jnp.float32
    assert bool(jnp.all(jnp.isfinite(out)))
    print("KERNEL_OK")
</pallas_src>

<mosaic_0001>
module attributes {stable_mosaic.version = 11 : i64} {
  func.func @_block_kernel(%arg0: i32, %arg1: memref<1x32x64xf32, #tpu.memory_space<vmem>>, %arg2: memref<8x32xf32, #tpu.memory_space<vmem>>, %arg3: memref<1x96xf32, #tpu.memory_space<vmem>>, %arg4: memref<32x96xbf16, #tpu.memory_space<vmem>>, %arg5: memref<4x16x16xf32, #tpu.memory_space<vmem>>, %arg6: memref<32x32xbf16, #tpu.memory_space<vmem>>, %arg7: memref<15x128xf32, #tpu.memory_space<vmem>>, %arg8: memref<32x128xbf16, #tpu.memory_space<vmem>>, %arg9: memref<128x32xbf16, #tpu.memory_space<vmem>>, %arg10: memref<1x32x64xf32, #tpu.memory_space<vmem>>, %arg11: memref<64x32xf32, #tpu.memory_space<vmem>>) attributes {dimension_semantics = [#tpu.dimension_semantics<parallel>], iteration_bounds = array<i64: 2>, scalar_prefetch = 0 : i64, scratch_operands = 1 : i64, tpu.core_type = #tpu.core_type<tc>, window_params = [{transform_indices = @transform_0, window_bounds = array<i64: 1, 32, 64>}, {pipeline_mode = #tpu.pipeline_mode<synchronous>, transform_indices = @transform_1, window_bounds = array<i64: 8, 32>}, {pipeline_mode = #tpu.pipeline_mode<synchronous>, transform_indices = @transform_2, window_bounds = array<i64: 1, 96>}, {pipeline_mode = #tpu.pipeline_mode<synchronous>, transform_indices = @transform_3, window_bounds = array<i64: 32, 96>}, {pipeline_mode = #tpu.pipeline_mode<synchronous>, transform_indices = @transform_4, window_bounds = array<i64: 4, 16, 16>}, {pipeline_mode = #tpu.pipeline_mode<synchronous>, transform_indices = @transform_5, window_bounds = array<i64: 32, 32>}, {pipeline_mode = #tpu.pipeline_mode<synchronous>, transform_indices = @transform_6, window_bounds = array<i64: 15, 128>}, {pipeline_mode = #tpu.pipeline_mode<synchronous>, transform_indices = @transform_7, window_bounds = array<i64: 32, 128>}, {pipeline_mode = #tpu.pipeline_mode<synchronous>, transform_indices = @transform_8, window_bounds = array<i64: 128, 32>}, {transform_indices = @transform_9, window_bounds = array<i64: 1, 32, 64>}]} {
    %c0 = arith.constant 0 : index
    %c0_0 = arith.constant 0 : index
    %0 = vector.load %arg2[%c0, %c0_0] : memref<8x32xf32, #tpu.memory_space<vmem>>, vector<1x32xf32>
    %c1 = arith.constant 1 : index
    %c0_1 = arith.constant 0 : index
    %1 = vector.load %arg2[%c1, %c0_1] : memref<8x32xf32, #tpu.memory_space<vmem>>, vector<1x32xf32>
    %c2 = arith.constant 2 : index
    %c0_2 = arith.constant 0 : index
    %2 = vector.load %arg2[%c2, %c0_2] : memref<8x32xf32, #tpu.memory_space<vmem>>, vector<1x32xf32>
    %c3 = arith.constant 3 : index
    %c0_3 = arith.constant 0 : index
    %3 = vector.load %arg2[%c3, %c0_3] : memref<8x32xf32, #tpu.memory_space<vmem>>, vector<1x32xf32>
    %c4 = arith.constant 4 : index
    %c0_4 = arith.constant 0 : index
    %4 = vector.load %arg2[%c4, %c0_4] : memref<8x32xf32, #tpu.memory_space<vmem>>, vector<1x32xf32>
    %c5 = arith.constant 5 : index
    %c0_5 = arith.constant 0 : index
    %5 = vector.load %arg2[%c5, %c0_5] : memref<8x32xf32, #tpu.memory_space<vmem>>, vector<1x32xf32>
    %c6 = arith.constant 6 : index
    %c0_6 = arith.constant 0 : index
    %6 = vector.load %arg2[%c6, %c0_6] : memref<8x32xf32, #tpu.memory_space<vmem>>, vector<1x32xf32>
    %c7 = arith.constant 7 : index
    %c0_7 = arith.constant 0 : index
    %7 = vector.load %arg2[%c7, %c0_7] : memref<8x32xf32, #tpu.memory_space<vmem>>, vector<1x32xf32>
    %c9 = arith.constant 9 : index
    %c0_8 = arith.constant 0 : index
    %8 = vector.load %arg7[%c9, %c0_8] : memref<15x128xf32, #tpu.memory_space<vmem>>, vector<1x128xf32>
    %c10 = arith.constant 10 : index
    %c0_9 = arith.constant 0 : index
    %9 = vector.load %arg7[%c10, %c0_9] : memref<15x128xf32, #tpu.memory_space<vmem>>, vector<1x128xf32>
    %c11 = arith.constant 11 : index
    %c0_10 = arith.constant 0 : index
    %10 = vector.load %arg7[%c11, %c0_10] : memref<15x128xf32, #tpu.memory_space<vmem>>, vector<1x128xf32>
    %c12 = arith.constant 12 : index
    %c0_11 = arith.constant 0 : index
    %11 = vector.load %arg7[%c12, %c0_11] : memref<15x128xf32, #tpu.memory_space<vmem>>, vector<1x128xf32>
    %c13 = arith.constant 13 : index
    %c0_12 = arith.constant 0 : index
    %12 = vector.load %arg7[%c13, %c0_12] : memref<15x128xf32, #tpu.memory_space<vmem>>, vector<1x128xf32>
    %c14 = arith.constant 14 : index
    %c0_13 = arith.constant 0 : index
    %13 = vector.load %arg7[%c14, %c0_13] : memref<15x128xf32, #tpu.memory_space<vmem>>, vector<1x128xf32>
    %c0_14 = arith.constant 0 : index
    %c0_15 = arith.constant 0 : index
    %c0_16 = arith.constant 0 : index
    %14 = vector.load %arg1[%c0_14, %c0_15, %c0_16] : memref<1x32x64xf32, #tpu.memory_space<vmem>>, vector<1x32x64xf32>
    %15 = vector.shape_cast %14 : vector<1x32x64xf32> to vector<32x64xf32>
    %16 = tpu.transpose %15, [1, 0] : vector<32x64xf32> -> vector<64x32xf32>
    %cst = arith.constant dense<0.000000e+00> : vector<64xf32>
    %17 = vector.multi_reduction <add>, %16, %cst [1] : vector<64x32xf32> to vector<64xf32>
    %18 = vector.shape_cast %17 : vector<64xf32> to vector<64x1xf32>
    %cst_17 = arith.constant 3.200000e+01 : f32
    %19 = vector.broadcast %cst_17 : f32 to vector<64x1xf32>
    %20 = arith.divf %18, %19 : vector<64x1xf32>
    %21 = vector.broadcast %20 : vector<64x1xf32> to vector<64x32xf32>
    %22 = arith.subf %16, %21 : vector<64x32xf32>
    %23 = arith.mulf %22, %22 : vector<64x32xf32>
    %cst_18 = arith.constant dense<0.000000e+00> : vector<64xf32>
    %24 = vector.multi_reduction <add>, %23, %cst_18 [1] : vector<64x32xf32> to vector<64xf32>
    %25 = vector.shape_cast %24 : vector<64xf32> to vector<64x1xf32>
    %cst_19 = arith.constant 3.200000e+01 : f32
    %26 = vector.broadcast %cst_19 : f32 to vector<64x1xf32>
    %27 = arith.divf %25, %26 : vector<64x1xf32>
    %28 = vector.broadcast %20 : vector<64x1xf32> to vector<64x32xf32>
    %29 = arith.subf %16, %28 : vector<64x32xf32>
    %cst_20 = arith.constant 9.99999997E-7 : f32
    %30 = vector.broadcast %cst_20 : f32 to vector<64x1xf32>
    %31 = arith.addf %27, %30 : vector<64x1xf32>
    %32 = math.rsqrt %31 : vector<64x1xf32>
    %33 = vector.broadcast %32 : vector<64x1xf32> to vector<64x32xf32>
    %34 = arith.mulf %29, %33 : vector<64x32xf32>
    %35 = vector.broadcast %0 : vector<1x32xf32> to vector<64x32xf32>
    %36 = arith.mulf %34, %35 : vector<64x32xf32>
    %37 = vector.broadcast %1 : vector<1x32xf32> to vector<64x32xf32>
    %38 = arith.addf %36, %37 : vector<64x32xf32>
    %39 = arith.truncf %38 : vector<64x32xf32> to vector<64x32xbf16>
    %c0_21 = arith.constant 0 : index
    %c0_22 = arith.constant 0 : index
    %40 = vector.load %arg4[%c0_21, %c0_22] : memref<32x96xbf16, #tpu.memory_space<vmem>>, vector<32x96xbf16>
    %cst_23 = arith.constant dense<0.000000e+00> : vector<64x96xf32>
    %41 = tpu.matmul %39, %40, %cst_23 {dimension_numbers = #tpu.dot_dimension_numbers<[1], [0], [0], [1], [0, 0, 1, 1], [], []>} : vector<64x32xbf16>, vector<32x96xbf16>, vector<64x96xf32> -> vector<64x96xf32>
    %c0_24 = arith.constant 0 : index
    %c0_25 = arith.constant 0 : index
    %42 = vector.load %arg3[%c0_24, %c0_25] : memref<1x96xf32, #tpu.memory_space<vmem>>, vector<1x96xf32>
    %43 = vector.broadcast %42 : vector<1x96xf32> to vector<64x96xf32>
    %44 = arith.addf %41, %43 : vector<64x96xf32>
    %45 = vector.extract_strided_slice %44 {offsets = [0, 0], sizes = [4, 96], strides = [1, 1]} : vector<64x96xf32> to vector<4x96xf32>
    %46 = vector.extract_strided_slice %44 {offsets = [8, 0], sizes = [4, 96], strides = [1, 1]} : vector<64x96xf32> to vector<4x96xf32>
    %47 = vector.extract_strided_slice %44 {offsets = [16, 0], sizes = [4, 96], strides = [1, 1]} : vector<64x96xf32> to vector<4x96xf32>
    %48 = vector.extract_strided_slice %44 {offsets = [24, 0], sizes = [4, 96], strides = [1, 1]} : vector<64x96xf32> to vector<4x96xf32>
    %49 = vector.extract_strided_slice %44 {offsets = [4, 0], sizes = [4, 96], strides = [1, 1]} : vector<64x96xf32> to vector<4x96xf32>
    %50 = vector.extract_strided_slice %44 {offsets = [12, 0], sizes = [4, 96], strides = [1, 1]} : vector<64x96xf32> to vector<4x96xf32>
    %51 = vector.extract_strided_slice %44 {offsets = [20, 0], sizes = [4, 96], strides = [1, 1]} : vector<64x96xf32> to vector<4x96xf32>
    %52 = vector.extract_strided_slice %44 {offsets = [28, 0], sizes = [4, 96], strides = [1, 1]} : vector<64x96xf32> to vector<4x96xf32>
    %53 = vector.extract_strided_slice %44 {offsets = [32, 0], sizes = [4, 96], strides = [1, 1]} : vector<64x96xf32> to vector<4x96xf32>
    %54 = vector.extract_strided_slice %44 {offsets = [40, 0], sizes = [4, 96], strides = [1, 1]} : vector<64x96xf32> to vector<4x96xf32>
    %55 = vector.extract_strided_slice %44 {offsets = [48, 0], sizes = [4, 96], strides = [1, 1]} : vector<64x96xf32> to vector<4x96xf32>
    %56 = vector.extract_strided_slice %44 {offsets = [56, 0], sizes = [4, 96], strides = [1, 1]} : vector<64x96xf32> to vector<4x96xf32>
    %57 = vector.extract_strided_slice %44 {offsets = [36, 0], sizes = [4, 96], strides = [1, 1]} : vector<64x96xf32> to vector<4x96xf32>
    %58 = vector.extract_strided_slice %44 {offsets = [44, 0], sizes = [4, 96], strides = [1, 1]} : vector<64x96xf32> to vector<4x96xf32>
    %59 = vector.extract_strided_slice %44 {offsets = [52, 0], sizes = [4, 96], strides = [1, 1]} : vector<64x96xf32> to vector<4x96xf32>
    %60 = vector.extract_strided_slice %44 {offsets = [60, 0], sizes = [4, 96], strides = [1, 1]} : vector<64x96xf32> to vector<4x96xf32>
    %61 = tpu.concatenate %45, %46, %47, %48, %49, %50, %51, %52, %53, %54, %55, %56, %57, %58, %59, %60 in 0 : vector<4x96xf32>, vector<4x96xf32>, vector<4x96xf32>, vector<4x96xf32>, vector<4x96xf32>, vector<4x96xf32>, vector<4x96xf32>, vector<4x96xf32>, vector<4x96xf32>, vector<4x96xf32>, vector<4x96xf32>, vector<4x96xf32>, vector<4x96xf32>, vector<4x96xf32>, vector<4x96xf32>, vector<4x96xf32> -> vector<64x96xf32>
    %62 = vector.shape_cast %61 : vector<64x96xf32> to vector<4x16x96xf32>
    %63 = vector.extract_strided_slice %62 {offsets = [0, 0, 0], sizes = [4, 16, 8], strides = [1, 1, 1]} : vector<4x16x96xf32> to vector<4x16x8xf32>
    %64 = vector.extract_strided_slice %62 {offsets = [0, 0, 32], sizes = [4, 16, 8], strides = [1, 1, 1]} : vector<4x16x96xf32> to vector<4x16x8xf32>
    %65 = vector.extract_strided_slice %62 {offsets = [0, 0, 64], sizes = [4, 16, 8], strides = [1, 1, 1]} : vector<4x16x96xf32> to vector<4x16x8xf32>
    %66 = arith.truncf %63 : vector<4x16x8xf32> to vector<4x16x8xbf16>
    %67 = arith.truncf %64 : vector<4x16x8xf32> to vector<4x16x8xbf16>
    "tpu.trace_start"() <{level = 10 : i32, message = "wqd,wkd->wqk"}> : () -> ()
    %cst_26 = arith.constant dense<0.000000e+00> : vector<4x16x16xf32>
    %68 = tpu.matmul %66, %67, %cst_26 {dimension_numbers = #tpu.dot_dimension_numbers<[2], [2], [1], [1], [0, 0, 0, 1, 1, 1], [0], [0]>} : vector<4x16x8xbf16>, vector<4x16x8xbf16>, vector<4x16x16xf32> -> vector<4x16x16xf32>
    "tpu.trace_stop"() : () -> ()
    %c0_27 = arith.constant 0 : index
    %c0_28 = arith.constant 0 : index
    %c0_29 = arith.constant 0 : index
    %69 = vector.load %arg5[%c0_27, %c0_28, %c0_29] : memref<4x16x16xf32, #tpu.memory_space<vmem>>, vector<1x16x16xf32>
    %70 = vector.shape_cast %69 : vector<1x16x16xf32> to vector<16x16xf32>
    %71 = vector.shape_cast %70 : vector<16x16xf32> to vector<1x16x16xf32>
    %72 = vector.broadcast %71 : vector<1x16x16xf32> to vector<4x16x16xf32>
    %73 = arith.addf %68, %72 : vector<4x16x16xf32>
    %cst_30 = arith.constant dense<0xFF800000> : vector<4x16xf32>
    %74 = vector.multi_reduction <maximumf>, %73, %cst_30 [2] : vector<4x16x16xf32> to vector<4x16xf32>
    %75 = vector.shape_cast %74 : vector<4x16xf32> to vector<4x16x1xf32>
    %76 = vector.broadcast %75 : vector<4x16x1xf32> to vector<4x16x16xf32>
    %77 = arith.subf %73, %76 : vector<4x16x16xf32>
    %78 = math.exp %77 : vector<4x16x16xf32>
    %cst_31 = arith.constant dense<0.000000e+00> : vector<4x16xf32>
    %79 = vector.multi_reduction <add>, %78, %cst_31 [2] : vector<4x16x16xf32> to vector<4x16xf32>
    %80 = vector.shape_cast %79 : vector<4x16xf32> to vector<4x16x1xf32>
    %81 = tpu.reciprocal %80 {approx = true} : vector<4x16x1xf32> -> vector<4x16x1xf32>
    %82 = vector.broadcast %81 : vector<4x16x1xf32> to vector<4x16x16xf32>
    %83 = arith.mulf %78, %82 : vector<4x16x16xf32>
    %84 = arith.truncf %83 : vector<4x16x16xf32> to vector<4x16x16xbf16>
    %85 = arith.truncf %65 : vector<4x16x8xf32> to vector<4x16x8xbf16>
    "tpu.trace_start"() <{level = 10 : i32, message = "wqk,wkd->wqd"}> : () -> ()
    %cst_32 = arith.constant dense<0.000000e+00> : vector<4x16x8xf32>
    %86 = tpu.matmul %84, %85, %cst_32 {dimension_numbers = #tpu.dot_dimension_numbers<[2], [1], [1], [2], [0, 0, 0, 1, 1, 2], [0], [0]>} : vector<4x16x16xbf16>, vector<4x16x8xbf16>, vector<4x16x8xf32> -> vector<4x16x8xf32>
    "tpu.trace_stop"() : () -> ()
    %87 = vector.shape_cast %86 : vector<4x16x8xf32> to vector<64x8xf32>
    %c0_33 = arith.constant 0 : index
    %c0_34 = arith.constant 0 : index
    %88 = vector.load %arg11[%c0_33, %c0_34] : memref<64x32xf32, #tpu.memory_space<vmem>>, vector<64x8xf32>
    tpu.vector_store %arg11[%c0_33, %c0_34], %87 {strides = array<i32>} : memref<64x32xf32, #tpu.memory_space<vmem>>, vector<64x8xf32>,
    %89 = vector.extract_strided_slice %62 {offsets = [0, 0, 8], sizes = [4, 16, 8], strides = [1, 1, 1]} : vector<4x16x96xf32> to vector<4x16x8xf32>
    %90 = vector.extract_strided_slice %62 {offsets = [0, 0, 40], sizes = [4, 16, 8], strides = [1, 1, 1]} : vector<4x16x96xf32> to vector<4x16x8xf32>
    %91 = vector.extract_strided_slice %62 {offsets = [0, 0, 72], sizes = [4, 16, 8], strides = [1, 1, 1]} : vector<4x16x96xf32> to vector<4x16x8xf32>
    %92 = arith.truncf %89 : vector<4x16x8xf32> to vector<4x16x8xbf16>
    %93 = arith.truncf %90 : vector<4x16x8xf32> to vector<4x16x8xbf16>
    "tpu.trace_start"() <{level = 10 : i32, message = "wqd,wkd->wqk"}> : () -> ()
    %cst_35 = arith.constant dense<0.000000e+00> : vector<4x16x16xf32>
    %94 = tpu.matmul %92, %93, %cst_35 {dimension_numbers = #tpu.dot_dimension_numbers<[2], [2], [1], [1], [0, 0, 0, 1, 1, 1], [0], [0]>} : vector<4x16x8xbf16>, vector<4x16x8xbf16>, vector<4x16x16xf32> -> vector<4x16x16xf32>
    "tpu.trace_stop"() : () -> ()
    %c1_36 = arith.constant 1 : index
    %c0_37 = arith.constant 0 : index
    %c0_38 = arith.constant 0 : index
    %95 = vector.load %arg5[%c1_36, %c0_37, %c0_38] : memref<4x16x16xf32, #tpu.memory_space<vmem>>, vector<1x16x16xf32>
    %96 = vector.shape_cast %95 : vector<1x16x16xf32> to vector<16x16xf32>
    %97 = vector.shape_cast %96 : vector<16x16xf32> to vector<1x16x16xf32>
    %98 = vector.broadcast %97 : vector<1x16x16xf32> to vector<4x16x16xf32>
    %99 = arith.addf %94, %98 : vector<4x16x16xf32>
    %cst_39 = arith.constant dense<0xFF800000> : vector<4x16xf32>
    %100 = vector.multi_reduction <maximumf>, %99, %cst_39 [2] : vector<4x16x16xf32> to vector<4x16xf32>
    %101 = vector.shape_cast %100 : vector<4x16xf32> to vector<4x16x1xf32>
    %102 = vector.broadcast %101 : vector<4x16x1xf32> to vector<4x16x16xf32>
    %103 = arith.subf %99, %102 : vector<4x16x16xf32>
    %104 = math.exp %103 : vector<4x16x16xf32>
    %cst_40 = arith.constant dense<0.000000e+00> : vector<4x16xf32>
    %105 = vector.multi_reduction <add>, %104, %cst_40 [2] : vector<4x16x16xf32> to vector<4x16xf32>
    %106 = vector.shape_cast %105 : vector<4x16xf32> to vector<4x16x1xf32>
    %107 = tpu.reciprocal %106 {approx = true} : vector<4x16x1xf32> -> vector<4x16x1xf32>
    %108 = vector.broadcast %107 : vector<4x16x1xf32> to vector<4x16x16xf32>
    %109 = arith.mulf %104, %108 : vector<4x16x16xf32>
    %110 = arith.truncf %109 : vector<4x16x16xf32> to vector<4x16x16xbf16>
    %111 = arith.truncf %91 : vector<4x16x8xf32> to vector<4x16x8xbf16>
    "tpu.trace_start"() <{level = 10 : i32, message = "wqk,wkd->wqd"}> : () -> ()
    %cst_41 = arith.constant dense<0.000000e+00> : vector<4x16x8xf32>
    %112 = tpu.matmul %110, %111, %cst_41 {dimension_numbers = #tpu.dot_dimension_numbers<[2], [1], [1], [2], [0, 0, 0, 1, 1, 2], [0], [0]>} : vector<4x16x16xbf16>, vector<4x16x8xbf16>, vector<4x16x8xf32> -> vector<4x16x8xf32>
    "tpu.trace_stop"() : () -> ()
    %113 = vector.shape_cast %112 : vector<4x16x8xf32> to vector<64x8xf32>
    %c0_42 = arith.constant 0 : index
    %c8 = arith.constant 8 : index
    %114 = vector.load %arg11[%c0_42, %c8] : memref<64x32xf32, #tpu.memory_space<vmem>>, vector<64x8xf32>
    tpu.vector_store %arg11[%c0_42, %c8], %113 {strides = array<i32>} : memref<64x32xf32, #tpu.memory_space<vmem>>, vector<64x8xf32>,
    %115 = vector.extract_strided_slice %62 {offsets = [0, 0, 16], sizes = [4, 16, 8], strides = [1, 1, 1]} : vector<4x16x96xf32> to vector<4x16x8xf32>
    %116 = vector.extract_strided_slice %62 {offsets = [0, 0, 48], sizes = [4, 16, 8], strides = [1, 1, 1]} : vector<4x16x96xf32> to vector<4x16x8xf32>
    %117 = vector.extract_strided_slice %62 {offsets = [0, 0, 80], sizes = [4, 16, 8], strides = [1, 1, 1]} : vector<4x16x96xf32> to vector<4x16x8xf32>
    %118 = arith.truncf %115 : vector<4x16x8xf32> to vector<4x16x8xbf16>
    %119 = arith.truncf %116 : vector<4x16x8xf32> to vector<4x16x8xbf16>
    "tpu.trace_start"() <{level = 10 : i32, message = "wqd,wkd->wqk"}> : () -> ()
    %cst_43 = arith.constant dense<0.000000e+00> : vector<4x16x16xf32>
    %120 = tpu.matmul %118, %119, %cst_43 {dimension_numbers = #tpu.dot_dimension_numbers<[2], [2], [1], [1], [0, 0, 0, 1, 1, 1], [0], [0]>} : vector<4x16x8xbf16>, vector<4x16x8xbf16>, vector<4x16x16xf32> -> vector<4x16x16xf32>
    "tpu.trace_stop"() : () -> ()
    %c2_44 = arith.constant 2 : index
    %c0_45 = arith.constant 0 : index
    %c0_46 = arith.constant 0 : index
    %121 = vector.load %arg5[%c2_44, %c0_45, %c0_46] : memref<4x16x16xf32, #tpu.memory_space<vmem>>, vector<1x16x16xf32>
    %122 = vector.shape_cast %121 : vector<1x16x16xf32> to vector<16x16xf32>
    %123 = vector.shape_cast %122 : vector<16x16xf32> to vector<1x16x16xf32>
    %124 = vector.broadcast %123 : vector<1x16x16xf32> to vector<4x16x16xf32>
    %125 = arith.addf %120, %124 : vector<4x16x16xf32>
    %cst_47 = arith.constant dense<0xFF800000> : vector<4x16xf32>
    %126 = vector.multi_reduction <maximumf>, %125, %cst_47 [2] : vector<4x16x16xf32> to vector<4x16xf32>
    %127 = vector.shape_cast %126 : vector<4x16xf32> to vector<4x16x1xf32>
    %128 = vector.broadcast %127 : vector<4x16x1xf32> to vector<4x16x16xf32>
    %129 = arith.subf %125, %128 : vector<4x16x16xf32>
    %130 = math.exp %129 : vector<4x16x16xf32>
    %cst_48 = arith.constant dense<0.000000e+00> : vector<4x16xf32>
    %131 = vector.multi_reduction <add>, %130, %cst_48 [2] : vector<4x16x16xf32> to vector<4x16xf32>
    %132 = vector.shape_cast %131 : vector<4x16xf32> to vector<4x16x1xf32>
    %133 = tpu.reciprocal %132 {approx = true} : vector<4x16x1xf32> -> vector<4x16x1xf32>
    %134 = vector.broadcast %133 : vector<4x16x1xf32> to vector<4x16x16xf32>
    %135 = arith.mulf %130, %134 : vector<4x16x16xf32>
    %136 = arith.truncf %135 : vector<4x16x16xf32> to vector<4x16x16xbf16>
    %137 = arith.truncf %117 : vector<4x16x8xf32> to vector<4x16x8xbf16>
    "tpu.trace_start"() <{level = 10 : i32, message = "wqk,wkd->wqd"}> : () -> ()
    %cst_49 = arith.constant dense<0.000000e+00> : vector<4x16x8xf32>
    %138 = tpu.matmul %136, %137, %cst_49 {dimension_numbers = #tpu.dot_dimension_numbers<[2], [1], [1], [2], [0, 0, 0, 1, 1, 2], [0], [0]>} : vector<4x16x16xbf16>, vector<4x16x8xbf16>, vector<4x16x8xf32> -> vector<4x16x8xf32>
    "tpu.trace_stop"() : () -> ()
    %139 = vector.shape_cast %138 : vector<4x16x8xf32> to vector<64x8xf32>
    %c0_50 = arith.constant 0 : index
    %c16 = arith.constant 16 : index
    %140 = vector.load %arg11[%c0_50, %c16] : memref<64x32xf32, #tpu.memory_space<vmem>>, vector<64x8xf32>
    tpu.vector_store %arg11[%c0_50, %c16], %139 {strides = array<i32>} : memref<64x32xf32, #tpu.memory_space<vmem>>, vector<64x8xf32>,
    %141 = vector.extract_strided_slice %62 {offsets = [0, 0, 24], sizes = [4, 16, 8], strides = [1, 1, 1]} : vector<4x16x96xf32> to vector<4x16x8xf32>
    %142 = vector.extract_strided_slice %62 {offsets = [0, 0, 56], sizes = [4, 16, 8], strides = [1, 1, 1]} : vector<4x16x96xf32> to vector<4x16x8xf32>
    %143 = vector.extract_strided_slice %62 {offsets = [0, 0, 88], sizes = [4, 16, 8], strides = [1, 1, 1]} : vector<4x16x96xf32> to vector<4x16x8xf32>
    %144 = arith.truncf %141 : vector<4x16x8xf32> to vector<4x16x8xbf16>
    %145 = arith.truncf %142 : vector<4x16x8xf32> to vector<4x16x8xbf16>
    "tpu.trace_start"() <{level = 10 : i32, message = "wqd,wkd->wqk"}> : () -> ()
    %cst_51 = arith.constant dense<0.000000e+00> : vector<4x16x16xf32>
    %146 = tpu.matmul %144, %145, %cst_51 {dimension_numbers = #tpu.dot_dimension_numbers<[2], [2], [1], [1], [0, 0, 0, 1, 1, 1], [0], [0]>} : vector<4x16x8xbf16>, vector<4x16x8xbf16>, vector<4x16x16xf32> -> vector<4x16x16xf32>
    "tpu.trace_stop"() : () -> ()
    %c3_52 = arith.constant 3 : index
    %c0_53 = arith.constant 0 : index
    %c0_54 = arith.constant 0 : index
    %147 = vector.load %arg5[%c3_52, %c0_53, %c0_54] : memref<4x16x16xf32, #tpu.memory_space<vmem>>, vector<1x16x16xf32>
    %148 = vector.shape_cast %147 : vector<1x16x16xf32> to vector<16x16xf32>
    %149 = vector.shape_cast %148 : vector<16x16xf32> to vector<1x16x16xf32>
    %150 = vector.broadcast %149 : vector<1x16x16xf32> to vector<4x16x16xf32>
    %151 = arith.addf %146, %150 : vector<4x16x16xf32>
    %cst_55 = arith.constant dense<0xFF800000> : vector<4x16xf32>
    %152 = vector.multi_reduction <maximumf>, %151, %cst_55 [2] : vector<4x16x16xf32> to vector<4x16xf32>
    %153 = vector.shape_cast %152 : vector<4x16xf32> to vector<4x16x1xf32>
    %154 = vector.broadcast %153 : vector<4x16x1xf32> to vector<4x16x16xf32>
    %155 = arith.subf %151, %154 : vector<4x16x16xf32>
    %156 = math.exp %155 : vector<4x16x16xf32>
    %cst_56 = arith.constant dense<0.000000e+00> : vector<4x16xf32>
    %157 = vector.multi_reduction <add>, %156, %cst_56 [2] : vector<4x16x16xf32> to vector<4x16xf32>
    %158 = vector.shape_cast %157 : vector<4x16xf32> to vector<4x16x1xf32>
    %159 = tpu.reciprocal %158 {approx = true} : vector<4x16x1xf32> -> vector<4x16x1xf32>
    %160 = vector.broadcast %159 : vector<4x16x1xf32> to vector<4x16x16xf32>
    %161 = arith.mulf %156, %160 : vector<4x16x16xf32>
    %162 = arith.truncf %161 : vector<4x16x16xf32> to vector<4x16x16xbf16>
    %163 = arith.truncf %143 : vector<4x16x8xf32> to vector<4x16x8xbf16>
    "tpu.trace_start"() <{level = 10 : i32, message = "wqk,wkd->wqd"}> : () -> ()
    %cst_57 = arith.constant dense<0.000000e+00> : vector<4x16x8xf32>
    %164 = tpu.matmul %162, %163, %cst_57 {dimension_numbers = #tpu.dot_dimension_numbers<[2], [1], [1], [2], [0, 0, 0, 1, 1, 2], [0], [0]>} : vector<4x16x16xbf16>, vector<4x16x8xbf16>, vector<4x16x8xf32> -> vector<4x16x8xf32>
    "tpu.trace_stop"() : () -> ()
    %165 = vector.shape_cast %164 : vector<4x16x8xf32> to vector<64x8xf32>
    %c0_58 = arith.constant 0 : index
    %c24 = arith.constant 24 : index
    %166 = vector.load %arg11[%c0_58, %c24] : memref<64x32xf32, #tpu.memory_space<vmem>>, vector<64x8xf32>
    tpu.vector_store %arg11[%c0_58, %c24], %165 {strides = array<i32>} : memref<64x32xf32, #tpu.memory_space<vmem>>, vector<64x8xf32>,
    %c0_59 = arith.constant 0 : index
    %c0_60 = arith.constant 0 : index
    %167 = vector.load %arg11[%c0_59, %c0_60] : memref<64x32xf32, #tpu.memory_space<vmem>>, vector<64x32xf32>
    %168 = arith.truncf %167 : vector<64x32xf32> to vector<64x32xbf16>
    %c0_61 = arith.constant 0 : index
    %c0_62 = arith.constant 0 : index
    %169 = vector.load %arg6[%c0_61, %c0_62] : memref<32x32xbf16, #tpu.memory_space<vmem>>, vector<32x32xbf16>
    %cst_63 = arith.constant dense<0.000000e+00> : vector<64x32xf32>
    %170 = tpu.matmul %168, %169, %cst_63 {dimension_numbers = #tpu.dot_dimension_numbers<[1], [0], [0], [1], [0, 0, 1, 1], [], []>} : vector<64x32xbf16>, vector<32x32xbf16>, vector<64x32xf32> -> vector<64x32xf32>
    %171 = vector.broadcast %2 : vector<1x32xf32> to vector<64x32xf32>
    %172 = arith.addf %170, %171 : vector<64x32xf32>
    %173 = vector.extract_strided_slice %172 {offsets = [0, 0], sizes = [4, 32], strides = [1, 1]} : vector<64x32xf32> to vector<4x32xf32>
    %174 = vector.extract_strided_slice %172 {offsets = [16, 0], sizes = [4, 32], strides = [1, 1]} : vector<64x32xf32> to vector<4x32xf32>
    %175 = vector.extract_strided_slice %172 {offsets = [4, 0], sizes = [4, 32], strides = [1, 1]} : vector<64x32xf32> to vector<4x32xf32>
    %176 = vector.extract_strided_slice %172 {offsets = [20, 0], sizes = [4, 32], strides = [1, 1]} : vector<64x32xf32> to vector<4x32xf32>
    %177 = vector.extract_strided_slice %172 {offsets = [8, 0], sizes = [4, 32], strides = [1, 1]} : vector<64x32xf32> to vector<4x32xf32>
    %178 = vector.extract_strided_slice %172 {offsets = [24, 0], sizes = [4, 32], strides = [1, 1]} : vector<64x32xf32> to vector<4x32xf32>
    %179 = vector.extract_strided_slice %172 {offsets = [12, 0], sizes = [4, 32], strides = [1, 1]} : vector<64x32xf32> to vector<4x32xf32>
    %180 = vector.extract_strided_slice %172 {offsets = [28, 0], sizes = [4, 32], strides = [1, 1]} : vector<64x32xf32> to vector<4x32xf32>
    %181 = vector.extract_strided_slice %172 {offsets = [32, 0], sizes = [4, 32], strides = [1, 1]} : vector<64x32xf32> to vector<4x32xf32>
    %182 = vector.extract_strided_slice %172 {offsets = [48, 0], sizes = [4, 32], strides = [1, 1]} : vector<64x32xf32> to vector<4x32xf32>
    %183 = vector.extract_strided_slice %172 {offsets = [36, 0], sizes = [4, 32], strides = [1, 1]} : vector<64x32xf32> to vector<4x32xf32>
    %184 = vector.extract_strided_slice %172 {offsets = [52, 0], sizes = [4, 32], strides = [1, 1]} : vector<64x32xf32> to vector<4x32xf32>
    %185 = vector.extract_strided_slice %172 {offsets = [40, 0], sizes = [4, 32], strides = [1, 1]} : vector<64x32xf32> to vector<4x32xf32>
    %186 = vector.extract_strided_slice %172 {offsets = [56, 0], sizes = [4, 32], strides = [1, 1]} : vector<64x32xf32> to vector<4x32xf32>
    %187 = vector.extract_strided_slice %172 {offsets = [44, 0], sizes = [4, 32], strides = [1, 1]} : vector<64x32xf32> to vector<4x32xf32>
    %188 = vector.extract_strided_slice %172 {offsets = [60, 0], sizes = [4, 32], strides = [1, 1]} : vector<64x32xf32> to vector<4x32xf32>
    %189 = tpu.concatenate %173, %174, %175, %176, %177, %178, %179, %180, %181, %182, %183, %184, %185, %186, %187, %188 in 0 : vector<4x32xf32>, vector<4x32xf32>, vector<4x32xf32>, vector<4x32xf32>, vector<4x32xf32>, vector<4x32xf32>, vector<4x32xf32>, vector<4x32xf32>, vector<4x32xf32>, vector<4x32xf32>, vector<4x32xf32>, vector<4x32xf32>, vector<4x32xf32>, vector<4x32xf32>, vector<4x32xf32>, vector<4x32xf32> -> vector<64x32xf32>
    %190 = arith.addf %16, %189 : vector<64x32xf32>
    %cst_64 = arith.constant dense<0.000000e+00> : vector<64xf32>
    %191 = vector.multi_reduction <add>, %190, %cst_64 [1] : vector<64x32xf32> to vector<64xf32>
    %192 = vector.shape_cast %191 : vector<64xf32> to vector<64x1xf32>
    %cst_65 = arith.constant 3.200000e+01 : f32
    %193 = vector.broadcast %cst_65 : f32 to vector<64x1xf32>
    %194 = arith.divf %192, %193 : vector<64x1xf32>
    %195 = vector.broadcast %194 : vector<64x1xf32> to vector<64x32xf32>
    %196 = arith.subf %190, %195 : vector<64x32xf32>
    %197 = arith.mulf %196, %196 : vector<64x32xf32>
    %cst_66 = arith.constant dense<0.000000e+00> : vector<64xf32>
    %198 = vector.multi_reduction <add>, %197, %cst_66 [1] : vector<64x32xf32> to vector<64xf32>
    %199 = vector.shape_cast %198 : vector<64xf32> to vector<64x1xf32>
    %cst_67 = arith.constant 3.200000e+01 : f32
    %200 = vector.broadcast %cst_67 : f32 to vector<64x1xf32>
    %201 = arith.divf %199, %200 : vector<64x1xf32>
    %202 = vector.broadcast %194 : vector<64x1xf32> to vector<64x32xf32>
    %203 = arith.subf %190, %202 : vector<64x32xf32>
    %cst_68 = arith.constant 9.99999997E-7 : f32
    %204 = vector.broadcast %cst_68 : f32 to vector<64x1xf32>
    %205 = arith.addf %201, %204 : vector<64x1xf32>
    %206 = math.rsqrt %205 : vector<64x1xf32>
    %207 = vector.broadcast %206 : vector<64x1xf32> to vector<64x32xf32>
    %208 = arith.mulf %203, %207 : vector<64x32xf32>
    %209 = vector.broadcast %3 : vector<1x32xf32> to vector<64x32xf32>
    %210 = arith.mulf %208, %209 : vector<64x32xf32>
    %211 = vector.broadcast %4 : vector<1x32xf32> to vector<64x32xf32>
    %212 = arith.addf %210, %211 : vector<64x32xf32>
    %213 = arith.truncf %212 : vector<64x32xf32> to vector<64x32xbf16>
    %c0_69 = arith.constant 0 : index
    %c0_70 = arith.constant 0 : index
    %214 = vector.load %arg8[%c0_69, %c0_70] : memref<32x128xbf16, #tpu.memory_space<vmem>>, vector<32x128xbf16>
    %cst_71 = arith.constant dense<0.000000e+00> : vector<64x128xf32>
    %215 = tpu.matmul %213, %214, %cst_71 {dimension_numbers = #tpu.dot_dimension_numbers<[1], [0], [0], [1], [0, 0, 1, 1], [], []>} : vector<64x32xbf16>, vector<32x128xbf16>, vector<64x128xf32> -> vector<64x128xf32>
    %216 = vector.broadcast %9 : vector<1x128xf32> to vector<64x128xf32>
    %217 = arith.addf %215, %216 : vector<64x128xf32>
    %218 = vector.broadcast %10 : vector<1x128xf32> to vector<64x128xf32>
    %219 = arith.mulf %217, %218 : vector<64x128xf32>
    %220 = vector.broadcast %11 : vector<1x128xf32> to vector<64x128xf32>
    %221 = arith.addf %219, %220 : vector<64x128xf32>
    %cst_72 = arith.constant 5.000000e-01 : f32
    %222 = vector.broadcast %cst_72 : f32 to vector<64x128xf32>
    %223 = arith.mulf %222, %221 : vector<64x128xf32>
    %224 = arith.mulf %221, %221 : vector<64x128xf32>
    %225 = arith.mulf %224, %221 : vector<64x128xf32>
    %cst_73 = arith.constant 4.471500e-02 : f32
    %226 = vector.broadcast %cst_73 : f32 to vector<64x128xf32>
    %227 = arith.mulf %226, %225 : vector<64x128xf32>
    %228 = arith.addf %221, %227 : vector<64x128xf32>
    %cst_74 = arith.constant 0.797884583 : f32
    %229 = vector.broadcast %cst_74 : f32 to vector<64x128xf32>
    %230 = arith.mulf %229, %228 : vector<64x128xf32>
    %231 = math.tanh %230 : vector<64x128xf32>
    %cst_75 = arith.constant 1.000000e+00 : f32
    %232 = vector.broadcast %cst_75 : f32 to vector<64x128xf32>
    %233 = arith.addf %232, %231 : vector<64x128xf32>
    %234 = arith.mulf %223, %233 : vector<64x128xf32>
    %235 = vector.shape_cast %234 : vector<64x128xf32> to vector<8x8x128xf32>
    %cst_76 = arith.constant 0.000000e+00 : f32
    %236 = vector.broadcast %cst_76 : f32 to vector<1x8x128xf32>
    %237 = tpu.concatenate %236, %235, %236 in 0 : vector<1x8x128xf32>, vector<8x8x128xf32>, vector<1x8x128xf32> -> vector<10x8x128xf32>
    %cst_77 = arith.constant 0.000000e+00 : f32
    %238 = vector.broadcast %cst_77 : f32 to vector<10x1x128xf32>
    %239 = tpu.concatenate %238, %237, %238 in 1 : vector<10x1x128xf32>, vector<10x8x128xf32>, vector<10x1x128xf32> -> vector<10x10x128xf32>
    %cst_78 = arith.constant 0.000000e+00 : f32
    %240 = vector.broadcast %cst_78 : f32 to vector<8x8x128xf32>
    %241 = vector.extract_strided_slice %239 {offsets = [0, 0, 0], sizes = [8, 8, 128], strides = [1, 1, 1]} : vector<10x10x128xf32> to vector<8x8x128xf32>
    %c0_79 = arith.constant 0 : index
    %c0_80 = arith.constant 0 : index
    %242 = vector.load %arg7[%c0_79, %c0_80] : memref<15x128xf32, #tpu.memory_space<vmem>>, vector<1x128xf32>
    %243 = vector.shape_cast %242 : vector<1x128xf32> to vector<1x1x128xf32>
    %244 = vector.broadcast %243 : vector<1x1x128xf32> to vector<8x8x128xf32>
    %245 = arith.mulf %241, %244 : vector<8x8x128xf32>
    %246 = arith.addf %240, %245 : vector<8x8x128xf32>
    %247 = vector.extract_strided_slice %239 {offsets = [0, 1, 0], sizes = [8, 8, 128], strides = [1, 1, 1]} : vector<10x10x128xf32> to vector<8x8x128xf32>
    %c1_81 = arith.constant 1 : index
    %c0_82 = arith.constant 0 : index
    %248 = vector.load %arg7[%c1_81, %c0_82] : memref<15x128xf32, #tpu.memory_space<vmem>>, vector<1x128xf32>
    %249 = vector.shape_cast %248 : vector<1x128xf32> to vector<1x1x128xf32>
    %250 = vector.broadcast %249 : vector<1x1x128xf32> to vector<8x8x128xf32>
    %251 = arith.mulf %247, %250 : vector<8x8x128xf32>
    %252 = arith.addf %246, %251 : vector<8x8x128xf32>
    %253 = vector.extract_strided_slice %239 {offsets = [0, 2, 0], sizes = [8, 8, 128], strides = [1, 1, 1]} : vector<10x10x128xf32> to vector<8x8x128xf32>
    %c2_83 = arith.constant 2 : index
    %c0_84 = arith.constant 0 : index
    %254 = vector.load %arg7[%c2_83, %c0_84] : memref<15x128xf32, #tpu.memory_space<vmem>>, vector<1x128xf32>
    %255 = vector.shape_cast %254 : vector<1x128xf32> to vector<1x1x128xf32>
    %256 = vector.broadcast %255 : vector<1x1x128xf32> to vector<8x8x128xf32>
    %257 = arith.mulf %253, %256 : vector<8x8x128xf32>
    %258 = arith.addf %252, %257 : vector<8x8x128xf32>
    %259 = vector.extract_strided_slice %239 {offsets = [1, 0, 0], sizes = [8, 8, 128], strides = [1, 1, 1]} : vector<10x10x128xf32> to vector<8x8x128xf32>
    %c3_85 = arith.constant 3 : index
    %c0_86 = arith.constant 0 : index
    %260 = vector.load %arg7[%c3_85, %c0_86] : memref<15x128xf32, #tpu.memory_space<vmem>>, vector<1x128xf32>
    %261 = vector.shape_cast %260 : vector<1x128xf32> to vector<1x1x128xf32>
    %262 = vector.broadcast %261 : vector<1x1x128xf32> to vector<8x8x128xf32>
    %263 = arith.mulf %259, %262 : vector<8x8x128xf32>
    %264 = arith.addf %258, %263 : vector<8x8x128xf32>
    %265 = vector.extract_strided_slice %239 {offsets = [1, 1, 0], sizes = [8, 8, 128], strides = [1, 1, 1]} : vector<10x10x128xf32> to vector<8x8x128xf32>
    %c4_87 = arith.constant 4 : index
    %c0_88 = arith.constant 0 : index
    %266 = vector.load %arg7[%c4_87, %c0_88] : memref<15x128xf32, #tpu.memory_space<vmem>>, vector<1x128xf32>
    %267 = vector.shape_cast %266 : vector<1x128xf32> to vector<1x1x128xf32>
    %268 = vector.broadcast %267 : vector<1x1x128xf32> to vector<8x8x128xf32>
    %269 = arith.mulf %265, %268 : vector<8x8x128xf32>
    %270 = arith.addf %264, %269 : vector<8x8x128xf32>
    %271 = vector.extract_strided_slice %239 {offsets = [1, 2, 0], sizes = [8, 8, 128], strides = [1, 1, 1]} : vector<10x10x128xf32> to vector<8x8x128xf32>
    %c5_89 = arith.constant 5 : index
    %c0_90 = arith.constant 0 : index
    %272 = vector.load %arg7[%c5_89, %c0_90] : memref<15x128xf32, #tpu.memory_space<vmem>>, vector<1x128xf32>
    %273 = vector.shape_cast %272 : vector<1x128xf32> to vector<1x1x128xf32>
    %274 = vector.broadcast %273 : vector<1x1x128xf32> to vector<8x8x128xf32>
    %275 = arith.mulf %271, %274 : vector<8x8x128xf32>
    %276 = arith.addf %270, %275 : vector<8x8x128xf32>
    %277 = vector.extract_strided_slice %239 {offsets = [2, 0, 0], sizes = [8, 8, 128], strides = [1, 1, 1]} : vector<10x10x128xf32> to vector<8x8x128xf32>
    %c6_91 = arith.constant 6 : index
    %c0_92 = arith.constant 0 : index
    %278 = vector.load %arg7[%c6_91, %c0_92] : memref<15x128xf32, #tpu.memory_space<vmem>>, vector<1x128xf32>
    %279 = vector.shape_cast %278 : vector<1x128xf32> to vector<1x1x128xf32>
    %280 = vector.broadcast %279 : vector<1x1x128xf32> to vector<8x8x128xf32>
    %281 = arith.mulf %277, %280 : vector<8x8x128xf32>
    %282 = arith.addf %276, %281 : vector<8x8x128xf32>
    %283 = vector.extract_strided_slice %239 {offsets = [2, 1, 0], sizes = [8, 8, 128], strides = [1, 1, 1]} : vector<10x10x128xf32> to vector<8x8x128xf32>
    %c7_93 = arith.constant 7 : index
    %c0_94 = arith.constant 0 : index
    %284 = vector.load %arg7[%c7_93, %c0_94] : memref<15x128xf32, #tpu.memory_space<vmem>>, vector<1x128xf32>
    %285 = vector.shape_cast %284 : vector<1x128xf32> to vector<1x1x128xf32>
    %286 = vector.broadcast %285 : vector<1x1x128xf32> to vector<8x8x128xf32>
    %287 = arith.mulf %283, %286 : vector<8x8x128xf32>
    %288 = arith.addf %282, %287 : vector<8x8x128xf32>
    %289 = vector.extract_strided_slice %239 {offsets = [2, 2, 0], sizes = [8, 8, 128], strides = [1, 1, 1]} : vector<10x10x128xf32> to vector<8x8x128xf32>
    %c8_95 = arith.constant 8 : index
    %c0_96 = arith.constant 0 : index
    %290 = vector.load %arg7[%c8_95, %c0_96] : memref<15x128xf32, #tpu.memory_space<vmem>>, vector<1x128xf32>
    %291 = vector.shape_cast %290 : vector<1x128xf32> to vector<1x1x128xf32>
    %292 = vector.broadcast %291 : vector<1x1x128xf32> to vector<8x8x128xf32>
    %293 = arith.mulf %289, %292 : vector<8x8x128xf32>
    %294 = arith.addf %288, %293 : vector<8x8x128xf32>
    %295 = vector.shape_cast %294 : vector<8x8x128xf32> to vector<64x128xf32>
    %296 = vector.broadcast %8 : vector<1x128xf32> to vector<64x128xf32>
    %297 = arith.addf %295, %296 : vector<64x128xf32>
    %298 = vector.broadcast %12 : vector<1x128xf32> to vector<64x128xf32>
    %299 = arith.mulf %297, %298 : vector<64x128xf32>
    %300 = vector.broadcast %13 : vector<1x128xf32> to vector<64x128xf32>
    %301 = arith.addf %299, %300 : vector<64x128xf32>
    %cst_97 = arith.constant 5.000000e-01 : f32
    %302 = vector.broadcast %cst_97 : f32 to vector<64x128xf32>
    %303 = arith.mulf %302, %301 : vector<64x128xf32>
    %304 = arith.mulf %301, %301 : vector<64x128xf32>
    %305 = arith.mulf %304, %301 : vector<64x128xf32>
    %cst_98 = arith.constant 4.471500e-02 : f32
    %306 = vector.broadcast %cst_98 : f32 to vector<64x128xf32>
    %307 = arith.mulf %306, %305 : vector<64x128xf32>
    %308 = arith.addf %301, %307 : vector<64x128xf32>
    %cst_99 = arith.constant 0.797884583 : f32
    %309 = vector.broadcast %cst_99 : f32 to vector<64x128xf32>
    %310 = arith.mulf %309, %308 : vector<64x128xf32>
    %311 = math.tanh %310 : vector<64x128xf32>
    %cst_100 = arith.constant 1.000000e+00 : f32
    %312 = vector.broadcast %cst_100 : f32 to vector<64x128xf32>
    %313 = arith.addf %312, %311 : vector<64x128xf32>
    %314 = arith.mulf %303, %313 : vector<64x128xf32>
    %315 = arith.truncf %314 : vector<64x128xf32> to vector<64x128xbf16>
    %c0_101 = arith.constant 0 : index
    %c0_102 = arith.constant 0 : index
    %316 = vector.load %arg9[%c0_101, %c0_102] : memref<128x32xbf16, #tpu.memory_space<vmem>>, vector<128x32xbf16>
    %cst_103 = arith.constant dense<0.000000e+00> : vector<64x32xf32>
    %317 = tpu.matmul %315, %316, %cst_103 {dimension_numbers = #tpu.dot_dimension_numbers<[1], [0], [0], [1], [0, 0, 1, 1], [], []>} : vector<64x128xbf16>, vector<128x32xbf16>, vector<64x32xf32> -> vector<64x32xf32>
    %318 = vector.broadcast %5 : vector<1x32xf32> to vector<64x32xf32>
    %319 = arith.addf %317, %318 : vector<64x32xf32>
    %320 = vector.broadcast %6 : vector<1x32xf32> to vector<64x32xf32>
    %321 = arith.mulf %319, %320 : vector<64x32xf32>
    %322 = vector.broadcast %7 : vector<1x32xf32> to vector<64x32xf32>
    %323 = arith.addf %321, %322 : vector<64x32xf32>
    %cst_104 = arith.constant 5.000000e-01 : f32
    %324 = vector.broadcast %cst_104 : f32 to vector<64x32xf32>
    %325 = arith.mulf %324, %323 : vector<64x32xf32>
    %326 = arith.mulf %323, %323 : vector<64x32xf32>
    %327 = arith.mulf %326, %323 : vector<64x32xf32>
    %cst_105 = arith.constant 4.471500e-02 : f32
    %328 = vector.broadcast %cst_105 : f32 to vector<64x32xf32>
    %329 = arith.mulf %328, %327 : vector<64x32xf32>
    %330 = arith.addf %323, %329 : vector<64x32xf32>
    %cst_106 = arith.constant 0.797884583 : f32
    %331 = vector.broadcast %cst_106 : f32 to vector<64x32xf32>
    %332 = arith.mulf %331, %330 : vector<64x32xf32>
    %333 = math.tanh %332 : vector<64x32xf32>
    %cst_107 = arith.constant 1.000000e+00 : f32
    %334 = vector.broadcast %cst_107 : f32 to vector<64x32xf32>
    %335 = arith.addf %334, %333 : vector<64x32xf32>
    %336 = arith.mulf %325, %335 : vector<64x32xf32>
    %337 = arith.addf %190, %336 : vector<64x32xf32>
    %338 = tpu.transpose %337, [1, 0] : vector<64x32xf32> -> vector<32x64xf32>
    %c0_108 = arith.constant 0 : index
    %c0_109 = arith.constant 0 : index
    %c0_110 = arith.constant 0 : index
    %339 = vector.load %arg10[%c0_108, %c0_109, %c0_110] : memref<1x32x64xf32, #tpu.memory_space<vmem>>, vector<1x32x64xf32>
    %340 = vector.shape_cast %339 : vector<1x32x64xf32> to vector<32x64xf32>
    %341 = vector.shape_cast %338 : vector<32x64xf32> to vector<1x32x64xf32>
    tpu.vector_store %arg10[%c0_108, %c0_109, %c0_110], %341 {strides = array<i32>} : memref<1x32x64xf32, #tpu.memory_space<vmem>>, vector<1x32x64xf32>,
    return
  }
  func.func @transform_0(%arg0: i32) -> (i32, i32, i32) {
    %c0_i32 = arith.constant 0 : i32
    %c0_i32_0 = arith.constant 0 : i32
    %c0_i32_1 = arith.constant 0 : i32
    return %arg0, %c0_i32, %c0_i32_0 : i32, i32, i32
  }
  func.func @transform_1(%arg0: i32) -> (i32, i32) {
    %c0_i32 = arith.constant 0 : i32
    %c0_i32_0 = arith.constant 0 : i32
    %c0_i32_1 = arith.constant 0 : i32
    return %c0_i32, %c0_i32_0 : i32, i32
  }
  func.func @transform_2(%arg0: i32) -> (i32, i32) {
    %c0_i32 = arith.constant 0 : i32
    %c0_i32_0 = arith.constant 0 : i32
    %c0_i32_1 = arith.constant 0 : i32
    return %c0_i32, %c0_i32_0 : i32, i32
  }
  func.func @transform_3(%arg0: i32) -> (i32, i32) {
    %c0_i32 = arith.constant 0 : i32
    %c0_i32_0 = arith.constant 0 : i32
    %c0_i32_1 = arith.constant 0 : i32
    return %c0_i32, %c0_i32_0 : i32, i32
  }
  func.func @transform_4(%arg0: i32) -> (i32, i32, i32) {
    %c0_i32 = arith.constant 0 : i32
    %c0_i32_0 = arith.constant 0 : i32
    %c0_i32_1 = arith.constant 0 : i32
    %c0_i32_2 = arith.constant 0 : i32
    return %c0_i32, %c0_i32_0, %c0_i32_1 : i32, i32, i32
  }
  func.func @transform_5(%arg0: i32) -> (i32, i32) {
    %c0_i32 = arith.constant 0 : i32
    %c0_i32_0 = arith.constant 0 : i32
    %c0_i32_1 = arith.constant 0 : i32
    return %c0_i32, %c0_i32_0 : i32, i32
  }
  func.func @transform_6(%arg0: i32) -> (i32, i32) {
    %c0_i32 = arith.constant 0 : i32
    %c0_i32_0 = arith.constant 0 : i32
    %c0_i32_1 = arith.constant 0 : i32
    return %c0_i32, %c0_i32_0 : i32, i32
  }
  func.func @transform_7(%arg0: i32) -> (i32, i32) {
    %c0_i32 = arith.constant 0 : i32
    %c0_i32_0 = arith.constant 0 : i32
    %c0_i32_1 = arith.constant 0 : i32
    return %c0_i32, %c0_i32_0 : i32, i32
  }
  func.func @transform_8(%arg0: i32) -> (i32, i32) {
    %c0_i32 = arith.constant 0 : i32
    %c0_i32_0 = arith.constant 0 : i32
    %c0_i32_1 = arith.constant 0 : i32
    return %c0_i32, %c0_i32_0 : i32, i32
  }
  func.func @transform_9(%arg0: i32) -> (i32, i32, i32) {
    %c0_i32 = arith.constant 0 : i32
    %c0_i32_0 = arith.constant 0 : i32
    %c0_i32_1 = arith.constant 0 : i32
    return %arg0, %c0_i32, %c0_i32_0 : i32, i32, i32
  }
}

</mosaic_0001>

<bundles_post_ra>
// kernel: general_transformer_block.1
= control target key start
LH: loop header
LB: loop body
LE: loop exit
PB: predicated region body
PF: predicated region fallthrough
CT: control target
= control target key end

     0   :  { %s3870_s30 = smov 0   ;;  %s5180_s0 = inlined_call_operand.vmem [shape: f32[2,32,64], index: 0, kind: input, shape index: {}]   ;;  %s5181_s1 = inlined_call_operand.vmem [shape: f32[8,32], index: 1, kind: input, shape index: {}]   ;;  %s5182_s2 = inlined_call_operand.vmem [shape: f32[1,96], index: 2, kind: input, shape index: {}]   ;;  %s5183_s3 = inlined_call_operand.vmem [shape: bf16[32,96], index: 3, kind: input, shape index: {}]   ;;  %s5184_s4 = inlined_call_operand.vmem [shape: f32[4,16,16], index: 4, kind: input, shape index: {}]   ;;  %s5185_s5 = inlined_call_operand.vmem [shape: bf16[32,32], index: 5, kind: input, shape index: {}]   ;;  %s5186_s6 = inlined_call_operand.vmem [shape: f32[15,128], index: 6, kind: input, shape index: {}]   ;;  %s5187_s7 = inlined_call_operand.vmem [shape: bf16[32,128], index: 7, kind: input, shape index: {}]   ;;  %s5188_s8 = inlined_call_operand.vmem [shape: bf16[128,32], index: 8, kind: input, shape index: {}]   ;;  %s5189_s9 = inlined_call_operand.vmem [shape: f32[2,32,64], index: 9, kind: output, shape index: {}]  }
   0x1 LB: > { %s3405_s10 = sadd.s32 4294967295, %s3802_s30   ;;  %p3409_p0 = scmp.ge.s32.totalorder %s3802_s30, 1  ;;  %s3802_s30 = sphi %s3870_s30, %s19_s30  }
   0x2   : > { %p287_p1 = scmp.lt.s32.totalorder %s3802_s30, 3 }
   0x4   : > { %p288_p2 = pnand %p3409_p0, %p287_p1 }
   0x5   : > { %p323_p3 = scmp.lt.s32.totalorder (!%p288_p2), %s3405_s10, 1  ;;  %s3805_s25 = smov (!%p288_p2), 64  }
   0x6   : > { %291 = sbr.rel (%p288_p2) target bundleno = 3872 (0xf20), region = 56  ;;  %s3806_s26 = smov (!%p288_p2), 96  }
   0x7   : > { %s3807_s27 = smov (!%p288_p2), 88   ;;  %s3809_s15 = smov (!%p288_p2), 80  }
   0x8   : > { %s3810_s20 = smov (!%p288_p2), 56   ;;  %s3811_s21 = smov (!%p288_p2), 112  }
   0x9   : > { %s3812_s22 = smov (!%p288_p2), 48   ;;  %s3814_s28 = smov (!%p288_p2), 104  }
   0xa   : > { %s3816_s16 = smov (!%p288_p2), 8   ;;  %s3817_s17 = smov (!%p288_p2), 16  }
   0xb   : > { %s5193_s10 = smov (!%p323_p3, %s3405_s10), 1  ;;  %vm384_vm0 = vcmask 261120   ;;  %v3804_v18 = vmov 32.0   ;;  %v3525_v62 = vld [vmem:[%s5183_s3 + $0x8] sm:$0xff]  ;;  %s3818_s18 = smov 24  }
   0xc   : > { %s3522_s11 = sshll.u32 %s5193_s10, 5  ;;  %3586 = vrcp.f32 %v3804_v18  ;;  %628 = vmatpush.bf16.msra.mxu0 %v3525_v62 }
   0xd   : > { %s327_s14 = scalar_lea.vmem %s5180_s0, %s3522_s11 }
   0xe   : > { %v348_v0 = vld [vmem:[%s327_s14] sm:$0xff]  ;;  %v349_v1 = vld [vmem:[%s327_s14 + $0x8] sm:$0xff]  ;;  %v350_v2 = vld [vmem:[%s327_s14 + $0x10] sm:$0xff] }
   0xf   : > { %352 = vxpose.xlu0.b32.start [1/4] (short) (narrow) %v348_v0, 64  ;;  %v351_v3 = vld [vmem:[%s327_s14 + $0x18] sm:$0xff]  ;;  %s3808_s14 = smov 120  }
  0x12   : > { %v3587_v19 = vpop.eup %3586 }
  0x13   : > { %v410_v20 = vmul.f32 32.0, %v3587_v19  ;;  %vm414_vm1 = vweird.f32 %v3587_v19 }
  0x15   : > { %v411_v21 = vsub.f32 1.0, %v410_v20 }
  0x17   : > { %353 = vxpose.xlu0.b32.cont [2/4] (short) (narrow) %v349_v1, 64  ;;  %v412_v22 = vmul.f32 %v3587_v19, %v411_v21  ;;  %v3524_v1 = vld [vmem:[%s5183_s3] sm:$0xff] }
  0x18   : > { %629 = vmatpush.bf16.msra.mxu0 %v3524_v1 }
  0x19   : > { %v413_v23 = vadd.f32 %v3587_v19, %v412_v22 }
  0x1b   : > { %v3914_v24 = vsel %vm414_vm1, %v3587_v19, %v413_v23 }
  0x1f   : > { %354 = vxpose.xlu0.b32.cont [3/4] (short) (narrow) %v350_v2, 64 }
  0x27   : > { %355 = vxpose.xlu0.b32.end [4/4] (short) (narrow) %v351_v3, 64 }
  0xb3   : > { %v3886_v4 = vpop.trf.xlu0 }
  0xb4   : > { %v385_v5 = vsel %vm384_vm0, %v3886_v4, 0.0 }
  0xb5   : > { %386 = vadd.xlane.f32.xlu1 %v385_v5 }
  0xbb   : > { %v3890_v6 = vpop.trf.xlu0 }
  0xbc   : > { %v388_v7 = vsel %vm384_vm0, %v3890_v6, 0.0 }
  0xbd   : > { %389 = vadd.xlane.f32.xlu1 %v388_v7 }
  0xc3   : > { %v3894_v8 = vpop.trf.xlu0 }
  0xc4   : > { %v391_v9 = vsel %vm384_vm0, %v3894_v8, 0.0 }
  0xc5   : > { %392 = vadd.xlane.f32.xlu2 %v391_v9 }
  0xcb   : > { %v3898_v10 = vpop.trf.xlu0 }
  0xcc   : > { %v394_v11 = vsel %vm384_vm0, %v3898_v10, 0.0 }
  0xcd   : > { %395 = vadd.xlane.f32.xlu2 %v394_v11 }
  0xd3   : > { %v3902_v12 = vpop.trf.xlu0 }
  0xd4   : > { %v397_v13 = vsel %vm384_vm0, %v3902_v12, 0.0 }
  0xd5   : > { %398 = vadd.xlane.f32.xlu1 %v397_v13 }
  0xdb   : > { %v3906_v14 = vpop.trf.xlu0 }
  0xdc   : > { %v400_v15 = vsel %vm384_vm0, %v3906_v14, 0.0 }
  0xdd   : > { %401 = vadd.xlane.f32.xlu2 %v400_v15 }
  0xe3   : > { %v3910_v16 = vpop.trf.xlu0 }
  0xe4   : > { %v403_v17 = vsel %vm384_vm0, %v3910_v16, 0.0 }
  0xe5   : > { %404 = vadd.xlane.f32.xlu0 %v403_v17 }
  0xeb   : > { %v3924_v32 = vpop.trf.xlu0 }
  0xec   : > { %v406_v35 = vsel %vm384_vm0, %v3924_v32, 0.0 }
 0x128   : > { %v387_v25 = vpop.xlane.xlu1 %386 }
 0x129   : > { %v416_v26 = vmul.f32 %v3914_v24, %v387_v25 }
 0x12b   : > { %v3918_v27 = vsub.f32 %v3886_v4, %v416_v26 }
 0x12d   : > { %v432_v28 = vmul.f32 %v3918_v27, %v3918_v27 }
 0x12f   : > { %v440_v29 = vsel %vm384_vm0, %v432_v28, 0.0 }
 0x130   : > { %v390_v30 = vpop.xlane.xlu1 %389  ;;  %441 = vadd.xlane.f32.xlu1 %v440_v29 }
 0x131   : > { %v417_v31 = vmul.f32 %v3914_v24, %v390_v30 }
 0x133   : > { %v3927_v33 = vsub.f32 %v3890_v6, %v417_v31 }
 0x135   : > { %v433_v34 = vmul.f32 %v3927_v33, %v3927_v33 }
 0x137   : > { %v443_v36 = vsel %vm384_vm0, %v433_v34, 0.0 }
 0x138   : > { %v393_v37 = vpop.xlane.xlu2 %392  ;;  %444 = vadd.xlane.f32.xlu2 %v443_v36  ;;  %407 = vadd.xlane.f32.xlu1 %v406_v35 }
 0x139   : > { %v418_v38 = vmul.f32 %v3914_v24, %v393_v37 }
 0x13b   : > { %v3936_v39 = vsub.f32 %v3894_v8, %v418_v38 }
 0x13d   : > { %v434_v40 = vmul.f32 %v3936_v39, %v3936_v39 }
 0x13f   : > { %v446_v41 = vsel %vm384_vm0, %v434_v40, 0.0 }
 0x140   : > { %v396_v42 = vpop.xlane.xlu2 %395  ;;  %447 = vadd.xlane.f32.xlu2 %v446_v41 }
 0x141   : > { %v419_v43 = vmul.f32 %v3914_v24, %v396_v42 }
 0x143   : > { %v3943_v44 = vsub.f32 %v3898_v10, %v419_v43  ;;  %v3990_v43 = vld [vmem:[%s5181_s1] ss:$0 sm:$0xff] }
 0x145   : > { %v435_v45 = vmul.f32 %v3943_v44, %v3943_v44 }
 0x147   : > { %v449_v46 = vsel %vm384_vm0, %v435_v45, 0.0 }
 0x148   : > { %v399_v47 = vpop.xlane.xlu1 %398  ;;  %450 = vadd.xlane.f32.xlu1 %v449_v46 }
 0x149   : > { %v420_v48 = vmul.f32 %v3914_v24, %v399_v47 }
 0x14b   : > { %v3950_v49 = vsub.f32 %v3902_v12, %v420_v48 }
 0x14d   : > { %v436_v50 = vmul.f32 %v3950_v49, %v3950_v49 }
 0x14f   : > { %v452_v51 = vsel %vm384_vm0, %v436_v50, 0.0 }
 0x150   : > { %453 = vadd.xlane.f32.xlu2 %v452_v51  ;;  %v402_v52 = vpop.xlane.xlu2 %401 }
 0x151   : > { %v421_v53 = vmul.f32 %v3914_v24, %v402_v52 }
 0x153   : > { %v3957_v54 = vsub.f32 %v3906_v14, %v421_v53 }
 0x155   : > { %v437_v55 = vmul.f32 %v3957_v54, %v3957_v54 }
 0x157   : > { %v455_v56 = vsel %vm384_vm0, %v437_v55, 0.0 }
 0x158   : > { %456 = vadd.xlane.f32.xlu1 %v455_v56  ;;  %v405_v57 = vpop.xlane.xlu0 %404 }
 0x159   : > { %v422_v58 = vmul.f32 %v3914_v24, %v405_v57 }
 0x15b   : > { %v3964_v59 = vsub.f32 %v3910_v16, %v422_v58 }
 0x15d   : > { %v438_v60 = vmul.f32 %v3964_v59, %v3964_v59 }
 0x15f   : > { %v458_v61 = vsel %vm384_vm0, %v438_v60, 0.0 }
 0x160   : > { %459 = vadd.xlane.f32.xlu2 %v458_v61 }
 0x1a3   : > { %v442_v63 = vpop.xlane.xlu1 %441 }
 0x1a4   : > { %v464_v0 = vmul.f32 %v442_v63, %v3914_v24 }
 0x1a6   : > { %v472_v2 = vadd.f32 1e-06, %v464_v0 }
 0x1a8   : > { %3588 = vrsqrt.f32 %v472_v2  ;;  %vm486_vm3 = vweird.f32 %v472_v2 }
 0x1ab   : > { %v445_v3 = vpop.xlane.xlu2 %444  ;;  %v408_v5 = vpop.xlane.xlu1 %407 }
 0x1ac   : > { %v465_v7 = vmul.f32 %v445_v3, %v3914_v24  ;;  %v423_v9 = vmul.f32 %v3914_v24, %v408_v5 }
 0x1ae   : > { %v3589_v11 = vpop.eup %3588  ;;  %v473_v13 = vadd.f32 1e-06, %v465_v7  ;;  %v3979_v15 = vsub.f32 %v3924_v32, %v423_v9 }
 0x1af   : > { %v481_v17 = vmul.f32 %v3589_v11, %v472_v2  ;;  %vm487_vm2 = vweird.f32 %v3589_v11 }
 0x1b0   : > { %3590 = vrsqrt.f32 %v473_v13  ;;  %v439_v18 = vmul.f32 %v3979_v15, %v3979_v15  ;;  %vm488_vm4 = vmor %vm486_vm3, %vm487_vm2  ;;  %vm496_vm6 = vweird.f32 %v473_v13 }
 0x1b1   : > { %v482_v19 = vmul.f32 %v3589_v11, %v481_v17 }
 0x1b2   : > { %v461_v20 = vsel %vm384_vm0, %v439_v18, 0.0 }
 0x1b3   : > { %v483_v21 = vmul.f32 0.5, %v482_v19  ;;  %v448_v22 = vpop.xlane.xlu2 %447  ;;  %462 = vadd.xlane.f32.xlu1 %v461_v20 }
 0x1b4   : > { %v466_v23 = vmul.f32 %v448_v22, %v3914_v24 }
 0x1b5   : > { %v484_v25 = vsub.f32 1.5, %v483_v21 }
 0x1b6   : > { %v3591_v26 = vpop.eup %3590  ;;  %v474_v28 = vadd.f32 1e-06, %v466_v23 }
 0x1b7   : > { %v485_v29 = vmul.f32 %v3589_v11, %v484_v25  ;;  %v491_v30 = vmul.f32 %v3591_v26, %v473_v13  ;;  %vm497_vm5 = vweird.f32 %v3591_v26 }
 0x1b8   : > { %3592 = vrsqrt.f32 %v474_v28  ;;  %vm498_vm7 = vmor %vm496_vm6, %vm497_vm5  ;;  %vm506_vm9 = vweird.f32 %v474_v28 }
 0x1b9   : > { %v492_v31 = vmul.f32 %v3591_v26, %v491_v30  ;;  %v489_v34 = vsel %vm488_vm4, %v3589_v11, %v485_v29 }
 0x1ba   : > { %v560_v41 = vmul.f32 %v489_v34, %v3918_v27  ;;  %v3997_v27 = vld [vmem:[%s5181_s1 + $0x1] ss:$0 sm:$0xff] }
 0x1bb   : > { %v493_v35 = vmul.f32 0.5, %v492_v31  ;;  %v451_v36 = vpop.xlane.xlu1 %450 }
 0x1bc   : > { %v467_v37 = vmul.f32 %v451_v36, %v3914_v24  ;;  %v569_v51 = vmul.f32 %v3990_v43, %v560_v41 }
 0x1bd   : > { %v494_v38 = vsub.f32 1.5, %v493_v35 }
 0x1be   : > { %v3593_v40 = vpop.eup %3592  ;;  %v475_v42 = vadd.f32 1e-06, %v467_v37  ;;  %v578_v61 = vadd.f32 %v3997_v27, %v569_v51 }
 0x1bf   : > { %v495_v45 = vmul.f32 %v3591_v26, %v494_v38  ;;  %v501_v46 = vmul.f32 %v3593_v40, %v474_v28  ;;  %vm507_vm8 = vweird.f32 %v3593_v40 }
 0x1c0   : > { %3594 = vrsqrt.f32 %v475_v42  ;;  %vm508_vm10 = vmor %vm506_vm9, %vm507_vm8  ;;  %vm516_vm12 = vweird.f32 %v475_v42 }
 0x1c1   : > { %v499_v47 = vsel %vm498_vm7, %v3591_v26, %v495_v45  ;;  %v502_v48 = vmul.f32 %v3593_v40, %v501_v46 }
 0x1c2   : > { %v561_v50 = vmul.f32 %v499_v47, %v3927_v33 }
 0x1c3   : > { %v503_v52 = vmul.f32 0.5, %v502_v48  ;;  %v454_v53 = vpop.xlane.xlu2 %453 }
 0x1c4   : > { %v468_v55 = vmul.f32 %v454_v53, %v3914_v24  ;;  %v570_v56 = vmul.f32 %v3990_v43, %v561_v50 }
 0x1c5   : > { %v504_v57 = vsub.f32 1.5, %v503_v52 }
 0x1c6   : > { %v3595_v58 = vpop.eup %3594  ;;  %v476_v60 = vadd.f32 1e-06, %v468_v55  ;;  %v579_v33 = vadd.f32 %v3997_v27, %v570_v56 }
 0x1c7   : > { %v505_v62 = vmul.f32 %v3593_v40, %v504_v57  ;;  %v511_v63 = vmul.f32 %v3595_v58, %v475_v42  ;;  %vm517_vm11 = vweird.f32 %v3595_v58 }
 0x1c8   : > { %3596 = vrsqrt.f32 %v476_v60  ;;  %v586_v0 = vpack.c.bf16 %v579_v33, %v578_v61  ;;  %vm518_vm13 = vmor %vm516_vm12, %vm517_vm11  ;;  %vm526_vm15 = vweird.f32 %v476_v60  ;;  %vm675_vm11 = vcmask 1043456  }
 0x1c9   : > { %v512_v1 = vmul.f32 %v3595_v58, %v511_v63  ;;  %v509_v2 = vsel %vm508_vm10, %v3593_v40, %v505_v62  ;;  %vm701_vm12 = vcmask 64512  }
 0x1ca   : > { %3422 = vmatmul.msk.bf16.vlgmr.msra.gmra.mxu0 %vm384_vm0, %v586_v0  ;;  %v562_v17 = vmul.f32 %v509_v2, %v3936_v39 }
 0x1cb   : > { %v513_v3 = vmul.f32 0.5, %v512_v1  ;;  %v457_v5 = vpop.xlane.xlu1 %456 }
 0x1cc   : > { %v469_v7 = vmul.f32 %v457_v5, %v3914_v24  ;;  %v571_v23 = vmul.f32 %v3990_v43, %v562_v17 }
 0x1cd   : > { %v514_v9 = vsub.f32 1.5, %v513_v3 }
 0x1ce   : > { %v3597_v11 = vpop.eup %3596  ;;  %v477_v13 = vadd.f32 1e-06, %v469_v7  ;;  %v580_v30 = vadd.f32 %v3997_v27, %v571_v23 }
 0x1cf   : > { %v515_v18 = vmul.f32 %v3595_v58, %v514_v9  ;;  %v521_v19 = vmul.f32 %v3597_v11, %v476_v60  ;;  %vm527_vm14 = vweird.f32 %v3597_v11 }
 0x1d0   : > { %3598 = vrsqrt.f32 %v477_v13  ;;  %vm528_vm1 = vmor %vm526_vm15, %vm527_vm14  ;;  %vm536_vm3 = vweird.f32 %v477_v13  ;;  %vm1335_vm14 = vcmask 130112   ;;  %vm1671_vm15 = vcmask 195712  }
 0x1d1   : > { %v519_v20 = vsel %vm518_vm13, %v3595_v58, %v515_v18  ;;  %v522_v21 = vmul.f32 %v3597_v11, %v521_v19  ;;  %vm803_vm13 = vcmask 130048  }
 0x1d2   : > { %v563_v22 = vmul.f32 %v519_v20, %v3943_v44 }
 0x1d3   : > { %v523_v25 = vmul.f32 0.5, %v522_v21  ;;  %v460_v52 = vpop.xlane.xlu2 %459 }
 0x1d4   : > { %v572_v26 = vmul.f32 %v3990_v43, %v563_v22 }
 0x1d5   : > { %v524_v28 = vsub.f32 1.5, %v523_v25 }
 0x1d6   : > { %v3599_v29 = vpop.eup %3598  ;;  %v581_v39 = vadd.f32 %v3997_v27, %v572_v26 }
 0x1d7   : > { %v525_v31 = vmul.f32 %v3597_v11, %v524_v28  ;;  %v531_v34 = vmul.f32 %v3599_v29, %v477_v13  ;;  %vm537_vm2 = vweird.f32 %v3599_v29 }
 0x1d8   : > { %v587_v35 = vpack.c.bf16 %v581_v39, %v580_v30  ;;  %vm538_vm4 = vmor %vm536_vm3, %vm537_vm2 }
 0x1d9   : > { %v532_v36 = vmul.f32 %v3599_v29, %v531_v34  ;;  %v529_v44 = vsel %vm528_vm1, %v3597_v11, %v525_v31  ;;  %vm2007_vm1 = vcmask 261312  }
 0x1da   : > { %3423 = vmatmul.msk.bf16.gmra.mxu0 %vm384_vm0, %v587_v35  ;;  %v564_v40 = vmul.f32 %v529_v44, %v3950_v49  ;;  %v470_v49 = vmul.f32 %v460_v52, %v3914_v24 }
 0x1db   : > { %v533_v37 = vmul.f32 0.5, %v532_v36 }
 0x1dc   : > { %v573_v46 = vmul.f32 %v3990_v43, %v564_v40  ;;  %v478_v53 = vadd.f32 1e-06, %v470_v49 }
 0x1dd   : > { %v534_v38 = vsub.f32 1.5, %v533_v37 }
 0x1de   : > { %v582_v48 = vadd.f32 %v3997_v27, %v573_v46  ;;  %3600 = vrsqrt.f32 %v478_v53  ;;  %vm546_vm6 = vweird.f32 %v478_v53 }
 0x1df   : > { %v535_v41 = vmul.f32 %v3599_v29, %v534_v38 }
 0x1e1   : > { %v539_v42 = vsel %vm538_vm4, %v3599_v29, %v535_v41 }
 0x1e2   : > { %v565_v45 = vmul.f32 %v539_v42, %v3957_v54 }
 0x1e4   : > { %v574_v47 = vmul.f32 %v3990_v43, %v565_v45  ;;  %v3601_v55 = vpop.eup %3600 }
 0x1e5   : > { %v541_v56 = vmul.f32 %v3601_v55, %v478_v53  ;;  %vm547_vm5 = vweird.f32 %v3601_v55 }
 0x1e6   : > { %v583_v50 = vadd.f32 %v3997_v27, %v574_v47  ;;  %vm548_vm7 = vmor %vm546_vm6, %vm547_vm5 }
 0x1e7   : > { %v542_v57 = vmul.f32 %v3601_v55, %v541_v56 }
 0x1e8   : > { %v588_v51 = vpack.c.bf16 %v583_v50, %v582_v48 }
 0x1e9   : > { %v543_v61 = vmul.f32 0.5, %v542_v57 }
 0x1ea   : > { %3424 = vmatmul.msk.bf16.gmra.mxu0 %vm384_vm0, %v588_v51 }
 0x1eb   : > { %v544_v33 = vsub.f32 1.5, %v543_v61 }
 0x1ed   : > { %v545_v63 = vmul.f32 %v3601_v55, %v544_v33 }
 0x1ef   : > { %v549_v2 = vsel %vm548_vm7, %v3601_v55, %v545_v63 }
 0x1f0   : > { %v566_v7 = vmul.f32 %v549_v2, %v3964_v59  ;;  %v3564_v59 = vld [vmem:[%s5182_s2] ss:$0 sm:$0xff] }
 0x1f2   : > { %v575_v17 = vmul.f32 %v3990_v43, %v566_v7 }
 0x1f4   : > { %v584_v19 = vadd.f32 %v3997_v27, %v575_v17 }
 0x226   : > { %v463_v54 = vpop.xlane.xlu1 %462 }
 0x227   : > { %v471_v58 = vmul.f32 %v463_v54, %v3914_v24 }
 0x229   : > { %v479_v60 = vadd.f32 1e-06, %v471_v58 }
 0x22b   : > { %3602 = vrsqrt.f32 %v479_v60  ;;  %vm556_vm9 = vweird.f32 %v479_v60 }
 0x231   : > { %v3603_v62 = vpop.eup %3602 }
 0x232   : > { %v551_v0 = vmul.f32 %v3603_v62, %v479_v60  ;;  %vm557_vm8 = vweird.f32 %v3603_v62 }
 0x233   : > { %vm558_vm10 = vmor %vm556_vm9, %vm557_vm8 }
 0x234   : > { %v552_v1 = vmul.f32 %v3603_v62, %v551_v0 }
 0x236   : > { %v553_v3 = vmul.f32 0.5, %v552_v1 }
 0x238   : > { %v554_v5 = vsub.f32 1.5, %v553_v3 }
 0x23a   : > { %v555_v9 = vmul.f32 %v3603_v62, %v554_v5 }
 0x23c   : > { %v559_v11 = vsel %vm558_vm10, %v3603_v62, %v555_v9 }
 0x23d   : > { %v567_v13 = vmul.f32 %v559_v11, %v3979_v15 }
 0x23f   : > { %v576_v18 = vmul.f32 %v3990_v43, %v567_v13 }
 0x241   : > { %v585_v20 = vadd.f32 %v3997_v27, %v576_v18 }
 0x243   : > { %v589_v21 = vpack.c.bf16 %v585_v20, %v584_v19 }
 0x245   : > { %3425 = vmatmul.msk.bf16.gmra.mxu0 %vm384_vm0, %v589_v21 }
 0x247   : > { %v631_v22 = vpop.f32.mrf.mxu0 }
 0x248   : > { %v632_v26 = vadd.f32 %v3564_v59, %v631_v22 }
 0x24a   : > { %v658_v28 = vrot.slane %v632_v26, 4 }
 0x24f   : > { %v633_v23 = vpop.f32.mrf.mxu0 }
 0x250   : > { %v634_v15 = vadd.f32 %v3564_v59, %v633_v23 }
 0x252   : > { %v652_v29 = vrot.slane %v634_v15, 4  ;;  %v678_v30 = vsel %vm675_vm11, %v658_v28, %v634_v15 }
 0x253   : > { %v686_v35 = vpack.c.bf16 %v678_v30, %v678_v30 }
 0x254   : > { %v676_v27 = vsel %vm675_vm11, %v632_v26, %v652_v29 }
 0x255   : > { %v684_v37 = vpack.c.bf16 %v676_v27, %v676_v27  ;;  %v724_v41 = vunpack.c.l.b16 %v686_v35 }
 0x257   : > { %v636_v25 = vpop.f32.mrf.mxu0  ;;  %v696_v46 = vunpack.c.l.b16 %v684_v37 }
 0x258   : > { %v637_v43 = vadd.f32 %v3564_v59, %v636_v25 }
 0x25a   : > { %v661_v31 = vrot.slane %v637_v43, 4 }
 0x25f   : > { %v638_v39 = vpop.f32.mrf.mxu0 }
 0x260   : > { %v639_v34 = vadd.f32 %v3564_v59, %v638_v39 }
 0x262   : > { %v655_v36 = vrot.slane %v639_v34, 4  ;;  %v679_v44 = vsel %vm675_vm11, %v661_v31, %v639_v34  ;;  %v693_v34 = vld [vmem:[%s5184_s4 + $0x8] sm:$0xff] }
 0x263   : > { %v687_v38 = vpack.c.bf16 %v679_v44, %v679_v44 }
 0x264   : > { %v677_v40 = vsel %vm675_vm11, %v637_v43, %v655_v36  ;;  %v692_v43 = vld [vmem:[%s5184_s4] sm:$0xff] }
 0x265   : > { %v685_v42 = vpack.c.bf16 %v677_v40, %v677_v40  ;;  %v725_v45 = vunpack.c.l.b16 %v687_v38 }
 0x267   : > { %v697_v47 = vunpack.c.l.b16 %v685_v42  ;;  %v4035_v48 = vpack.c.b16 %v725_v45, %v724_v41  ;;  %v641_v51 = vpop.f32.mrf.mxu0 }
 0x268   : > { %v642_v53 = vadd.f32 %v3564_v59, %v641_v51 }
 0x269   : > { %v4037_v50 = vpack.c.b16 %v697_v47, %v696_v46  ;;  %930 = vrot.lane.b32.xlu0 %v4035_v48, %s3805_s25  ;;  %727 = vrot.lane.b32.xlu1 %v4035_v48, %s3806_s26 }
 0x26a   : > { %v670_v54 = vrot.slane %v642_v53, 4 }
 0x26b   : > { %699 = vrot.lane.b32.xlu2 %v4037_v50, %s3806_s26 }
 0x26f   : > { %v643_v52 = vpop.f32.mrf.mxu0 }
 0x270   : > { %v644_v55 = vadd.f32 %v3564_v59, %v643_v52 }
 0x272   : > { %v664_v58 = vrot.slane %v644_v55, 4  ;;  %v682_v61 = vsel %vm675_vm11, %v670_v54, %v644_v55 }
 0x273   : > { %v690_v1 = vpack.c.bf16 %v682_v61, %v682_v61 }
 0x274   : > { %v680_v62 = vsel %vm675_vm11, %v642_v53, %v664_v58 }
 0x275   : > { %v688_v5 = vpack.c.bf16 %v680_v62, %v680_v62  ;;  %v778_v11 = vunpack.c.l.b16 %v690_v1 }
 0x277   : > { %v751_v18 = vunpack.c.l.b16 %v688_v5 }
 0x2c2   : > { %v646_v49 = vpop.f32.mrf.mxu0 }
 0x2c3   : > { %v647_v60 = vadd.f32 %v3564_v59, %v646_v49 }
 0x2c5   : > { %v700_v56 = vpop.permute.xlu2 %699  ;;  %v673_v63 = vrot.slane %v647_v60, 4 }
 0x2c6   : > { %v706_v57 = vsel %vm701_vm12, %v700_v56, 0 }
 0x2c7   : > { %715 = vmatpush.bf16.xpose.msra.mxu3 %v706_v57 }
 0x2ca   : > { %v648_v33 = vpop.f32.mrf.mxu0 }
 0x2cb   : > { %v649_v0 = vadd.f32 %v3564_v59, %v648_v33 }
 0x2cd   : > { %v667_v2 = vrot.slane %v649_v0, 4  ;;  %v683_v3 = vsel %vm675_vm11, %v673_v63, %v649_v0 }
 0x2ce   : > { %v691_v7 = vpack.c.bf16 %v683_v3, %v683_v3  ;;  %3426 = vmatmul.msk.bf16.vlgmr.msra.gmra.mxu3 %vm701_vm12, %v4037_v50 }
 0x2cf   : > { %v681_v9 = vsel %vm675_vm11, %v647_v60, %v667_v2 }
 0x2d0   : > { %v689_v13 = vpack.c.bf16 %v681_v9, %v681_v9  ;;  %v779_v17 = vunpack.c.l.b16 %v691_v7 }
 0x2d2   : > { %v752_v19 = vunpack.c.l.b16 %v689_v13  ;;  %v4052_v20 = vpack.c.b16 %v779_v17, %v778_v11 }
 0x2d4   : > { %v4054_v21 = vpack.c.b16 %v752_v19, %v751_v18  ;;  %781 = vrot.lane.b32.xlu2 %v4052_v20, %s3806_s26 }
 0x2d6   : > { %955 = vrot.lane.b32.xlu0 %v4054_v21, %s3805_s25 }
 0x2db   : > { %v728_v22 = vpop.permute.xlu1 %727  ;;  %v931_v28 = vpop.permute.xlu0 %930 }
 0x2dc   : > { %754 = vrot.lane.b32.xlu2 %v4054_v21, %s3806_s26  ;;  %v733_v23 = vsel %vm701_vm12, %v728_v22, 0 }
 0x2dd   : > { %742 = vmatpush.bf16.xpose.msrb.mxu3 %v733_v23 }
 0x2de   : > { %1061 = vrot.lane.b32.xlu0 %v4054_v21, %s3807_s27 }
 0x2e4   : > { %3427 = vmatmul.msk.bf16.vlgmr.msrb.gmra.mxu3 %vm701_vm12, %v4035_v48 }
 0x2e6   : > { %1037 = vrot.lane.b32.xlu0 %v4035_v48, %s3807_s27 }
 0x32e   : > { %v782_v59 = vpop.permute.xlu2 %781 }
 0x32f   : > { %v787_v25 = vsel %vm701_vm12, %v782_v59, 0 }
 0x330   : > { %796 = vmatpush.bf16.xpose.msra.mxu1 %v787_v25 }
 0x336   : > { %v755_v26 = vpop.permute.xlu2 %754 }
 0x337   : > { %v760_v15 = vsel %vm701_vm12, %v755_v26, 0  ;;  %3429 = vmatmul.msk.bf16.vlgmr.msra.gmra.mxu1 %vm701_vm12, %v4052_v20 }
 0x338   : > { %769 = vmatpush.bf16.xpose.msra.mxu3 %v760_v15 }
 0x33f   : > { %3428 = vmatmul.msk.bf16.vlgmr.msra.gmra.mxu3 %vm701_vm12, %v4054_v21 }
 0x340   : > { %943 = vmatpush.bf16.msrb.mxu3 %v931_v28 }
 0x348   : > { %v956_v29 = vpop.permute.xlu0 %955 }
 0x349   : > { %968 = vmatpush.bf16.msrb.mxu1 %v956_v29 }
 0x350   : > { %v4078_v30 = vpop.permute.xlu0 %1061 }
 0x351   : > { %v717_v39 = vpop.f32.mrf.mxu3 }
 0x352   : > { %v718_v27 = vadd.f32 %v717_v39, %v692_v43 }
 0x354   : > { %v804_v31 = vsel %vm803_vm13, %v718_v27, -inf }
 0x355   : > { %805 = vmax.xlane.f32.xlu1 %v804_v31 }
 0x358   : > { %v1038_v35 = vpop.permute.xlu0 %1037 }
 0x359   : > { %v1043_v36 = vsel %vm701_vm12, %v1038_v35, 0  ;;  %v719_v44 = vpop.f32.mrf.mxu3 }
 0x35a   : > { %v720_v37 = vadd.f32 %v719_v44, %v693_v34  ;;  %1052 = vmatpush.bf16.xpose.msra.mxu1 %v1043_v36 }
 0x35c   : > { %v807_v38 = vsel %vm803_vm13, %v720_v37, -inf }
 0x35d   : > { %808 = vmax.xlane.f32.xlu2 %v807_v38 }
 0x367   : > { %v744_v40 = vpop.f32.mrf.mxu3 }
 0x368   : > { %v745_v41 = vadd.f32 %v744_v40, %v692_v43 }
 0x36a   : > { %v810_v42 = vsel %vm803_vm13, %v745_v41, -inf }
 0x36b   : > { %811 = vmax.xlane.f32.xlu1 %v810_v42 }
 0x36f   : > { %v746_v45 = vpop.f32.mrf.mxu3 }
 0x370   : > { %v747_v46 = vadd.f32 %v746_v45, %v693_v34 }
 0x372   : > { %v813_v47 = vsel %vm803_vm13, %v747_v46, -inf }
 0x373   : > { %814 = vmax.xlane.f32.xlu2 %v813_v47 }
 0x3b4   : > { %v798_v51 = vpop.f32.mrf.mxu1 }
 0x3b5   : > { %v799_v52 = vadd.f32 %v798_v51, %v692_v43 }
 0x3b7   : > { %v822_v49 = vsel %vm803_vm13, %v799_v52, -inf }
 0x3b8   : > { %823 = vmax.xlane.f32.xlu1 %v822_v49 }
 0x3bc   : > { %v800_v53 = vpop.f32.mrf.mxu1 }
 0x3bd   : > { %v801_v55 = vadd.f32 %v800_v53, %v693_v34 }
 0x3bf   : > { %v825_v56 = vsel %vm803_vm13, %v801_v55, -inf }
 0x3c0   : > { %826 = vmax.xlane.f32.xlu2 %v825_v56 }
 0x3c2   : > { %v771_v57 = vpop.f32.mrf.mxu3 }
 0x3c3   : > { %v772_v54 = vadd.f32 %v771_v57, %v692_v43 }
 0x3c5   : > { %v816_v58 = vsel %vm803_vm13, %v772_v54, -inf }
 0x3c6   : > { %817 = vmax.xlane.f32.xlu1 %v816_v58 }
 0x3c8   : > { %v806_v1 = vpop.xlane.xlu1 %805 }
 0x3c9   : > { %v828_v2 = vsub.f32 %v718_v27, %v806_v1 }
 0x3ca   : > { %v773_v5 = vpop.f32.mrf.mxu3 }
 0x3cb   : > { %v836_v3 = vmul.f32 1.442695, %v828_v2  ;;  %v774_v7 = vadd.f32 %v773_v5, %v693_v34 }
 0x3cd   : > { %v819_v11 = vsel %vm803_vm13, %v774_v7, -inf }
 0x3d0   : > { %v809_v60 = vpop.xlane.xlu2 %808 }
 0x3d1   : > { %v829_v22 = vsub.f32 %v720_v37, %v809_v60 }
 0x3d3   : > { %v838_v25 = vmul.f32 1.442695, %v829_v22 }
 0x3d8   : > { %980 = vrot.lane.b32.xlu2 %v4052_v20, %s3805_s25 }
 0x3de   : > { %v812_v23 = vpop.xlane.xlu1 %811 }
 0x3df   : > { %905 = vrot.lane.b32.xlu1 %v4037_v50, %s3805_s25  ;;  %v830_v28 = vsub.f32 %v745_v41, %v812_v23  ;;  %v1067_v23 = vsel %vm701_vm12, %v4078_v30, 0 }
 0x3e0   : > { %1013 = vrot.lane.b32.xlu2 %v4037_v50, %s3807_s27 }
 0x3e1   : > { %v840_v39 = vmul.f32 1.442695, %v830_v28 }
 0x3e6   : > { %v815_v61 = vpop.xlane.xlu2 %814 }
 0x3e7   : > { %v831_v33 = vsub.f32 %v747_v46, %v815_v61 }
 0x3e9   : > { %v842_v62 = vmul.f32 1.442695, %v831_v33 }
 0x3eb   : > { %3604 = vpow2.f32 %v842_v62 }
 0x3ec   : > { %3606 = vpow2.f32 %v836_v3 }
 0x3f1   : > { %v4097_v63 = vpop.eup %3604 }
 0x3f2   : > { %v861_v0 = vsel %vm803_vm13, %v4097_v63, 0.0  ;;  %v4101_v9 = vpop.eup %3606 }
 0x3f3   : > { %862 = vadd.xlane.f32.xlu0 %v861_v0  ;;  %v852_v13 = vsel %vm803_vm13, %v4101_v9, 0.0 }
 0x409   : > { %820 = vmax.xlane.f32.xlu2 %v819_v11  ;;  %853 = vadd.xlane.f32.xlu1 %v852_v13 }
 0x421   : > { %1011 = vrot.lane.b32.xlu2 %v4037_v50, %s3808_s14 }
 0x42b   : > { %v824_v29 = vpop.xlane.xlu1 %823 }
 0x42c   : > { %v834_v34 = vsub.f32 %v799_v52, %v824_v29 }
 0x42e   : > { %v848_v44 = vmul.f32 1.442695, %v834_v34 }
 0x433   : > { %v827_v17 = vpop.xlane.xlu2 %826 }
 0x434   : > { %v835_v18 = vsub.f32 %v801_v55, %v827_v17 }
 0x436   : > { %v850_v19 = vmul.f32 1.442695, %v835_v18 }
 0x438   : > { %3608 = vpow2.f32 %v850_v19 }
 0x439   : > { %3610 = vpow2.f32 %v838_v25  ;;  %v818_v35 = vpop.xlane.xlu1 %817 }
 0x43a   : > { %3612 = vpow2.f32 %v840_v39  ;;  %v832_v38 = vsub.f32 %v772_v54, %v818_v35 }
 0x43b   : > { %v981_v59 = vpop.permute.xlu2 %980  ;;  %3614 = vpow2.f32 %v848_v44 }
 0x43c   : > { %v844_v42 = vmul.f32 1.442695, %v832_v38 }
 0x43e   : > { %v4108_v26 = vpop.eup %3608  ;;  %3616 = vpow2.f32 %v844_v42 }
 0x43f   : > { %v873_v15 = vsel %vm803_vm13, %v4108_v26, 0.0  ;;  %v3611_v31 = vpop.eup %3610 }
 0x440   : > { %874 = vadd.xlane.f32.xlu0 %v873_v15  ;;  %v855_v36 = vsel %vm803_vm13, %v3611_v31, 0.0  ;;  %v3613_v37 = vpop.eup %3612 }
 0x441   : > { %v858_v41 = vsel %vm803_vm13, %v3613_v37, 0.0  ;;  %v3615_v45 = vpop.eup %3614 }
 0x442   : > { %v870_v46 = vsel %vm803_vm13, %v3615_v45, 0.0 }
 0x443   : > { %v1014_v43 = vpop.permute.xlu2 %1013 }
 0x444   : > { %v1019_v27 = vsel %vm701_vm12, %v1014_v43, 0  ;;  %v4120_v47 = vpop.eup %3616 }
 0x445   : > { %1028 = vmatpush.bf16.xpose.msra.mxu3 %v1019_v27  ;;  %v864_v51 = vsel %vm803_vm13, %v4120_v47, 0.0 }
 0x44a   : > { %856 = vadd.xlane.f32.xlu2 %v855_v36 }
 0x451   : > { %v906_v40 = vpop.permute.xlu1 %905 }
 0x452   : > { %918 = vmatpush.bf16.msra.mxu2 %v906_v40  ;;  %859 = vadd.xlane.f32.xlu2 %v858_v41 }
 0x454   : > { %1085 = vrot.lane.b32.xlu0 %v4052_v20, %s3807_s27  ;;  %s3813_s27 = smov 72  }
 0x456   : > { %993 = vmatpush.bf16.msrb.mxu2 %v981_v59 }
 0x45a   : > { %871 = vadd.xlane.f32.xlu2 %v870_v46 }
 0x45c   : > { %1349 = vrot.lane.b32.xlu0 %v4037_v50, %s3809_s15 }
 0x462   : > { %865 = vadd.xlane.f32.xlu2 %v864_v51 }
 0x466   : > { %v863_v58 = vpop.xlane.xlu0 %862 }
 0x47a   : > { %1035 = vrot.lane.b32.xlu2 %v4035_v48, %s3808_s14 }
 0x47c   : > { %v821_v52 = vpop.xlane.xlu2 %820  ;;  %v854_v57 = vpop.xlane.xlu1 %853 }
 0x47d   : > { %v833_v49 = vsub.f32 %v774_v7, %v821_v52 }
 0x47f   : > { %v846_v53 = vmul.f32 1.442695, %v833_v49 }
 0x481   : > { %3618 = vpow2.f32 %v846_v53 }
 0x482   : > { %1083 = vrot.lane.b32.xlu2 %v4052_v20, %s3808_s14  ;;  %3620 = vrcp.f32 %v854_v57 }
 0x484   : > { %v1012_v54 = vpop.permute.xlu2 %1011 }
 0x487   : > { %v4128_v55 = vpop.eup %3618 }
 0x488   : > { %v867_v56 = vsel %vm803_vm13, %v4128_v55, 0.0  ;;  %v3621_v61 = vpop.eup %3620 }
 0x489   : > { %868 = vadd.xlane.f32.xlu1 %v867_v56  ;;  %v884_v62 = vmul.f32 %v3621_v61, %v4101_v9 }
 0x48b   : > { %v892_v3 = vpack.c.bf16 %v884_v62, %v884_v62 }
 0x48d   : > { %v902_v17 = vunpack.c.l.b16 %v892_v3 }
 0x4a2   : > { %1059 = vrot.lane.b32.xlu1 %v4054_v21, %s3808_s14 }
 0x4b3   : > { %v875_v33 = vpop.xlane.xlu0 %874 }
 0x4bd   : > { %v857_v60 = vpop.xlane.xlu2 %856 }
 0x4be   : > { %3622 = vrcp.f32 %v857_v60 }
 0x4bf   : > { %3624 = vrcp.f32 %v863_v58 }
 0x4c4   : > { %v3623_v0 = vpop.eup %3622 }
 0x4c5   : > { %v860_v1 = vpop.xlane.xlu2 %859  ;;  %v885_v2 = vmul.f32 %v3623_v0, %v3611_v31  ;;  %v3625_v5 = vpop.eup %3624  ;;  %v3434_v0 = vld [vmem:[%s5184_s4 + $0x10] sm:$0xff] }
 0x4c6   : > { %3626 = vrcp.f32 %v860_v1  ;;  %v1086_v7 = vpop.permute.xlu0 %1085  ;;  %v887_v13 = vmul.f32 %v3625_v5, %v4097_v63 }
 0x4c7   : > { %v893_v11 = vpack.c.bf16 %v885_v2, %v885_v2  ;;  %3628 = vrcp.f32 %v875_v33  ;;  %v1091_v35 = vsel %vm701_vm12, %v1086_v7, 0  ;;  %v3435_v7 = vld [vmem:[%s5184_s4 + $0x18] sm:$0xff] }
 0x4c8   : > { %v895_v59 = vpack.c.bf16 %v887_v13, %v887_v13 }
 0x4c9   : > { %v903_v18 = vunpack.c.l.b16 %v893_v11 }
 0x4ca   : > { %v928_v63 = vunpack.c.l.b16 %v895_v59 }
 0x4cb   : > { %v904_v19 = vpack.c.b16 %v903_v18, %v902_v17 }
 0x4cc   : > { %v3627_v22 = vpop.eup %3626 }
 0x4cd   : > { %v886_v9 = vmul.f32 %v3627_v22, %v3613_v37  ;;  %3430 = vmatmul.msk.bf16.vlgmr.msra.gmra.mxu2 %vm803_vm13, %v904_v19  ;;  %v872_v25 = vpop.xlane.xlu2 %871  ;;  %v3629_v15 = vpop.eup %3628 }
 0x4ce   : > { %3630 = vrcp.f32 %v872_v25  ;;  %1076 = vmatpush.bf16.xpose.msra.mxu2 %v1067_v23  ;;  %v1350_v28 = vpop.permute.xlu0 %1349  ;;  %v891_v39 = vmul.f32 %v3629_v15, %v4108_v26 }
 0x4cf   : > { %v894_v29 = vpack.c.bf16 %v886_v9, %v886_v9  ;;  %v1355_v43 = vsel %vm701_vm12, %v1350_v28, 0 }
 0x4d0   : > { %1364 = vmatpush.bf16.xpose.msrb.mxu0 %v1355_v43  ;;  %v899_v30 = vpack.c.bf16 %v891_v39, %v891_v39 }
 0x4d1   : > { %v927_v27 = vunpack.c.l.b16 %v894_v29 }
 0x4d2   : > { %v978_v37 = vunpack.c.l.b16 %v899_v30 }
 0x4d3   : > { %v929_v31 = vpack.c.b16 %v928_v63, %v927_v27 }
 0x4d4   : > { %v3631_v34 = vpop.eup %3630 }
 0x4d5   : > { %v890_v36 = vmul.f32 %v3631_v34, %v3615_v45  ;;  %3431 = vmatmul.msk.bf16.vlgmr.msrb.gmra.mxu3 %vm803_vm13, %v929_v31  ;;  %v866_v41 = vpop.xlane.xlu2 %865 }
 0x4d6   : > { %1100 = vmatpush.bf16.xpose.msrb.mxu3 %v1091_v35  ;;  %3632 = vrcp.f32 %v866_v41 }
 0x4d7   : > { %v898_v44 = vpack.c.bf16 %v890_v36, %v890_v36 }
 0x4d9   : > { %v977_v38 = vunpack.c.l.b16 %v898_v44 }
 0x4db   : > { %v979_v40 = vpack.c.b16 %v978_v37, %v977_v38 }
 0x4dc   : > { %v3633_v51 = vpop.eup %3632 }
 0x4dd   : > { %3433 = vmatmul.msk.bf16.vlgmr.msrb.gmra.mxu2 %vm803_vm13, %v979_v40  ;;  %v1036_v26 = vpop.permute.xlu2 %1035  ;;  %v888_v45 = vmul.f32 %v3633_v51, %v4120_v47 }
 0x4df   : > { %v896_v49 = vpack.c.bf16 %v888_v45, %v888_v45 }
 0x4e1   : > { %v952_v57 = vunpack.c.l.b16 %v896_v49 }
 0x4e5   : > { %3436 = vmatmul.msk.bf16.vlgmr.msra.gmra.mxu3 %vm701_vm12, %v1012_v54  ;;  %v1084_v42 = vpop.permute.xlu2 %1083 }
 0x4f5   : > { %3439 = vmatmul.msk.bf16.vlgmr.msrb.gmra.mxu3 %vm701_vm12, %v1084_v42 }
 0x4fc   : > { %v869_v46 = vpop.xlane.xlu1 %868 }
 0x4fd   : > { %3634 = vrcp.f32 %v869_v46 }
 0x503   : > { %v3635_v52 = vpop.eup %3634 }
 0x504   : > { %v889_v53 = vmul.f32 %v3635_v52, %v4128_v55 }
 0x506   : > { %v897_v56 = vpack.c.bf16 %v889_v53, %v889_v53 }
 0x508   : > { %v953_v58 = vunpack.c.l.b16 %v897_v56 }
 0x50a   : > { %v954_v60 = vpack.c.b16 %v953_v58, %v952_v57 }
 0x50c   : > { %3432 = vmatmul.msk.bf16.vlgmr.msrb.gmra.mxu1 %vm803_vm13, %v954_v60 }
 0x514   : > { %v1060_v54 = vpop.permute.xlu1 %1059 }
 0x515   : > { %3438 = vmatmul.msk.bf16.vlgmr.msra.gmra.mxu2 %vm701_vm12, %v1060_v54 }
 0x51c   : > { %3437 = vmatmul.msk.bf16.vlgmr.msra.gmra.mxu1 %vm701_vm12, %v1036_v26 }
 0x550   : > { %v920_v61 = vpop.f32.mrf.mxu2 }
 0x551   : > { %1000 = vst.msk [vmem:[#allocation2] sm:$0xff] %vm701_vm12, %v920_v61 }
 0x558   : > { %v922_v33 = vpop.f32.mrf.mxu2  ;;  %v945_v47 = vpop.f32.mrf.mxu3 }
 0x559   : > { %1001 = vst.msk [vmem:[#allocation2 + $0x8] sm:$0xff] %vm701_vm12, %v922_v33 }
 0x55a   : > { %1002 = vst.msk [vmem:[#allocation2 + $0x10] sm:$0xff] %vm701_vm12, %v945_v47 }
 0x560   : > { %v947_v55 = vpop.f32.mrf.mxu3  ;;  %v995_v62 = vpop.f32.mrf.mxu2 }
 0x561   : > { %1003 = vst.msk [vmem:[#allocation2 + $0x18] sm:$0xff] %vm701_vm12, %v947_v55 }
 0x562   : > { %1006 = vst.msk [vmem:[#allocation2 + $0x30] sm:$0xff] %vm701_vm12, %v995_v62 }
 0x568   : > { %v997_v1 = vpop.f32.mrf.mxu2  ;;  %v1030_v2 = vpop.f32.mrf.mxu3 }
 0x569   : > { %1007 = vst.msk [vmem:[#allocation2 + $0x38] sm:$0xff] %vm701_vm12, %v997_v1  ;;  %v1031_v3 = vadd.f32 %v3434_v0, %v1030_v2 }
 0x56b   : > { %v1107_v5 = vsel %vm803_vm13, %v1031_v3, -inf }
 0x56c   : > { %1108 = vmax.xlane.f32.xlu0 %v1107_v5 }
 0x570   : > { %v1032_v11 = vpop.f32.mrf.mxu3 }
 0x571   : > { %v1033_v13 = vadd.f32 %v3435_v7, %v1032_v11 }
 0x573   : > { %v1110_v17 = vsel %vm803_vm13, %v1033_v13, -inf }
 0x574   : > { %1111 = vmax.xlane.f32.xlu2 %v1110_v17 }
 0x578   : > { %v1102_v22 = vpop.f32.mrf.mxu3 }
 0x579   : > { %v1103_v43 = vadd.f32 %v3434_v0, %v1102_v22 }
 0x57b   : > { %v1125_v34 = vsel %vm803_vm13, %v1103_v43, -inf }
 0x580   : > { %v1104_v29 = vpop.f32.mrf.mxu3 }
 0x581   : > { %v4169_v63 = vadd.f32 %v3435_v7, %v1104_v29 }
 0x583   : > { %v1128_v35 = vsel %vm803_vm13, %v4169_v63, -inf }
 0x589   : > { %v970_v18 = vpop.f32.mrf.mxu1 }
 0x58a   : > { %1004 = vst.msk [vmem:[#allocation2 + $0x20] sm:$0xff] %vm701_vm12, %v970_v18 }
 0x591   : > { %v972_v19 = vpop.f32.mrf.mxu1 }
 0x592   : > { %1005 = vst.msk [vmem:[#allocation2 + $0x28] sm:$0xff] %vm701_vm12, %v972_v19 }
 0x598   : > { %v1078_v23 = vpop.f32.mrf.mxu2 }
 0x599   : > { %v1079_v59 = vadd.f32 %v3434_v0, %v1078_v23  ;;  %v1054_v9 = vpop.f32.mrf.mxu1 }
 0x59a   : > { %v1055_v25 = vadd.f32 %v3434_v0, %v1054_v9 }
 0x59b   : > { %v1119_v15 = vsel %vm803_vm13, %v1079_v59, -inf }
 0x59c   : > { %1120 = vmax.xlane.f32.xlu1 %v1119_v15  ;;  %v1113_v28 = vsel %vm803_vm13, %v1055_v25, -inf }
 0x59d   : > { %1114 = vmax.xlane.f32.xlu2 %v1113_v28 }
 0x5a0   : > { %v1080_v39 = vpop.f32.mrf.mxu2 }
 0x5a1   : > { %v1081_v27 = vadd.f32 %v3435_v7, %v1080_v39  ;;  %v1056_v30 = vpop.f32.mrf.mxu1 }
 0x5a2   : > { %v1057_v36 = vadd.f32 %v3435_v7, %v1056_v30 }
 0x5a3   : > { %v1122_v31 = vsel %vm803_vm13, %v1081_v27, -inf }
 0x5a4   : > { %1123 = vmax.xlane.f32.xlu0 %v1122_v31  ;;  %1126 = vmax.xlane.f32.xlu1 %v1125_v34  ;;  %v1116_v44 = vsel %vm803_vm13, %v1057_v36, -inf }
 0x5a5   : > { %1129 = vmax.xlane.f32.xlu2 %v1128_v35 }
 0x5ac   : > { %1117 = vmax.xlane.f32.xlu0 %v1116_v44 }
 0x5bd   : > { %1258 = vrot.lane.b32.xlu2 %v4054_v21, %s3810_s20  ;;  %1208 = vrot.lane.b32.xlu1 %v4037_v50, %s3810_s20 }
 0x5c0   : > { %1233 = vrot.lane.b32.xlu0 %v4035_v48, %s3810_s20 }
 0x5c8   : > { %1347 = vrot.lane.b32.xlu0 %v4037_v50, %s3811_s21 }
 0x5d0   : > { %1397 = vrot.lane.b32.xlu0 %v4054_v21, %s3809_s15 }
 0x5d8   : > { %1373 = vrot.lane.b32.xlu0 %v4035_v48, %s3809_s15 }
 0x5df   : > { %v1109_v42 = vpop.xlane.xlu0 %1108 }
 0x5e0   : > { %1283 = vrot.lane.b32.xlu0 %v4052_v20, %s3810_s20  ;;  %v1131_v46 = vsub.f32 %v1031_v3, %v1109_v42 }
 0x5e2   : > { %v1139_v51 = vmul.f32 1.442695, %v1131_v46 }
 0x5e7   : > { %v1112_v37 = vpop.xlane.xlu2 %1111 }
 0x5e8   : > { %v1132_v38 = vsub.f32 %v1033_v13, %v1112_v37  ;;  %1395 = vrot.lane.b32.xlu0 %v4054_v21, %s3811_s21 }
 0x5ea   : > { %v1141_v40 = vmul.f32 1.442695, %v1132_v38 }
 0x5ec   : > { %3636 = vpow2.f32 %v1141_v40 }
 0x5ed   : > { %3638 = vpow2.f32 %v1139_v51 }
 0x5f2   : > { %v4188_v41 = vpop.eup %3636 }
 0x5f3   : > { %v1158_v26 = vsel %vm803_vm13, %v4188_v41, 0.0  ;;  %v4192_v45 = vpop.eup %3638 }
 0x5f4   : > { %1159 = vadd.xlane.f32.xlu1 %v1158_v26  ;;  %v1155_v57 = vsel %vm803_vm13, %v4192_v45, 0.0 }
 0x60f   : > { %v1121_v52 = vpop.xlane.xlu1 %1120 }
 0x610   : > { %v1135_v49 = vsub.f32 %v1079_v59, %v1121_v52  ;;  %v1115_v53 = vpop.xlane.xlu2 %1114 }
 0x611   : > { %v1133_v56 = vsub.f32 %v1055_v25, %v1115_v53 }
 0x612   : > { %v1147_v58 = vmul.f32 1.442695, %v1135_v49  ;;  %1156 = vadd.xlane.f32.xlu0 %v1155_v57 }
 0x613   : > { %v1143_v60 = vmul.f32 1.442695, %v1133_v56 }
 0x614   : > { %3640 = vpow2.f32 %v1147_v58 }
 0x615   : > { %3642 = vpow2.f32 %v1143_v60 }
 0x617   : > { %v1127_v54 = vpop.xlane.xlu1 %1126  ;;  %v1124_v61 = vpop.xlane.xlu0 %1123 }
 0x618   : > { %v1137_v33 = vsub.f32 %v1103_v43, %v1127_v54  ;;  %v1136_v47 = vsub.f32 %v1081_v27, %v1124_v61  ;;  %v1130_v55 = vpop.xlane.xlu2 %1129 }
 0x619   : > { %v1138_v18 = vsub.f32 %v4169_v63, %v1130_v55 }
 0x61a   : > { %v4196_v62 = vpop.eup %3640  ;;  %v1151_v0 = vmul.f32 1.442695, %v1137_v33  ;;  %v1149_v1 = vmul.f32 1.442695, %v1136_v47 }
 0x61b   : > { %v4198_v2 = vpop.eup %3642  ;;  %v1167_v3 = vsel %vm803_vm13, %v4196_v62, 0.0  ;;  %v1153_v9 = vmul.f32 1.442695, %v1138_v18 }
 0x61c   : > { %3644 = vpow2.f32 %v1151_v0  ;;  %1168 = vadd.xlane.f32.xlu2 %v1167_v3  ;;  %v1161_v5 = vsel %vm803_vm13, %v4198_v2, 0.0 }
 0x61d   : > { %3646 = vpow2.f32 %v1149_v1  ;;  %1162 = vadd.xlane.f32.xlu1 %v1161_v5 }
 0x61f   : > { %v1118_v7 = vpop.xlane.xlu0 %1117 }
 0x620   : > { %v1134_v11 = vsub.f32 %v1057_v36, %v1118_v7  ;;  %v1259_v13 = vpop.permute.xlu2 %1258 }
 0x621   : > { %1271 = vmatpush.bf16.msrb.mxu2 %v1259_v13 }
 0x622   : > { %v4204_v17 = vpop.eup %3644  ;;  %v1145_v19 = vmul.f32 1.442695, %v1134_v11 }
 0x623   : > { %v3647_v22 = vpop.eup %3646  ;;  %v1173_v23 = vsel %vm803_vm13, %v4204_v17, 0.0 }
 0x624   : > { %3648 = vpow2.f32 %v1145_v19  ;;  %v1170_v59 = vsel %vm803_vm13, %v3647_v22, 0.0 }
 0x625   : > { %1171 = vadd.xlane.f32.xlu0 %v1170_v59  ;;  %1174 = vadd.xlane.f32.xlu1 %v1173_v23  ;;  %3650 = vpow2.f32 %v1153_v9 }
 0x62a   : > { %v4210_v25 = vpop.eup %3648 }
 0x62b   : > { %v1164_v15 = vsel %vm803_vm13, %v4210_v25, 0.0  ;;  %v4214_v29 = vpop.eup %3650 }
 0x62c   : > { %1165 = vadd.xlane.f32.xlu2 %v1164_v15  ;;  %v1176_v63 = vsel %vm803_vm13, %v4214_v29, 0.0 }
 0x62f   : > { %v1209_v28 = vpop.permute.xlu1 %1208 }
 0x630   : > { %1221 = vmatpush.bf16.msra.mxu3 %v1209_v28 }
 0x632   : > { %v1234_v43 = vpop.permute.xlu0 %1233 }
 0x633   : > { %1246 = vmatpush.bf16.msrb.mxu1 %v1234_v43 }
 0x634   : > { %1177 = vadd.xlane.f32.xlu2 %v1176_v63 }
 0x639   : > { %1371 = vrot.lane.b32.xlu0 %v4035_v48, %s3811_s21 }
 0x63a   : > { %v1348_v39 = vpop.permute.xlu0 %1347 }
 0x63b   : > { %3446 = vmatmul.msk.bf16.vlgmr.msrb.gmra.mxu0 %vm701_vm12, %v1348_v39 }
 0x63e   : > { %1419 = vrot.lane.b32.xlu1 %v4052_v20, %s3811_s21 }
 0x642   : > { %v1398_v27 = vpop.permute.xlu0 %1397 }
 0x643   : > { %v1403_v31 = vsel %vm701_vm12, %v1398_v27, 0 }
 0x644   : > { %1412 = vmatpush.bf16.xpose.msra.mxu2 %v1403_v31 }
 0x646   : > { %1544 = vrot.lane.b32.xlu1 %v4037_v50, %s3812_s22 }
 0x64a   : > { %v1374_v34 = vpop.permute.xlu0 %1373 }
 0x64b   : > { %v1379_v30 = vsel %vm701_vm12, %v1374_v34, 0 }
 0x64c   : > { %1421 = vrot.lane.b32.xlu2 %v4052_v20, %s3809_s15  ;;  %1388 = vmatpush.bf16.xpose.msra.mxu1 %v1379_v30  ;;  %s3815_s15 = smov 40  }
 0x652   : > { %v1284_v35 = vpop.permute.xlu0 %1283 }
 0x653   : > { %1296 = vmatpush.bf16.msrb.mxu3 %v1284_v35 }
 0x65a   : > { %v1396_v36 = vpop.permute.xlu0 %1395 }
 0x667   : > { %v1160_v44 = vpop.xlane.xlu1 %1159 }
 0x668   : > { %3652 = vrcp.f32 %v1160_v44 }
 0x66e   : > { %v3653_v38 = vpop.eup %3652 }
 0x66f   : > { %v1188_v40 = vmul.f32 %v3653_v38, %v4188_v41 }
 0x671   : > { %v1196_v42 = vpack.c.bf16 %v1188_v40, %v1188_v40  ;;  %v3445_v40 = vld [vmem:[%s5184_s4 + $0x28] sm:$0xff] }
 0x673   : > { %v1206_v49 = vunpack.c.l.b16 %v1196_v42 }
 0x685   : > { %v1157_v37 = vpop.xlane.xlu0 %1156 }
 0x686   : > { %3654 = vrcp.f32 %v1157_v37 }
 0x68c   : > { %v3655_v26 = vpop.eup %3654 }
 0x68d   : > { %v1187_v46 = vmul.f32 %v3655_v26, %v4192_v45 }
 0x68f   : > { %v1195_v51 = vpack.c.bf16 %v1187_v46, %v1187_v46  ;;  %v1169_v52 = vpop.xlane.xlu2 %1168 }
 0x690   : > { %3656 = vrcp.f32 %v1169_v52  ;;  %v1163_v57 = vpop.xlane.xlu1 %1162 }
 0x691   : > { %v1205_v53 = vunpack.c.l.b16 %v1195_v51 }
 0x693   : > { %v1207_v56 = vpack.c.b16 %v1206_v49, %v1205_v53 }
 0x695   : > { %3440 = vmatmul.msk.bf16.vlgmr.msra.gmra.mxu3 %vm803_vm13, %v1207_v56 }
 0x696   : > { %v3657_v60 = vpop.eup %3656 }
 0x697   : > { %v1191_v54 = vmul.f32 %v3657_v60, %v4196_v62 }
 0x698   : > { %v1172_v58 = vpop.xlane.xlu0 %1171  ;;  %v1175_v61 = vpop.xlane.xlu1 %1174 }
 0x699   : > { %3658 = vrcp.f32 %v1172_v58  ;;  %v1199_v45 = vpack.c.bf16 %v1191_v54, %v1191_v54 }
 0x69a   : > { %3660 = vrcp.f32 %v1163_v57 }
 0x69b   : > { %v1255_v3 = vunpack.c.l.b16 %v1199_v45 }
 0x69f   : > { %v3659_v41 = vpop.eup %3658  ;;  %v1166_v33 = vpop.xlane.xlu2 %1165 }
 0x6a0   : > { %v3661_v47 = vpop.eup %3660  ;;  %v1192_v55 = vmul.f32 %v3659_v41, %v3647_v22  ;;  %3662 = vrcp.f32 %v1166_v33 }
 0x6a1   : > { %3664 = vrcp.f32 %v1175_v61  ;;  %v1189_v1 = vmul.f32 %v3661_v47, %v4198_v2 }
 0x6a2   : > { %v1200_v0 = vpack.c.bf16 %v1192_v55, %v1192_v55 }
 0x6a3   : > { %v1197_v13 = vpack.c.bf16 %v1189_v1, %v1189_v1 }
 0x6a4   : > { %v1256_v5 = vunpack.c.l.b16 %v1200_v0 }
 0x6a5   : > { %v1230_v59 = vunpack.c.l.b16 %v1197_v13 }
 0x6a6   : > { %v3663_v7 = vpop.eup %3662  ;;  %v1257_v11 = vpack.c.b16 %v1256_v5, %v1255_v3 }
 0x6a7   : > { %v1190_v18 = vmul.f32 %v3663_v7, %v4210_v25  ;;  %v1178_v19 = vpop.xlane.xlu2 %1177  ;;  %v3665_v62 = vpop.eup %3664 }
 0x6a8   : > { %3666 = vrcp.f32 %v1178_v19  ;;  %3442 = vmatmul.msk.bf16.vlgmr.msrb.gmra.mxu2 %vm803_vm13, %v1257_v11  ;;  %v1193_v22 = vmul.f32 %v3665_v62, %v4204_v17  ;;  %v3444_v17 = vld [vmem:[%s5184_s4 + $0x20] sm:$0xff] }
 0x6a9   : > { %v1198_v23 = vpack.c.bf16 %v1190_v18, %v1190_v18 }
 0x6aa   : > { %v1201_v2 = vpack.c.bf16 %v1193_v22, %v1193_v22 }
 0x6ab   : > { %v1231_v9 = vunpack.c.l.b16 %v1198_v23  ;;  %v1372_v38 = vpop.permute.xlu0 %1371 }
 0x6ac   : > { %v1280_v31 = vunpack.c.l.b16 %v1201_v2 }
 0x6ad   : > { %v1232_v15 = vpack.c.b16 %v1231_v9, %v1230_v59 }
 0x6ae   : > { %v3667_v28 = vpop.eup %3666 }
 0x6af   : > { %v1194_v43 = vmul.f32 %v3667_v28, %v4214_v29  ;;  %v1422_v63 = vpop.permute.xlu2 %1421  ;;  %3441 = vmatmul.msk.bf16.vlgmr.msrb.gmra.mxu1 %vm803_vm13, %v1232_v15 }
 0x6b0   : > { %v1427_v25 = vsel %vm701_vm12, %v1422_v63, 0  ;;  %v1420_v39 = vpop.permute.xlu1 %1419 }
 0x6b1   : > { %v1202_v27 = vpack.c.bf16 %v1194_v43, %v1194_v43  ;;  %1436 = vmatpush.bf16.xpose.msra.mxu3 %v1427_v25 }
 0x6b3   : > { %v1281_v34 = vunpack.c.l.b16 %v1202_v27 }
 0x6b5   : > { %v1282_v30 = vpack.c.b16 %v1281_v34, %v1280_v31 }
 0x6b7   : > { %3443 = vmatmul.msk.bf16.vlgmr.msrb.gmra.mxu3 %vm803_vm13, %v1282_v30 }
 0x6b8   : > { %3448 = vmatmul.msk.bf16.vlgmr.msra.gmra.mxu2 %vm701_vm12, %v1396_v36  ;;  %v1545_v29 = vpop.permute.xlu1 %1544  ;;  %v1366_v35 = vpop.f32.mrf.mxu0 }
 0x6b9   : > { %v1367_v44 = vadd.f32 %v3444_v17, %v1366_v35  ;;  %1557 = vmatpush.bf16.msra.mxu0 %v1545_v29 }
 0x6bb   : > { %v1443_v37 = vsel %vm803_vm13, %v1367_v44, -inf }
 0x6bc   : > { %1444 = vmax.xlane.f32.xlu0 %v1443_v37 }
 0x6bf   : > { %3447 = vmatmul.msk.bf16.vlgmr.msra.gmra.mxu1 %vm701_vm12, %v1372_v38 }
 0x6c0   : > { %v1368_v26 = vpop.f32.mrf.mxu0 }
 0x6c1   : > { %v1369_v42 = vadd.f32 %v3445_v40, %v1368_v26 }
 0x6c3   : > { %v1446_v46 = vsel %vm803_vm13, %v1369_v42, -inf }
 0x6c4   : > { %1447 = vmax.xlane.f32.xlu2 %v1446_v46 }
 0x6c7   : > { %3449 = vmatmul.msk.bf16.vlgmr.msra.gmra.mxu3 %vm701_vm12, %v1420_v39 }
 0x718   : > { %v4254_v51 = vpop.f32.mrf.mxu3 }
 0x720   : > { %v4260_v60 = vpop.f32.mrf.mxu3 }
 0x72b   : > { %v4256_v49 = vpop.f32.mrf.mxu2 }
 0x72c   : > { %v4252_v36 = vpop.f32.mrf.mxu1 }
 0x72f   : > { %v1445_v52 = vpop.xlane.xlu0 %1444 }
 0x730   : > { %v1467_v53 = vsub.f32 %v1367_v44, %v1445_v52 }
 0x732   : > { %v1475_v56 = vmul.f32 1.442695, %v1467_v53 }
 0x733   : > { %v4262_v61 = vpop.f32.mrf.mxu2 }
 0x734   : > { %3668 = vpow2.f32 %v1475_v56  ;;  %v4258_v57 = vpop.f32.mrf.mxu1 }
 0x737   : > { %v1448_v58 = vpop.xlane.xlu2 %1447 }
 0x738   : > { %v1468_v54 = vsub.f32 %v1369_v42, %v1448_v58 }
 0x73a   : > { %v3669_v41 = vpop.eup %3668  ;;  %v1477_v33 = vmul.f32 1.442695, %v1468_v54  ;;  %v4266_v1 = vpop.f32.mrf.mxu3 }
 0x73b   : > { %v1491_v47 = vsel %vm803_vm13, %v3669_v41, 0.0  ;;  %v1414_v7 = vpop.f32.mrf.mxu2 }
 0x73c   : > { %3670 = vpow2.f32 %v1477_v33  ;;  %v1390_v45 = vpop.f32.mrf.mxu1  ;;  %1492 = vadd.xlane.f32.xlu2 %v1491_v47  ;;  %v1415_v11 = vadd.f32 %v3444_v17, %v1414_v7 }
 0x73d   : > { %v1391_v55 = vadd.f32 %v3444_v17, %v1390_v45 }
 0x73e   : > { %v1455_v18 = vsel %vm803_vm13, %v1415_v11, -inf }
 0x73f   : > { %v1449_v0 = vsel %vm803_vm13, %v1391_v55, -inf }
 0x740   : > { %1450 = vmax.xlane.f32.xlu1 %v1449_v0 }
 0x742   : > { %v3671_v3 = vpop.eup %3670  ;;  %v4269_v13 = vpop.f32.mrf.mxu3 }
 0x743   : > { %v1494_v5 = vsel %vm803_vm13, %v3671_v3, 0.0  ;;  %v1416_v15 = vpop.f32.mrf.mxu2 }
 0x744   : > { %1495 = vadd.xlane.f32.xlu0 %v1494_v5  ;;  %v1392_v19 = vpop.f32.mrf.mxu1  ;;  %v4280_v28 = vadd.f32 %v3445_v40, %v1416_v15 }
 0x745   : > { %v1393_v62 = vadd.f32 %v3445_v40, %v1392_v19 }
 0x746   : > { %v1458_v43 = vsel %vm803_vm13, %v4280_v28, -inf }
 0x747   : > { %v1452_v23 = vsel %vm803_vm13, %v1393_v62, -inf }
 0x74a   : > { %v1438_v59 = vpop.f32.mrf.mxu3 }
 0x74b   : > { %v1439_v22 = vadd.f32 %v3444_v17, %v1438_v59 }
 0x74c   : > { %1456 = vmax.xlane.f32.xlu0 %v1455_v18 }
 0x74d   : > { %v1461_v9 = vsel %vm803_vm13, %v1439_v22, -inf }
 0x752   : > { %v1440_v2 = vpop.f32.mrf.mxu3 }
 0x753   : > { %v4284_v63 = vadd.f32 %v3445_v40, %v1440_v2 }
 0x754   : > { %1453 = vmax.xlane.f32.xlu0 %v1452_v23  ;;  %1685 = vrot.lane.b32.xlu2 %v4037_v50, %s3813_s27 }
 0x755   : > { %v1464_v25 = vsel %vm803_vm13, %v4284_v63, -inf }
 0x759   : > { %1683 = vrot.lane.b32.xlu1 %v4037_v50, %s3814_s28 }
 0x75c   : > { %1462 = vmax.xlane.f32.xlu0 %v1461_v9 }
 0x770   : > { %1569 = vrot.lane.b32.xlu0 %v4035_v48, %s3812_s22 }
 0x77d   : > { %1459 = vmax.xlane.f32.xlu2 %v1458_v43 }
 0x783   : > { %1465 = vmax.xlane.f32.xlu1 %v1464_v25 }
 0x795   : > { %1709 = vrot.lane.b32.xlu2 %v4035_v48, %s3813_s27 }
 0x79c   : > { %1594 = vrot.lane.b32.xlu1 %v4054_v21, %s3812_s22 }
 0x79d   : > { %1733 = vrot.lane.b32.xlu2 %v4054_v21, %s3813_s27 }
 0x7a5   : > { %1707 = vrot.lane.b32.xlu2 %v4035_v48, %s3814_s28 }
 0x7ad   : > { %1619 = vrot.lane.b32.xlu2 %v4052_v20, %s3812_s22 }
 0x7af   : > { %v1493_v39 = vpop.xlane.xlu2 %1492 }
 0x7b0   : > { %3672 = vrcp.f32 %v1493_v39 }
 0x7b3   : > { %v1451_v37 = vpop.xlane.xlu1 %1450 }
 0x7b4   : > { %v1469_v26 = vsub.f32 %v1391_v55, %v1451_v37 }
 0x7b6   : > { %v3673_v30 = vpop.eup %3672  ;;  %v1479_v53 = vmul.f32 1.442695, %v1469_v26 }
 0x7b7   : > { %v1686_v27 = vpop.permute.xlu2 %1685  ;;  %v1496_v31 = vpop.xlane.xlu0 %1495  ;;  %v1523_v17 = vmul.f32 %v3673_v30, %v3669_v41 }
 0x7b8   : > { %v1691_v34 = vsel %vm701_vm12, %v1686_v27, 0  ;;  %3674 = vrcp.f32 %v1496_v31 }
 0x7b9   : > { %1700 = vmatpush.bf16.xpose.msrb.mxu0 %v1691_v34  ;;  %v1531_v44 = vpack.c.bf16 %v1523_v17, %v1523_v17  ;;  %3676 = vpow2.f32 %v1479_v53 }
 0x7bb   : > { %v1541_v42 = vunpack.c.l.b16 %v1531_v44 }
 0x7be   : > { %v3675_v29 = vpop.eup %3674 }
 0x7bf   : > { %v1457_v35 = vpop.xlane.xlu0 %1456  ;;  %v1524_v38 = vmul.f32 %v3675_v29, %v3671_v3  ;;  %v3677_v0 = vpop.eup %3676 }
 0x7c0   : > { %v1471_v33 = vsub.f32 %v1415_v11, %v1457_v35  ;;  %v1497_v7 = vsel %vm803_vm13, %v3677_v0, 0.0 }
 0x7c1   : > { %v1532_v40 = vpack.c.bf16 %v1524_v38, %v1524_v38 }
 0x7c2   : > { %v1483_v41 = vmul.f32 1.442695, %v1471_v33 }
 0x7c3   : > { %v1542_v46 = vunpack.c.l.b16 %v1532_v40 }
 0x7c5   : > { %v1543_v52 = vpack.c.b16 %v1542_v46, %v1541_v42 }
 0x7c7   : > { %v1454_v56 = vpop.xlane.xlu0 %1453  ;;  %3450 = vmatmul.msk.bf16.vlgmr.msra.gmra.mxu0 %vm803_vm13, %v1543_v52 }
 0x7c8   : > { %v1470_v58 = vsub.f32 %v1393_v62, %v1454_v56 }
 0x7ca   : > { %v1481_v54 = vmul.f32 1.442695, %v1470_v58 }
 0x7cb   : > { %v1684_v18 = vpop.permute.xlu1 %1683 }
 0x7cc   : > { %3678 = vpow2.f32 %v1481_v54  ;;  %v4330_v54 = vld [vmem:[%s5184_s4 + $0x30] sm:$0xff] }
 0x7cd   : > { %3680 = vpow2.f32 %v1483_v41 }
 0x7cf   : > { %v1463_v47 = vpop.xlane.xlu0 %1462 }
 0x7d0   : > { %v1473_v45 = vsub.f32 %v1439_v22, %v1463_v47 }
 0x7d2   : > { %v3679_v5 = vpop.eup %3678  ;;  %v1487_v3 = vmul.f32 1.442695, %v1473_v45 }
 0x7d3   : > { %v1500_v55 = vsel %vm803_vm13, %v3679_v5, 0.0  ;;  %v4303_v19 = vpop.eup %3680 }
 0x7d4   : > { %3682 = vpow2.f32 %v1487_v3  ;;  %1501 = vadd.xlane.f32.xlu0 %v1500_v55  ;;  %v1503_v23 = vsel %vm803_vm13, %v4303_v19, 0.0 }
 0x7d6   : > { %1498 = vadd.xlane.f32.xlu2 %v1497_v7 }
 0x7d7   : > { %3456 = vmatmul.msk.bf16.vlgmr.msrb.gmra.mxu0 %vm701_vm12, %v1684_v18 }
 0x7da   : > { %v4305_v11 = vpop.eup %3682 }
 0x7db   : > { %v1509_v62 = vsel %vm803_vm13, %v4305_v11, 0.0 }
 0x7dc   : > { %1510 = vadd.xlane.f32.xlu1 %v1509_v62 }
 0x7de   : > { %1504 = vadd.xlane.f32.xlu2 %v1503_v23 }
 0x7e2   : > { %v1570_v59 = vpop.permute.xlu0 %1569 }
 0x7e3   : > { %1582 = vmatpush.bf16.msrb.mxu1 %v1570_v59 }
 0x7f0   : > { %v1460_v22 = vpop.xlane.xlu2 %1459 }
 0x7f1   : > { %v1472_v9 = vsub.f32 %v4280_v28, %v1460_v22 }
 0x7f3   : > { %v1485_v15 = vmul.f32 1.442695, %v1472_v9 }
 0x7f5   : > { %3684 = vpow2.f32 %v1485_v15  ;;  %1757 = vrot.lane.b32.xlu1 %v4052_v20, %s3813_s27 }
 0x7f6   : > { %v1466_v2 = vpop.xlane.xlu1 %1465  ;;  %1731 = vrot.lane.b32.xlu2 %v4054_v21, %s3814_s28 }
 0x7f7   : > { %v1474_v43 = vsub.f32 %v4284_v63, %v1466_v2 }
 0x7f8   : > { %v1710_v25 = vpop.permute.xlu2 %1709 }
 0x7f9   : > { %v1489_v39 = vmul.f32 1.442695, %v1474_v43  ;;  %v1715_v27 = vsel %vm701_vm12, %v1710_v25, 0 }
 0x7fa   : > { %1724 = vmatpush.bf16.xpose.msra.mxu1 %v1715_v27 }
 0x7fb   : > { %v3685_v31 = vpop.eup %3684  ;;  %3686 = vpow2.f32 %v1489_v39 }
 0x7fc   : > { %v1506_v28 = vsel %vm803_vm13, %v3685_v31, 0.0 }
 0x7fd   : > { %1507 = vadd.xlane.f32.xlu0 %v1506_v28 }
 0x800   : > { %v1734_v34 = vpop.permute.xlu2 %1733 }
 0x801   : > { %v3687_v30 = vpop.eup %3686  ;;  %v1739_v44 = vsel %vm701_vm12, %v1734_v34, 0 }
 0x802   : > { %v1512_v17 = vsel %vm803_vm13, %v3687_v30, 0.0 }
 0x805   : > { %1513 = vadd.xlane.f32.xlu0 %v1512_v17 }
 0x808   : > { %v1708_v29 = vpop.permute.xlu2 %1707 }
 0x80e   : > { %v1595_v35 = vpop.permute.xlu1 %1594 }
 0x80f   : > { %1607 = vmatpush.bf16.msrb.mxu2 %v1595_v35 }
 0x810   : > { %v1620_v63 = vpop.permute.xlu2 %1619 }
 0x811   : > { %1632 = vmatpush.bf16.msrb.mxu3 %v1620_v63 }
 0x813   : > { %1748 = vmatpush.bf16.xpose.msra.mxu2 %v1739_v44 }
 0x819   : > { %1755 = vrot.lane.b32.xlu0 %v4052_v20, %s3814_s28 }
 0x844   : > { %v4323_v37 = vpop.f32.mrf.mxu0 }
 0x847   : > { %v1502_v38 = vpop.xlane.xlu0 %1501 }
 0x848   : > { %3688 = vrcp.f32 %v1502_v38 }
 0x849   : > { %v1499_v40 = vpop.xlane.xlu2 %1498 }
 0x84a   : > { %3690 = vrcp.f32 %v1499_v40 }
 0x84c   : > { %v4325_v26 = vpop.f32.mrf.mxu0 }
 0x84e   : > { %v3689_v42 = vpop.eup %3688 }
 0x84f   : > { %v1526_v46 = vmul.f32 %v3689_v42, %v3679_v5  ;;  %v1511_v18 = vpop.xlane.xlu1 %1510 }
 0x850   : > { %v3691_v52 = vpop.eup %3690 }
 0x851   : > { %v1534_v53 = vpack.c.bf16 %v1526_v46, %v1526_v46  ;;  %v1525_v56 = vmul.f32 %v3691_v52, %v3677_v0  ;;  %v4338_v0 = vld [vmem:[%s5184_s4 + $0x38] sm:$0xff]  ;;  %v1505_v59 = vpop.xlane.xlu2 %1504 }
 0x852   : > { %3692 = vrcp.f32 %v1505_v59 }
 0x853   : > { %v1533_v58 = vpack.c.bf16 %v1525_v56, %v1525_v56  ;;  %v1567_v33 = vunpack.c.l.b16 %v1534_v53 }
 0x854   : > { %v1702_v47 = vpop.f32.mrf.mxu0 }
 0x855   : > { %v1566_v41 = vunpack.c.l.b16 %v1533_v58  ;;  %v1703_v45 = vadd.f32 %v4330_v54, %v1702_v47 }
 0x857   : > { %v1568_v3 = vpack.c.b16 %v1567_v33, %v1566_v41  ;;  %v1779_v55 = vsel %vm803_vm13, %v1703_v45, -inf }
 0x858   : > { %1780 = vmax.xlane.f32.xlu2 %v1779_v55  ;;  %v3693_v15 = vpop.eup %3692 }
 0x859   : > { %3451 = vmatmul.msk.bf16.vlgmr.msrb.gmra.mxu1 %vm803_vm13, %v1568_v3  ;;  %v1527_v2 = vmul.f32 %v3693_v15, %v4303_v19 }
 0x85b   : > { %v1535_v25 = vpack.c.bf16 %v1527_v2, %v1527_v2 }
 0x85c   : > { %v1704_v5 = vpop.f32.mrf.mxu0 }
 0x85d   : > { %v1705_v7 = vadd.f32 %v4338_v0, %v1704_v5  ;;  %v1591_v35 = vunpack.c.l.b16 %v1535_v25 }
 0x85f   : > { %v1782_v62 = vsel %vm803_vm13, %v1705_v7, -inf }
 0x860   : > { %1783 = vmax.xlane.f32.xlu0 %v1782_v62 }
 0x867   : > { %v1758_v23 = vpop.permute.xlu1 %1757 }
 0x868   : > { %v1763_v22 = vsel %vm701_vm12, %v1758_v23, 0 }
 0x869   : > { %3457 = vmatmul.msk.bf16.vlgmr.msra.gmra.mxu1 %vm701_vm12, %v1708_v29  ;;  %1772 = vmatpush.bf16.xpose.msra.mxu3 %v1763_v22 }
 0x870   : > { %v1508_v9 = vpop.xlane.xlu0 %1507 }
 0x871   : > { %3694 = vrcp.f32 %v1508_v9 }
 0x872   : > { %3696 = vrcp.f32 %v1511_v18 }
 0x877   : > { %v3695_v43 = vpop.eup %3694 }
 0x878   : > { %v1528_v39 = vmul.f32 %v3695_v43, %v3685_v31  ;;  %v1514_v27 = vpop.xlane.xlu0 %1513  ;;  %v3697_v28 = vpop.eup %3696 }
 0x879   : > { %3698 = vrcp.f32 %v1514_v27  ;;  %v1529_v17 = vmul.f32 %v3697_v28, %v4305_v11  ;;  %v1732_v31 = vpop.permute.xlu2 %1731 }
 0x87a   : > { %v1536_v34 = vpack.c.bf16 %v1528_v39, %v1528_v39 }
 0x87b   : > { %v1537_v38 = vpack.c.bf16 %v1529_v17, %v1529_v17 }
 0x87c   : > { %v1592_v44 = vunpack.c.l.b16 %v1536_v34 }
 0x87d   : > { %v1616_v46 = vunpack.c.l.b16 %v1537_v38 }
 0x87e   : > { %v1593_v29 = vpack.c.b16 %v1592_v44, %v1591_v35 }
 0x87f   : > { %v3699_v63 = vpop.eup %3698 }
 0x880   : > { %v1530_v40 = vmul.f32 %v3699_v63, %v3687_v30  ;;  %3452 = vmatmul.msk.bf16.vlgmr.msrb.gmra.mxu2 %vm803_vm13, %v1593_v29 }
 0x882   : > { %v1538_v42 = vpack.c.bf16 %v1530_v40, %v1530_v40 }
 0x884   : > { %v1617_v19 = vunpack.c.l.b16 %v1538_v42 }
 0x886   : > { %v1618_v52 = vpack.c.b16 %v1617_v19, %v1616_v46 }
 0x888   : > { %3453 = vmatmul.msk.bf16.vlgmr.msrb.gmra.mxu3 %vm803_vm13, %v1618_v52 }
 0x88b   : > { %v1756_v53 = vpop.permute.xlu0 %1755 }
 0x890   : > { %3458 = vmatmul.msk.bf16.vlgmr.msra.gmra.mxu2 %vm701_vm12, %v1732_v31 }
 0x898   : > { %3459 = vmatmul.msk.bf16.vlgmr.msra.gmra.mxu3 %vm701_vm12, %v1756_v53 }
 0x8cb   : > { %v1781_v11 = vpop.xlane.xlu2 %1780 }
 0x8cc   : > { %v1803_v56 = vsub.f32 %v1703_v45, %v1781_v11 }
 0x8ce   : > { %v1811_v58 = vmul.f32 1.442695, %v1803_v56 }
 0x8d0   : > { %3700 = vpow2.f32 %v1811_v58 }
 0x8d3   : > { %v1784_v33 = vpop.xlane.xlu0 %1783 }
 0x8d4   : > { %v1804_v30 = vsub.f32 %v1705_v7, %v1784_v33 }
 0x8d6   : > { %v4350_v41 = vpop.f32.mrf.mxu1  ;;  %v4352_v47 = vpop.eup %3700  ;;  %v1813_v3 = vmul.f32 1.442695, %v1804_v30 }
 0x8d7   : > { %v1827_v55 = vsel %vm803_vm13, %v4352_v47, 0.0 }
 0x8d8   : > { %3702 = vpow2.f32 %v1813_v3  ;;  %1828 = vadd.xlane.f32.xlu2 %v1827_v55 }
 0x8de   : > { %v4356_v5 = vpop.f32.mrf.mxu1  ;;  %v4358_v18 = vpop.eup %3702 }
 0x8df   : > { %v1830_v45 = vsel %vm803_vm13, %v4358_v18, 0.0 }
 0x8e0   : > { %1831 = vadd.xlane.f32.xlu0 %v1830_v45 }
 0x8e6   : > { %v1726_v62 = vpop.f32.mrf.mxu1 }
 0x8e7   : > { %v1727_v7 = vadd.f32 %v4330_v54, %v1726_v62 }
 0x8e9   : > { %v1785_v23 = vsel %vm803_vm13, %v1727_v7, -inf }
 0x8ea   : > { %1786 = vmax.xlane.f32.xlu1 %v1785_v23 }
 0x8ee   : > { %v1728_v59 = vpop.f32.mrf.mxu1 }
 0x8ef   : > { %v1729_v22 = vadd.f32 %v4338_v0, %v1728_v59 }
 0x8f1   : > { %v1788_v9 = vsel %vm803_vm13, %v1729_v22, -inf }
 0x8f2   : > { %1789 = vmax.xlane.f32.xlu2 %v1788_v9 }
 0x903   : > { %v4366_v15 = vpop.f32.mrf.mxu2 }
 0x90b   : > { %v4368_v2 = vpop.f32.mrf.mxu2  ;;  %v4370_v43 = vpop.f32.mrf.mxu3 }
 0x913   : > { %v4372_v25 = vpop.f32.mrf.mxu3  ;;  %v1750_v39 = vpop.f32.mrf.mxu2 }
 0x914   : > { %v1751_v27 = vadd.f32 %v4330_v54, %v1750_v39 }
 0x916   : > { %v1791_v28 = vsel %vm803_vm13, %v1751_v27, -inf }
 0x917   : > { %1792 = vmax.xlane.f32.xlu2 %v1791_v28 }
 0x91b   : > { %v1752_v34 = vpop.f32.mrf.mxu2  ;;  %v1774_v17 = vpop.f32.mrf.mxu3 }
 0x91c   : > { %v1753_v35 = vadd.f32 %v4338_v0, %v1752_v34  ;;  %v1775_v44 = vadd.f32 %v4330_v54, %v1774_v17 }
 0x91e   : > { %v1794_v29 = vsel %vm803_vm13, %v1753_v35, -inf  ;;  %v1797_v63 = vsel %vm803_vm13, %v1775_v44, -inf }
 0x91f   : > { %1795 = vmax.xlane.f32.xlu2 %v1794_v29  ;;  %1798 = vmax.xlane.f32.xlu0 %v1797_v63 }
 0x923   : > { %v1776_v38 = vpop.f32.mrf.mxu3 }
 0x924   : > { %v4381_v40 = vadd.f32 %v4338_v0, %v1776_v38 }
 0x926   : > { %v1800_v42 = vsel %vm803_vm13, %v4381_v40, -inf }
 0x927   : > { %1801 = vmax.xlane.f32.xlu1 %v1800_v42 }
 0x937   : > { %1905 = vrot.lane.b32.xlu2 %v4035_v48, %s3815_s15 }
 0x940   : > { %1880 = vrot.lane.b32.xlu1 %v4037_v50, %s3815_s15 }
 0x94b   : > { %v1829_v54 = vpop.xlane.xlu2 %1828 }
 0x953   : > { %v1832_v50 = vpop.xlane.xlu0 %1831 }
 0x95d   : > { %v1787_v46 = vpop.xlane.xlu1 %1786 }
 0x95e   : > { %v1805_v19 = vsub.f32 %v1727_v7, %v1787_v46 }
 0x960   : > { %v1815_v52 = vmul.f32 1.442695, %v1805_v19 }
 0x962   : > { %3704 = vpow2.f32 %v1815_v52 }
 0x965   : > { %v1790_v31 = vpop.xlane.xlu2 %1789 }
 0x966   : > { %v1806_v53 = vsub.f32 %v1729_v22, %v1790_v31 }
 0x968   : > { %v4389_v0 = vpop.eup %3704  ;;  %v1817_v11 = vmul.f32 1.442695, %v1806_v53 }
 0x969   : > { %v1833_v56 = vsel %vm803_vm13, %v4389_v0, 0.0 }
 0x96a   : > { %3706 = vpow2.f32 %v1817_v11  ;;  %1834 = vadd.xlane.f32.xlu2 %v1833_v56 }
 0x970   : > { %v4393_v58 = vpop.eup %3706 }
 0x971   : > { %v1836_v48 = vsel %vm803_vm13, %v4393_v58, 0.0 }
 0x972   : > { %1837 = vadd.xlane.f32.xlu0 %v1836_v48 }
 0x98a   : > { %v1793_v33 = vpop.xlane.xlu2 %1792 }
 0x98b   : > { %v1807_v30 = vsub.f32 %v1751_v27, %v1793_v33 }
 0x98d   : > { %v1819_v3 = vmul.f32 1.442695, %v1807_v30 }
 0x98f   : > { %3708 = vpow2.f32 %v1819_v3 }
 0x992   : > { %v1796_v55 = vpop.xlane.xlu2 %1795  ;;  %v1799_v45 = vpop.xlane.xlu0 %1798 }
 0x993   : > { %v1808_v62 = vsub.f32 %v1753_v35, %v1796_v55  ;;  %v1809_v7 = vsub.f32 %v1775_v44, %v1799_v45 }
 0x995   : > { %v4397_v23 = vpop.eup %3708  ;;  %v1821_v59 = vmul.f32 1.442695, %v1808_v62  ;;  %v1823_v22 = vmul.f32 1.442695, %v1809_v7 }
 0x996   : > { %v1839_v9 = vsel %vm803_vm13, %v4397_v23, 0.0 }
 0x997   : > { %3710 = vpow2.f32 %v1821_v59  ;;  %1840 = vadd.xlane.f32.xlu2 %v1839_v9 }
 0x998   : > { %3712 = vpow2.f32 %v1823_v22 }
 0x999   : > { %3714 = vrcp.f32 %v1832_v50 }
 0x99a   : > { %v1906_v39 = vpop.permute.xlu2 %1905  ;;  %3716 = vrcp.f32 %v1829_v54  ;;  %v1802_v38 = vpop.xlane.xlu1 %1801 }
 0x99b   : > { %1918 = vmatpush.bf16.msrb.mxu1 %v1906_v39 }
 0x99d   : > { %v3711_v28 = vpop.eup %3710 }
 0x99e   : > { %v4401_v27 = vpop.eup %3712  ;;  %v1842_v34 = vsel %vm803_vm13, %v3711_v28, 0.0 }
 0x99f   : > { %1843 = vadd.xlane.f32.xlu0 %v1842_v34  ;;  %v1845_v17 = vsel %vm803_vm13, %v4401_v27, 0.0  ;;  %v3715_v35 = vpop.eup %3714 }
 0x9a0   : > { %1846 = vadd.xlane.f32.xlu1 %v1845_v17  ;;  %v3717_v44 = vpop.eup %3716  ;;  %v1860_v29 = vmul.f32 %v3715_v35, %v4358_v18 }
 0x9a1   : > { %v1859_v63 = vmul.f32 %v3717_v44, %v4352_v47 }
 0x9a2   : > { %v1868_v42 = vpack.c.bf16 %v1860_v29, %v1860_v29 }
 0x9a3   : > { %v1867_v46 = vpack.c.bf16 %v1859_v63, %v1859_v63 }
 0x9a4   : > { %v1878_v19 = vunpack.c.l.b16 %v1868_v42 }
 0x9a5   : > { %v1877_v52 = vunpack.c.l.b16 %v1867_v46 }
 0x9a7   : > { %v1879_v54 = vpack.c.b16 %v1878_v19, %v1877_v52 }
 0x9af   : > { %1955 = vrot.lane.b32.xlu2 %v4052_v20, %s3815_s15  ;;  %v1810_v20 = vsub.f32 %v4381_v40, %v1802_v38 }
 0x9b2   : > { %v1881_v31 = vpop.permute.xlu1 %1880 }
 0x9b3   : > { %1893 = vmatpush.bf16.msra.mxu0 %v1881_v31  ;;  %1930 = vrot.lane.b32.xlu0 %v4054_v21, %s3815_s15  ;;  %v1825_v21 = vmul.f32 1.442695, %v1810_v20  ;;  %s332_s15 = scalar_lea.vmem %s5189_s9, %s3522_s11 }
 0x9b5   : > { %3718 = vpow2.f32 %v1825_v21 }
 0x9b6   : > { %3460 = vmatmul.msk.bf16.vlgmr.msra.gmra.mxu0 %vm803_vm13, %v1879_v54 }
 0x9b7   : > { %1311 = vrot.lane.b32.xlu2 %v4254_v51, %s3816_s16 }
 0x9b9   : > { %1649 = vrot.lane.b32.xlu1 %v4325_v26, %s3817_s17 }
 0x9bb   : > { %v3719_v47 = vpop.eup %3718 }
 0x9bc   : > { %v1848_v51 = vsel %vm803_vm13, %v3719_v47, 0.0 }
 0x9bf   : > { %1313 = vrot.lane.b32.xlu2 %v4260_v60, %s3816_s16 }
 0x9c1   : > { %1651 = vrot.lane.b32.xlu1 %v4350_v41, %s3817_s17 }
 0x9c7   : > { %1647 = vrot.lane.b32.xlu2 %v4323_v37, %s3817_s17 }
 0x9dd   : > { %v1835_v18 = vpop.xlane.xlu2 %1834  ;;  %1849 = vadd.xlane.f32.xlu0 %v1848_v51 }
 0x9de   : > { %3720 = vrcp.f32 %v1835_v18 }
 0x9e4   : > { %v3721_v53 = vpop.eup %3720 }
 0x9e5   : > { %v1838_v26 = vpop.xlane.xlu0 %1837  ;;  %v1861_v60 = vmul.f32 %v3721_v53, %v4389_v0 }
 0x9e6   : > { %3722 = vrcp.f32 %v1838_v26 }
 0x9e7   : > { %v1869_v41 = vpack.c.bf16 %v1861_v60, %v1861_v60 }
 0x9e9   : > { %v1902_v48 = vunpack.c.l.b16 %v1869_v41 }
 0x9ec   : > { %v3723_v11 = vpop.eup %3722 }
 0x9ed   : > { %v1862_v56 = vmul.f32 %v3723_v11, %v4393_v58 }
 0x9ef   : > { %v1870_v37 = vpack.c.bf16 %v1862_v56, %v1862_v56 }
 0x9f1   : > { %v1903_v40 = vunpack.c.l.b16 %v1870_v37  ;;  %1315 = vrot.lane.b32.xlu0 %v4252_v36, %s3816_s16 }
 0x9f3   : > { %v1904_v50 = vpack.c.b16 %v1903_v40, %v1902_v48 }
 0x9f5   : > { %3461 = vmatmul.msk.bf16.vlgmr.msrb.gmra.mxu1 %vm803_vm13, %v1904_v50 }
 0xa0a   : > { %v1841_v33 = vpop.xlane.xlu2 %1840 }
 0xa12   : > { %v1956_v30 = vpop.permute.xlu2 %1955  ;;  %v1844_v3 = vpop.xlane.xlu0 %1843 }
 0xa13   : > { %3724 = vrcp.f32 %v1844_v3  ;;  %1968 = vmatpush.bf16.msrb.mxu3 %v1956_v30  ;;  %v1847_v22 = vpop.xlane.xlu1 %1846 }
 0xa14   : > { %3726 = vrcp.f32 %v1841_v33 }
 0xa15   : > { %3728 = vrcp.f32 %v1847_v22 }
 0xa19   : > { %v3725_v0 = vpop.eup %3724 }
 0xa1a   : > { %v3727_v55 = vpop.eup %3726  ;;  %v1312_v45 = vpop.permute.xlu2 %1311  ;;  %v1864_v58 = vmul.f32 %v3725_v0, %v3711_v28 }
 0xa1b   : > { %1336 = vst.msk [vmem:[#allocation2] sm:$0xff] %vm1335_vm14, %v1312_v45  ;;  %v1863_v62 = vmul.f32 %v3727_v55, %v4397_v23  ;;  %v3729_v63 = vpop.eup %3728 }
 0xa1c   : > { %v1872_v7 = vpack.c.bf16 %v1864_v58, %v1864_v58  ;;  %v1865_v38 = vmul.f32 %v3729_v63, %v4401_v27  ;;  %v3526_v27 = vld [vmem:[%s5185_s5] sm:$0xff] }
 0xa1d   : > { %v1871_v36 = vpack.c.bf16 %v1863_v62, %v1863_v62 }
 0xa1e   : > { %v1928_v9 = vunpack.c.l.b16 %v1872_v7  ;;  %v1873_v46 = vpack.c.bf16 %v1865_v38, %v1865_v38 }
 0xa1f   : > { %v1927_v39 = vunpack.c.l.b16 %v1871_v36 }
 0xa20   : > { %v1952_v31 = vunpack.c.l.b16 %v1873_v46 }
 0xa21   : > { %v1929_v17 = vpack.c.b16 %v1928_v9, %v1927_v39 }
 0xa22   : > { %v1314_v59 = vpop.permute.xlu2 %1313 }
 0xa23   : > { %1337 = vst.msk [vmem:[#allocation2 + $0x8] sm:$0xff] %vm1335_vm14, %v1314_v59 }
 0xa25   : > { %v1931_v34 = vpop.permute.xlu0 %1930 }
 0xa26   : > { %1943 = vmatpush.bf16.msrb.mxu2 %v1931_v34 }
 0xa29   : > { %3462 = vmatmul.msk.bf16.vlgmr.msrb.gmra.mxu2 %vm803_vm13, %v1929_v17 }
 0xa2a   : > { %v1648_v35 = vpop.permute.xlu2 %1647 }
 0xa2b   : > { %1672 = vst.msk [vmem:[#allocation2] sm:$0xff] %vm1671_vm15, %v1648_v35  ;;  %v1650_v28 = vpop.permute.xlu1 %1649 }
 0xa2c   : > { %1673 = vst.msk [vmem:[#allocation2 + $0x8] sm:$0xff] %vm1671_vm15, %v1650_v28  ;;  %v3565_v28 = vld [vmem:[%s5181_s1 + $0x2] ss:$0 sm:$0xff] }
 0xa33   : > { %v1895_v23 = vpop.f32.mrf.mxu0  ;;  %v1652_v20 = vpop.permute.xlu1 %1651 }
 0xa34   : > { %1983 = vrot.lane.b32.xlu2 %v1895_v23, %s3818_s18 }
 0xa3b   : > { %v1897_v44 = vpop.f32.mrf.mxu0 }
 0xa3c   : > { %1985 = vrot.lane.b32.xlu2 %v1897_v44, %s3818_s18 }
 0xa44   : > { %1317 = vrot.lane.b32.xlu2 %v4258_v57, %s3816_s16 }
 0xa4c   : > { %1653 = vrot.lane.b32.xlu2 %v4356_v5, %s3817_s17 }
 0xa50   : > { %v1850_v29 = vpop.xlane.xlu0 %1849 }
 0xa51   : > { %3730 = vrcp.f32 %v1850_v29 }
 0xa54   : > { %1319 = vrot.lane.b32.xlu2 %v4256_v49, %s3816_s16 }
 0xa57   : > { %v3731_v42 = vpop.eup %3730 }
 0xa58   : > { %v1866_v19 = vmul.f32 %v3731_v42, %v3719_v47 }
 0xa5a   : > { %v1874_v52 = vpack.c.bf16 %v1866_v19, %v1866_v19 }
 0xa5c   : > { %v1953_v54 = vunpack.c.l.b16 %v1874_v52  ;;  %1657 = vrot.lane.b32.xlu2 %v4368_v2, %s3817_s17  ;;  %v3527_v2 = vld [vmem:[%s5185_s5 + $0x8] sm:$0xff] }
 0xa5d   : > { %2063 = vmatpush.bf16.msrb.mxu0 %v3527_v2 }
 0xa5e   : > { %v1954_v57 = vpack.c.b16 %v1953_v54, %v1952_v31 }
 0xa60   : > { %3463 = vmatmul.msk.bf16.vlgmr.msrb.gmra.mxu3 %vm803_vm13, %v1954_v57 }
 0xa61   : > { %2064 = vmatpush.bf16.msrb.mxu0 %v3526_v27 }
 0xa63   : > { %v1316_v5 = vpop.permute.xlu0 %1315 }
 0xa64   : > { %1338 = vst.msk [vmem:[#allocation2 + $0x10] sm:$0xff] %vm1335_vm14, %v1316_v5  ;;  %1323 = vrot.lane.b32.xlu2 %v4266_v1, %s3816_s16 }
 0xa65   : > { %1674 = vst.msk [vmem:[#allocation2 + $0x10] sm:$0xff] %vm1671_vm15, %v1652_v20 }
 0xa6c   : > { %1661 = vrot.lane.b32.xlu2 %v4372_v25, %s3817_s17 }
 0xa72   : > { %v1920_v49 = vpop.f32.mrf.mxu1 }
 0xa73   : > { %1987 = vrot.lane.b32.xlu1 %v1920_v49, %s3818_s18 }
 0xa7a   : > { %v1922_v21 = vpop.f32.mrf.mxu1 }
 0xa7b   : > { %1321 = vrot.lane.b32.xlu1 %v4262_v61, %s3816_s16  ;;  %1989 = vrot.lane.b32.xlu0 %v1922_v21, %s3818_s18 }
 0xa83   : > { %1655 = vrot.lane.b32.xlu0 %v4366_v15, %s3817_s17 }
 0xa8e   : > { %v1984_v1 = vpop.permute.xlu2 %1983 }
 0xa8f   : > { %2008 = vst.msk [vmem:[#allocation2] sm:$0xff] %vm2007_vm1, %v1984_v1 }
 0xa96   : > { %v1986_v25 = vpop.permute.xlu2 %1985  ;;  %v2016_v51 = vld [vmem:[#allocation2] sm:$0xff] }
 0xa97   : > { %2009 = vst.msk [vmem:[#allocation2 + $0x8] sm:$0xff] %vm2007_vm1, %v1986_v25 }
 0xa9e   : > { %v1318_v47 = vpop.permute.xlu2 %1317  ;;  %v2017_v18 = vld [vmem:[#allocation2 + $0x8] sm:$0xff] }
 0xa9f   : > { %1339 = vst.msk [vmem:[#allocation2 + $0x18] sm:$0xff] %vm1335_vm14, %v1318_v47  ;;  %v2024_v26 = vpack.c.bf16 %v2017_v18, %v2016_v51 }
 0xaa1   : > { %3472 = vmatmul.msk.bf16.vlgmr.msrb.gmra.mxu0 %vm384_vm0, %v2024_v26 }
 0xaa6   : > { %v1654_v61 = vpop.permute.xlu2 %1653 }
 0xaa7   : > { %1675 = vst.msk [vmem:[#allocation2 + $0x18] sm:$0xff] %vm1671_vm15, %v1654_v61 }
 0xaac   : > { %v1945_v53 = vpop.f32.mrf.mxu2 }
 0xaad   : > { %1991 = vrot.lane.b32.xlu1 %v1945_v53, %s3818_s18 }
 0xaae   : > { %v1320_v15 = vpop.permute.xlu2 %1319 }
 0xaaf   : > { %1340 = vst.msk [vmem:[#allocation2 + $0x20] sm:$0xff] %vm1335_vm14, %v1320_v15 }
 0xab4   : > { %v1947_v60 = vpop.f32.mrf.mxu2 }
 0xab5   : > { %1325 = vrot.lane.b32.xlu1 %v4269_v13, %s3816_s16  ;;  %1993 = vrot.lane.b32.xlu0 %v1947_v60, %s3818_s18 }
 0xab6   : > { %v1658_v11 = vpop.permute.xlu2 %1657 }
 0xabd   : > { %1659 = vrot.lane.b32.xlu0 %v4370_v43, %s3817_s17 }
 0xabe   : > { %v1324_v41 = vpop.permute.xlu2 %1323 }
 0xabf   : > { %1342 = vst.msk [vmem:[#allocation2 + $0x30] sm:$0xff] %vm1335_vm14, %v1324_v41 }
 0xac6   : > { %v1662_v45 = vpop.permute.xlu2 %1661 }
 0xae3   : > { %v1970_v56 = vpop.f32.mrf.mxu3 }
 0xae4   : > { %1995 = vrot.lane.b32.xlu1 %v1970_v56, %s3818_s18 }
 0xae5   : > { %v1988_v37 = vpop.permute.xlu1 %1987 }
 0xae6   : > { %2010 = vst.msk [vmem:[#allocation2 + $0x10] sm:$0xff] %vm2007_vm1, %v1988_v37 }
 0xaeb   : > { %v1972_v48 = vpop.f32.mrf.mxu3 }
 0xaec   : > { %1997 = vrot.lane.b32.xlu0 %v1972_v48, %s3818_s18 }
 0xaed   : > { %v1322_v40 = vpop.permute.xlu1 %1321  ;;  %v1990_v13 = vpop.permute.xlu0 %1989  ;;  %v2018_v50 = vld [vmem:[#allocation2 + $0x10] sm:$0xff] }
 0xaee   : > { %1341 = vst.msk [vmem:[#allocation2 + $0x28] sm:$0xff] %vm1335_vm14, %v1322_v40 }
 0xaef   : > { %1677 = vst.msk [vmem:[#allocation2 + $0x28] sm:$0xff] %vm1671_vm15, %v1658_v11 }
 0xaf0   : > { %2011 = vst.msk [vmem:[#allocation2 + $0x18] sm:$0xff] %vm2007_vm1, %v1990_v13 }
 0xaf5   : > { %v1656_v43 = vpop.permute.xlu0 %1655 }
 0xaf6   : > { %1676 = vst.msk [vmem:[#allocation2 + $0x20] sm:$0xff] %vm1671_vm15, %v1656_v43 }
 0xaf7   : > { %v2019_v33 = vld [vmem:[#allocation2 + $0x18] sm:$0xff] }
 0xaf8   : > { %v2025_v30 = vpack.c.bf16 %v2019_v33, %v2018_v50 }
 0xafa   : > { %3473 = vmatmul.msk.bf16.gmra.mxu0 %vm384_vm0, %v2025_v30 }
 0xb1e   : > { %v2066_v9 = vpop.f32.mrf.mxu0 }
 0xb1f   : > { %v1992_v3 = vpop.permute.xlu1 %1991  ;;  %v2067_v23 = vadd.f32 %v3565_v28, %v2066_v9 }
 0xb20   : > { %2012 = vst.msk [vmem:[#allocation2 + $0x20] sm:$0xff] %vm2007_vm1, %v1992_v3 }
 0xb21   : > { %v2090_v29 = vrot.slane %v2067_v23, 4 }
 0xb26   : > { %v2068_v35 = vpop.f32.mrf.mxu0 }
 0xb27   : > { %v1326_v0 = vpop.permute.xlu1 %1325  ;;  %v1994_v55 = vpop.permute.xlu0 %1993  ;;  %v2020_v62 = vld [vmem:[#allocation2 + $0x20] sm:$0xff]  ;;  %v2069_v19 = vadd.f32 %v3565_v28, %v2068_v35 }
 0xb28   : > { %1343 = vst.msk [vmem:[#allocation2 + $0x38] sm:$0xff] %vm1335_vm14, %v1326_v0 }
 0xb29   : > { %1679 = vst.msk [vmem:[#allocation2 + $0x38] sm:$0xff] %vm1671_vm15, %v1662_v45  ;;  %v2096_v20 = vrot.slane %v2069_v19, 4 }
 0xb2a   : > { %2013 = vst.msk [vmem:[#allocation2 + $0x28] sm:$0xff] %vm2007_vm1, %v1994_v55 }
 0xb2f   : > { %v1660_v58 = vpop.permute.xlu0 %1659 }
 0xb30   : > { %1678 = vst.msk [vmem:[#allocation2 + $0x30] sm:$0xff] %vm1671_vm15, %v1660_v58 }
 0xb31   : > { %v2021_v7 = vld [vmem:[#allocation2 + $0x28] sm:$0xff] }
 0xb32   : > { %v2026_v36 = vpack.c.bf16 %v2021_v7, %v2020_v62 }
 0xb34   : > { %3474 = vmatmul.msk.bf16.gmra.mxu0 %vm384_vm0, %v2026_v36 }
 0xb56   : > { %v1996_v59 = vpop.permute.xlu1 %1995 }
 0xb57   : > { %2014 = vst.msk [vmem:[#allocation2 + $0x30] sm:$0xff] %vm2007_vm1, %v1996_v59 }
 0xb5e   : > { %v1998_v22 = vpop.permute.xlu0 %1997  ;;  %v2022_v39 = vld [vmem:[#allocation2 + $0x30] sm:$0xff] }
 0xb5f   : > { %2015 = vst.msk [vmem:[#allocation2 + $0x38] sm:$0xff] %vm2007_vm1, %v1998_v22 }
 0xb66   : > { %v2023_v34 = vld [vmem:[#allocation2 + $0x38] sm:$0xff] }
 0xb67   : > { %v2027_v17 = vpack.c.bf16 %v2023_v34, %v2022_v39 }
 0xb69   : > { %3475 = vmatmul.msk.bf16.gmra.mxu0 %vm384_vm0, %v2027_v17 }
 0xb77   : > { %v2071_v44 = vpop.f32.mrf.mxu0 }
 0xb78   : > { %v2072_v63 = vadd.f32 %v3565_v28, %v2071_v44 }
 0xb7a   : > { %v2087_v38 = vrot.slane %v2072_v63, 4  ;;  %v2111_v42 = vsel %vm675_vm11, %v2090_v29, %v2072_v63 }
 0xb7b   : > { %v4501_v46 = vadd.f32 %v2111_v42, %v3890_v6 }
 0xb7c   : > { %v2110_v52 = vsel %vm675_vm11, %v2067_v23, %v2087_v38 }
 0xb7d   : > { %v2129_v31 = vsel %vm384_vm0, %v4501_v46, 0.0  ;;  %v4507_v54 = vadd.f32 %v2110_v52, %v3886_v4 }
 0xb7e   : > { %2130 = vadd.xlane.f32.xlu1 %v2129_v31 }
 0xb7f   : > { %v2073_v57 = vpop.f32.mrf.mxu0  ;;  %v2126_v5 = vsel %vm384_vm0, %v4507_v54, 0.0 }
 0xb80   : > { %v2074_v49 = vadd.f32 %v3565_v28, %v2073_v57  ;;  %2127 = vadd.xlane.f32.xlu2 %v2126_v5  ;;  %v3529_v5 = vld [vmem:[%s5187_s7 + $0x8] sm:$0xff] }
 0xb81   : > { %2359 = vmatpush.bf16.msra.mxu1 %v3529_v5 }
 0xb82   : > { %v2093_v2 = vrot.slane %v2074_v49, 4  ;;  %v2113_v6 = vsel %vm675_vm11, %v2096_v20, %v2074_v49 }
 0xb83   : > { %v4513_v27 = vadd.f32 %v2113_v6, %v3898_v10  ;;  %v3528_v6 = vld [vmem:[%s5187_s7] sm:$0xff] }
 0xb84   : > { %v2112_v21 = vsel %vm675_vm11, %v2069_v19, %v2093_v2 }
 0xb85   : > { %v4517_v1 = vadd.f32 %v2112_v21, %v3894_v8  ;;  %v2135_v25 = vsel %vm384_vm0, %v4513_v27, 0.0  ;;  %2360 = vmatpush.bf16.msra.mxu1 %v3528_v6 }
 0xb87   : > { %v2132_v4 = vsel %vm384_vm0, %v4517_v1, 0.0 }
 0xb88   : > { %2133 = vadd.xlane.f32.xlu0 %v2132_v4  ;;  %2136 = vadd.xlane.f32.xlu2 %v2135_v25 }
 0xbb1   : > { %v2076_v47 = vpop.f32.mrf.mxu0 }
 0xbb2   : > { %v2077_v18 = vadd.f32 %v3565_v28, %v2076_v47 }
 0xbb4   : > { %v2102_v61 = vrot.slane %v2077_v18, 4 }
 0xbb9   : > { %v2078_v51 = vpop.f32.mrf.mxu0 }
 0xbba   : > { %v2079_v40 = vadd.f32 %v3565_v28, %v2078_v51 }
 0xbbc   : > { %v2108_v7 = vrot.slane %v2079_v40, 4 }
 0xbe6   : > { %v2081_v26 = vpop.f32.mrf.mxu0 }
 0xbe7   : > { %v2082_v10 = vadd.f32 %v3565_v28, %v2081_v26 }
 0xbe9   : > { %v2099_v53 = vrot.slane %v2082_v10, 4  ;;  %v2115_v15 = vsel %vm675_vm11, %v2102_v61, %v2082_v10 }
 0xbea   : > { %v4525_v8 = vadd.f32 %v2115_v15, %v3906_v14 }
 0xbeb   : > { %v2114_v60 = vsel %vm675_vm11, %v2077_v18, %v2099_v53 }
 0xbec   : > { %v2141_v11 = vsel %vm384_vm0, %v4525_v8, 0.0  ;;  %v4531_v41 = vadd.f32 %v2114_v60, %v3902_v12 }
 0xbed   : > { %2142 = vadd.xlane.f32.xlu0 %v2141_v11 }
 0xbee   : > { %v2083_v56 = vpop.f32.mrf.mxu0  ;;  %v2138_v37 = vsel %vm384_vm0, %v4531_v41, 0.0 }
 0xbef   : > { %v2084_v48 = vadd.f32 %v3565_v28, %v2083_v56  ;;  %2139 = vadd.xlane.f32.xlu1 %v2138_v37 }
 0xbf1   : > { %v2105_v13 = vrot.slane %v2084_v48, 4  ;;  %v2131_v43 = vpop.xlane.xlu1 %2130  ;;  %v2117_v36 = vsel %vm675_vm11, %v2108_v7, %v2084_v48 }
 0xbf2   : > { %v2151_v14 = vmul.f32 %v2131_v43, %v3914_v24  ;;  %v4559_v34 = vadd.f32 %v2117_v36, %v3924_v32 }
 0xbf3   : > { %v2116_v50 = vsel %vm675_vm11, %v2079_v40, %v2105_v13  ;;  %v2128_v33 = vpop.xlane.xlu2 %2127 }
 0xbf4   : > { %v4538_v30 = vsub.f32 %v4501_v46, %v2151_v14  ;;  %v2150_v12 = vmul.f32 %v2128_v33, %v3914_v24  ;;  %v4542_v3 = vadd.f32 %v2116_v50, %v3910_v16  ;;  %v2147_v44 = vsel %vm384_vm0, %v4559_v34, 0.0 }
 0xbf6   : > { %v4545_v0 = vsub.f32 %v4507_v54, %v2150_v12  ;;  %v2144_v55 = vsel %vm384_vm0, %v4542_v3, 0.0  ;;  %v2167_v45 = vmul.f32 %v4538_v30, %v4538_v30 }
 0xbf7   : > { %2145 = vadd.xlane.f32.xlu0 %v2144_v55 }
 0xbf8   : > { %v2177_v58 = vsel %vm384_vm0, %v2167_v45, 0.0  ;;  %v2166_v62 = vmul.f32 %v4545_v0, %v4545_v0 }
 0xbf9   : > { %2178 = vadd.xlane.f32.xlu1 %v2177_v58 }
 0xbfa   : > { %v2174_v16 = vsel %vm384_vm0, %v2166_v62, 0.0 }
 0xbfb   : > { %2175 = vadd.xlane.f32.xlu2 %v2174_v16  ;;  %v2137_v59 = vpop.xlane.xlu2 %2136  ;;  %v2134_v22 = vpop.xlane.xlu0 %2133 }
 0xbfc   : > { %v2153_v9 = vmul.f32 %v2137_v59, %v3914_v24  ;;  %v2152_v39 = vmul.f32 %v2134_v22, %v3914_v24 }
 0xbfe   : > { %v4562_v17 = vsub.f32 %v4513_v27, %v2153_v9  ;;  %v4565_v35 = vsub.f32 %v4517_v1, %v2152_v39 }
 0xc00   : > { %v2169_v28 = vmul.f32 %v4562_v17, %v4562_v17  ;;  %v2168_v23 = vmul.f32 %v4565_v35, %v4565_v35 }
 0xc02   : > { %v2183_v29 = vsel %vm384_vm0, %v2169_v28, 0.0  ;;  %v2180_v32 = vsel %vm384_vm0, %v2168_v23, 0.0  ;;  %v4616_v28 = vld [vmem:[%s5181_s1 + $0x3] ss:$0 sm:$0xff] }
 0xc03   : > { %2148 = vadd.xlane.f32.xlu2 %v2147_v44  ;;  %2184 = vadd.xlane.f32.xlu0 %v2183_v29 }
 0xc04   : > { %2181 = vadd.xlane.f32.xlu1 %v2180_v32 }
 0xc60   : > { %v2143_v63 = vpop.xlane.xlu0 %2142 }
 0xc61   : > { %v2155_v38 = vmul.f32 %v2143_v63, %v3914_v24 }
 0xc62   : > { %v2140_v42 = vpop.xlane.xlu1 %2139 }
 0xc63   : > { %v4577_v19 = vsub.f32 %v4525_v8, %v2155_v38  ;;  %v2154_v52 = vmul.f32 %v2140_v42, %v3914_v24 }
 0xc65   : > { %v4581_v31 = vsub.f32 %v4531_v41, %v2154_v52  ;;  %v2171_v57 = vmul.f32 %v4577_v19, %v4577_v19 }
 0xc67   : > { %v2189_v20 = vsel %vm384_vm0, %v2171_v57, 0.0  ;;  %v2170_v49 = vmul.f32 %v4581_v31, %v4581_v31  ;;  %v4622_v57 = vld [vmem:[%s5181_s1 + $0x4] ss:$0 sm:$0xff] }
 0xc68   : > { %2190 = vadd.xlane.f32.xlu1 %v2189_v20 }
 0xc69   : > { %v2186_v2 = vsel %vm384_vm0, %v2170_v49, 0.0 }
 0xc6a   : > { %2187 = vadd.xlane.f32.xlu2 %v2186_v2  ;;  %v2146_v21 = vpop.xlane.xlu0 %2145 }
 0xc6b   : > { %v2156_v4 = vmul.f32 %v2146_v21, %v3914_v24 }
 0xc6c   : > { %v2179_v25 = vpop.xlane.xlu1 %2178 }
 0xc6d   : > { %v2199_v47 = vmul.f32 %v2179_v25, %v3914_v24  ;;  %v4598_v51 = vsub.f32 %v4542_v3, %v2156_v4 }
 0xc6e   : > { %v2176_v18 = vpop.xlane.xlu2 %2175 }
 0xc6f   : > { %v2207_v26 = vadd.f32 1e-06, %v2199_v47  ;;  %v2198_v61 = vmul.f32 %v2176_v18, %v3914_v24  ;;  %v2172_v10 = vmul.f32 %v4598_v51, %v4598_v51 }
 0xc71   : > { %3732 = vrsqrt.f32 %v2207_v26  ;;  %v2206_v53 = vadd.f32 1e-06, %v2198_v61  ;;  %v2192_v15 = vsel %vm384_vm0, %v2172_v10, 0.0  ;;  %vm2230_vm3 = vweird.f32 %v2207_v26 }
 0xc72   : > { %2193 = vadd.xlane.f32.xlu0 %v2192_v15 }
 0xc73   : > { %3734 = vrsqrt.f32 %v2206_v53  ;;  %vm2220_vm6 = vweird.f32 %v2206_v53 }
 0xc76   : > { %v2149_v60 = vpop.xlane.xlu2 %2148  ;;  %v2185_v11 = vpop.xlane.xlu0 %2184 }
 0xc77   : > { %v3733_v56 = vpop.eup %3732  ;;  %v2157_v37 = vmul.f32 %v2149_v60, %v3914_v24  ;;  %v2182_v48 = vpop.xlane.xlu1 %2181  ;;  %v2201_v40 = vmul.f32 %v2185_v11, %v3914_v24 }
 0xc78   : > { %v2225_v13 = vmul.f32 %v3733_v56, %v2207_v26  ;;  %v2200_v43 = vmul.f32 %v2182_v48, %v3914_v24  ;;  %vm2231_vm2 = vweird.f32 %v3733_v56 }
 0xc79   : > { %v3735_v14 = vpop.eup %3734  ;;  %v4608_v50 = vsub.f32 %v4559_v34, %v2157_v37  ;;  %v2209_v33 = vadd.f32 1e-06, %v2201_v40  ;;  %vm2232_vm5 = vmor %vm2230_vm3, %vm2231_vm2 }
 0xc7a   : > { %v2226_v12 = vmul.f32 %v3733_v56, %v2225_v13  ;;  %v2215_v55 = vmul.f32 %v3735_v14, %v2206_v53  ;;  %v2208_v45 = vadd.f32 1e-06, %v2200_v43  ;;  %vm2221_vm4 = vweird.f32 %v3735_v14 }
 0xc7b   : > { %3736 = vrsqrt.f32 %v2209_v33  ;;  %v2173_v58 = vmul.f32 %v4608_v50, %v4608_v50  ;;  %vm2222_vm7 = vmor %vm2220_vm6, %vm2221_vm4  ;;  %vm2250_vm10 = vweird.f32 %v2209_v33 }
 0xc7c   : > { %v2227_v62 = vmul.f32 0.5, %v2226_v12  ;;  %v2216_v7 = vmul.f32 %v3735_v14, %v2215_v55  ;;  %3738 = vrsqrt.f32 %v2208_v45  ;;  %vm2240_vm11 = vweird.f32 %v2208_v45 }
 0xc7d   : > { %v2195_v16 = vsel %vm384_vm0, %v2173_v58, 0.0 }
 0xc7e   : > { %v2228_v36 = vsub.f32 1.5, %v2227_v62  ;;  %v2217_v59 = vmul.f32 0.5, %v2216_v7  ;;  %2196 = vadd.xlane.f32.xlu2 %v2195_v16 }
 0xc80   : > { %v2229_v22 = vmul.f32 %v3733_v56, %v2228_v36  ;;  %v2218_v9 = vsub.f32 1.5, %v2217_v59 }
 0xc81   : > { %v3737_v39 = vpop.eup %3736 }
 0xc82   : > { %v3739_v23 = vpop.eup %3738  ;;  %v2233_v44 = vsel %vm2232_vm5, %v3733_v56, %v2229_v22  ;;  %v2219_v29 = vmul.f32 %v3735_v14, %v2218_v9  ;;  %v2245_v32 = vmul.f32 %v3737_v39, %v2209_v33  ;;  %vm2251_vm8 = vweird.f32 %v3737_v39 }
 0xc83   : > { %v2295_v63 = vmul.f32 %v2233_v44, %v4538_v30  ;;  %v2235_v38 = vmul.f32 %v3739_v23, %v2208_v45  ;;  %vm2241_vm9 = vweird.f32 %v3739_v23  ;;  %vm2252_vm12 = vmor %vm2250_vm10, %vm2251_vm8 }
 0xc84   : > { %v2223_v42 = vsel %vm2222_vm7, %v3735_v14, %v2219_v29  ;;  %v2246_v52 = vmul.f32 %v3737_v39, %v2245_v32  ;;  %vm2242_vm13 = vmor %vm2240_vm11, %vm2241_vm9  ;;  %vm2499_vm11 = vcmask 1040384  }
 0xc85   : > { %v2304_v5 = vmul.f32 %v4616_v28, %v2295_v63  ;;  %v2294_v20 = vmul.f32 %v2223_v42, %v4545_v0  ;;  %v2236_v49 = vmul.f32 %v3739_v23, %v2235_v38 }
 0xc86   : > { %v2247_v2 = vmul.f32 0.5, %v2246_v52 }
 0xc87   : > { %v2303_v6 = vmul.f32 %v4616_v28, %v2294_v20  ;;  %v2237_v21 = vmul.f32 0.5, %v2236_v49  ;;  %v2313_v30 = vadd.f32 %v4622_v57, %v2304_v5 }
 0xc88   : > { %v2248_v4 = vsub.f32 1.5, %v2247_v2 }
 0xc89   : > { %v2312_v25 = vadd.f32 %v4622_v57, %v2303_v6  ;;  %v2238_v47 = vsub.f32 1.5, %v2237_v21 }
 0xc8a   : > { %v2249_v18 = vmul.f32 %v3737_v39, %v2248_v4 }
 0xc8b   : > { %v2239_v26 = vmul.f32 %v3739_v23, %v2238_v47  ;;  %v2320_v61 = vpack.c.bf16 %v2313_v30, %v2312_v25 }
 0xc8c   : > { %v2253_v0 = vsel %vm2252_vm12, %v3737_v39, %v2249_v18  ;;  %vm2645_vm12 = vcmask 1045504  }
 0xc8d   : > { %v2243_v10 = vsel %vm2242_vm13, %v3739_v23, %v2239_v26  ;;  %3484 = vmatmul.msk.bf16.vlgmr.msra.gmra.mxu1 %vm384_vm0, %v2320_v61  ;;  %v2297_v15 = vmul.f32 %v2253_v0, %v4562_v17  ;;  %vm3345_vm13 = vcmask 523264  }
 0xc8e   : > { %v2296_v53 = vmul.f32 %v2243_v10, %v4565_v35 }
 0xc8f   : > { %v2306_v11 = vmul.f32 %v4616_v28, %v2297_v15 }
 0xc90   : > { %v2305_v60 = vmul.f32 %v4616_v28, %v2296_v53 }
 0xc91   : > { %v2315_v37 = vadd.f32 %v4622_v57, %v2306_v11  ;;  %v4652_v11 = vld [vmem:[%s5186_s6 + $0xa] ss:$0 sm:$0xff] }
 0xc92   : > { %v2314_v56 = vadd.f32 %v4622_v57, %v2305_v60 }
 0xc94   : > { %v2321_v48 = vpack.c.bf16 %v2315_v37, %v2314_v56 }
 0xc9d   : > { %3485 = vmatmul.msk.bf16.gmra.mxu1 %vm384_vm0, %v2321_v48  ;;  %v4659_v48 = vld [vmem:[%s5186_s6 + $0xb] ss:$0 sm:$0xff] }
 0xcdb   : > { %v2191_v40 = vpop.xlane.xlu1 %2190 }
 0xcdc   : > { %v2203_v13 = vmul.f32 %v2191_v40, %v3914_v24 }
 0xcdd   : > { %v2188_v43 = vpop.xlane.xlu2 %2187 }
 0xcde   : > { %v2211_v14 = vadd.f32 1e-06, %v2203_v13  ;;  %v2202_v35 = vmul.f32 %v2188_v43, %v3914_v24  ;;  %v4666_v43 = vld [vmem:[%s5186_s6 + $0xc] ss:$0 sm:$0xff] }
 0xce0   : > { %3740 = vrsqrt.f32 %v2211_v14  ;;  %v2210_v17 = vadd.f32 1e-06, %v2202_v35  ;;  %vm2270_vm15 = vweird.f32 %v2211_v14 }
 0xce2   : > { %3742 = vrsqrt.f32 %v2210_v17  ;;  %vm2260_vm3 = vweird.f32 %v2210_v17 }
 0xce5   : > { %v2194_v33 = vpop.xlane.xlu0 %2193 }
 0xce6   : > { %v3741_v12 = vpop.eup %3740  ;;  %v2204_v55 = vmul.f32 %v2194_v33, %v3914_v24 }
 0xce7   : > { %v2265_v45 = vmul.f32 %v3741_v12, %v2211_v14  ;;  %vm2271_vm14 = vweird.f32 %v3741_v12 }
 0xce8   : > { %v3743_v58 = vpop.eup %3742  ;;  %v2212_v62 = vadd.f32 1e-06, %v2204_v55  ;;  %vm2272_vm2 = vmor %vm2270_vm15, %vm2271_vm14 }
 0xce9   : > { %v2266_v7 = vmul.f32 %v3741_v12, %v2265_v45  ;;  %v2255_v16 = vmul.f32 %v3743_v58, %v2210_v17  ;;  %vm2261_vm1 = vweird.f32 %v3743_v58 }
 0xcea   : > { %3744 = vrsqrt.f32 %v2212_v62  ;;  %vm2262_vm4 = vmor %vm2260_vm3, %vm2261_vm1  ;;  %vm2280_vm6 = vweird.f32 %v2212_v62 }
 0xceb   : > { %v2267_v36 = vmul.f32 0.5, %v2266_v7  ;;  %v2256_v59 = vmul.f32 %v3743_v58, %v2255_v16  ;;  %v4677_v7 = vld [vmem:[%s5186_s6 + $0x1] ss:$0 sm:$0xff] }
 0xced   : > { %v2268_v22 = vsub.f32 1.5, %v2267_v36  ;;  %v2257_v9 = vmul.f32 0.5, %v2256_v59 }
 0xcef   : > { %v2269_v39 = vmul.f32 %v3741_v12, %v2268_v22  ;;  %v2258_v23 = vsub.f32 1.5, %v2257_v9 }
 0xcf0   : > { %v3745_v44 = vpop.eup %3744 }
 0xcf1   : > { %v2273_v29 = vsel %vm2272_vm2, %v3741_v12, %v2269_v39  ;;  %v2259_v32 = vmul.f32 %v3743_v58, %v2258_v23  ;;  %v2275_v63 = vmul.f32 %v3745_v44, %v2212_v62  ;;  %v2197_v38 = vpop.xlane.xlu2 %2196  ;;  %vm2281_vm5 = vweird.f32 %v3745_v44 }
 0xcf2   : > { %v2299_v42 = vmul.f32 %v2273_v29, %v4577_v19  ;;  %v2205_v52 = vmul.f32 %v2197_v38, %v3914_v24  ;;  %vm2282_vm7 = vmor %vm2280_vm6, %vm2281_vm5 }
 0xcf3   : > { %v2263_v5 = vsel %vm2262_vm4, %v3743_v58, %v2259_v32  ;;  %v2276_v20 = vmul.f32 %v3745_v44, %v2275_v63 }
 0xcf4   : > { %v2298_v49 = vmul.f32 %v2263_v5, %v4581_v31  ;;  %v2213_v2 = vadd.f32 1e-06, %v2205_v52  ;;  %v2308_v6 = vmul.f32 %v4616_v28, %v2299_v42  ;;  %v4700_v52 = vld [vmem:[%s5186_s6] ss:$0 sm:$0xff] }
 0xcf5   : > { %v2277_v21 = vmul.f32 0.5, %v2276_v20 }
 0xcf6   : > { %3746 = vrsqrt.f32 %v2213_v2  ;;  %v2307_v4 = vmul.f32 %v4616_v28, %v2298_v49  ;;  %v2317_v25 = vadd.f32 %v4622_v57, %v2308_v6  ;;  %vm2290_vm9 = vweird.f32 %v2213_v2 }
 0xcf7   : > { %v2278_v47 = vsub.f32 1.5, %v2277_v21 }
 0xcf8   : > { %v2316_v30 = vadd.f32 %v4622_v57, %v2307_v4 }
 0xcf9   : > { %v2279_v24 = vmul.f32 %v3745_v44, %v2278_v47 }
 0xcfa   : > { %v2322_v19 = vpack.c.bf16 %v2317_v25, %v2316_v30 }
 0xcfb   : > { %v2283_v61 = vsel %vm2282_vm7, %v3745_v44, %v2279_v24  ;;  %v4694_v44 = vld [vmem:[%s5186_s6 + $0x2] ss:$0 sm:$0xff] }
 0xcfc   : > { %v3747_v18 = vpop.eup %3746  ;;  %3486 = vmatmul.msk.bf16.gmra.mxu1 %vm384_vm0, %v2322_v19  ;;  %v2300_v53 = vmul.f32 %v2283_v61, %v4598_v51 }
 0xcfd   : > { %v2285_v26 = vmul.f32 %v3747_v18, %v2213_v2  ;;  %vm2291_vm8 = vweird.f32 %v3747_v18 }
 0xcfe   : > { %vm2292_vm10 = vmor %vm2290_vm9, %vm2291_vm8  ;;  %v2309_v37 = vmul.f32 %v4616_v28, %v2300_v53 }
 0xcff   : > { %v2286_v31 = vmul.f32 %v3747_v18, %v2285_v26 }
 0xd00   : > { %v2318_v14 = vadd.f32 %v4622_v57, %v2309_v37 }
 0xd01   : > { %v2287_v0 = vmul.f32 0.5, %v2286_v31 }
 0xd03   : > { %v2288_v10 = vsub.f32 1.5, %v2287_v0 }
 0xd05   : > { %v2289_v15 = vmul.f32 %v3747_v18, %v2288_v10 }
 0xd07   : > { %v2293_v60 = vsel %vm2292_vm10, %v3747_v18, %v2289_v15 }
 0xd08   : > { %v2301_v56 = vmul.f32 %v2293_v60, %v4608_v50 }
 0xd0a   : > { %v2362_v40 = vpop.f32.mrf.mxu1  ;;  %v2310_v51 = vmul.f32 %v4616_v28, %v2301_v56  ;;  %v3819_v28 = vmov 0.0  }
 0xd0b   : > { %v2363_v13 = vadd.f32 %v4652_v11, %v2362_v40  ;;  %v2481_v55 = vrot.slane %v3819_v28, 7 }
 0xd0c   : > { %v2319_v50 = vadd.f32 %v4622_v57, %v2310_v51 }
 0xd0d   : > { %v2383_v35 = vmul.f32 %v4659_v48, %v2363_v13  ;;  %v4680_v16 = vsel %vm2499_vm11, 0.0, %v2481_v55  ;;  %v4683_v36 = vsel %vm2499_vm11, %v2481_v55, 0.0  ;;  %v4721_v13 = vld [vmem:[%s5186_s6 + $0x3] ss:$0 sm:$0xff] }
 0xd0e   : > { %v2323_v17 = vpack.c.bf16 %v2319_v50, %v2318_v14  ;;  %v2538_v39 = vmul.f32 %v4677_v7, %v4680_v16  ;;  %v2539_v23 = vmul.f32 %v4677_v7, %v4683_v36  ;;  %v2613_v49 = vmul.f32 %v4694_v44, %v4680_v16  ;;  %v4726_v14 = vld [vmem:[%s5186_s6 + $0x4] ss:$0 sm:$0xff]  ;;  %v4731_v50 = vld [vmem:[%s5186_s6 + $0x5] ss:$0 sm:$0xff] }
 0xd0f   : > { %v2392_v33 = vadd.f32 %v4666_v43, %v2383_v35  ;;  %v2614_v2 = vmul.f32 %v4694_v44, %v4683_v36  ;;  %v2520_v25 = vmul.f32 %v4700_v52, %v4680_v16 }
 0xd10   : > { %3487 = vmatmul.msk.bf16.gmra.mxu1 %vm384_vm0, %v2323_v17  ;;  %v2571_v5 = vrot.slane %v2538_v39, 1  ;;  %v2572_v20 = vrot.slane %v2539_v23, 1  ;;  %vm2570_vm0 = vcmask 1046528   ;;  %v2646_v18 = vrot.slane %v2613_v49, 2 }
 0xd11   : > { %v2408_v12 = vmul.f32 %v2392_v33, %v2392_v33  ;;  %v2647_v24 = vrot.slane %v2614_v2, 2  ;;  %v2400_v61 = vmul.f32 0.5, %v2392_v33 }
 0xd12   : > { %v2364_v45 = vpop.f32.mrf.mxu1  ;;  %v2573_v47 = vsel %vm2570_vm0, %v2571_v5, %v2572_v20 }
 0xd13   : > { %v2416_v58 = vmul.f32 %v2408_v12, %v2392_v33  ;;  %v2365_v62 = vadd.f32 %v4652_v11, %v2364_v45  ;;  %v2603_v56 = vadd.f32 %v2573_v47, %v2520_v25  ;;  %v2648_v37 = vsel %vm2645_vm12, %v2646_v18, %v2647_v24 }
 0xd15   : > { %v2424_v57 = vmul.f32 0.044715, %v2416_v58  ;;  %v2384_v59 = vmul.f32 %v4659_v48, %v2365_v62  ;;  %v2678_v12 = vadd.f32 %v2648_v37, %v2603_v56 }
 0xd17   : > { %v2432_v22 = vadd.f32 %v2424_v57, %v2392_v33  ;;  %v2393_v9 = vadd.f32 %v4666_v43, %v2384_v59 }
 0xd19   : > { %v2440_v29 = vmul.f32 0.7978846, %v2432_v22  ;;  %v2409_v32 = vmul.f32 %v2393_v9, %v2393_v9  ;;  %v2401_v28 = vmul.f32 0.5, %v2393_v9 }
 0xd1a   : > { %v2367_v63 = vpop.f32.mrf.mxu1 }
 0xd1b   : > { %3748 = vtanh.f32 %v2440_v29  ;;  %v2417_v38 = vmul.f32 %v2409_v32, %v2393_v9  ;;  %v2368_v42 = vadd.f32 %v4652_v11, %v2367_v63 }
 0xd1d   : > { %v2425_v6 = vmul.f32 0.044715, %v2417_v38  ;;  %v2385_v21 = vmul.f32 %v4659_v48, %v2368_v42 }
 0xd1f   : > { %v2433_v4 = vadd.f32 %v2425_v6, %v2393_v9  ;;  %v4708_v30 = vadd.f32 %v4666_v43, %v2385_v21 }
 0xd21   : > { %v3749_v19 = vpop.eup %3748  ;;  %v2441_v26 = vmul.f32 0.7978846, %v2433_v4  ;;  %v2410_v31 = vmul.f32 %v4708_v30, %v4708_v30 }
 0xd22   : > { %v2456_v0 = vadd.f32 1.0, %v3749_v19  ;;  %v2369_v10 = vpop.f32.mrf.mxu1 }
 0xd23   : > { %v2418_v53 = vmul.f32 %v2410_v31, %v4708_v30  ;;  %v2370_v15 = vadd.f32 %v4652_v11, %v2369_v10  ;;  %3750 = vtanh.f32 %v2441_v26  ;;  %v3537_v10 = vld [vmem:[%s5188_s8 + $0x38] sm:$0xff] }
 0xd24   : > { %v2464_v60 = vmul.f32 %v2456_v0, %v2400_v61  ;;  %3186 = vmatpush.bf16.msra.mxu2 %v3537_v10  ;;  %v3534_v10 = vld [vmem:[%s5188_s8 + $0x20] sm:$0xff] }
 0xd25   : > { %v2426_v40 = vmul.f32 0.044715, %v2418_v53  ;;  %v2386_v35 = vmul.f32 %v4659_v48, %v2370_v15 }
 0xd26   : > { %v2482_v51 = vrot.slane %v2464_v60, 7  ;;  %v2402_v60 = vmul.f32 0.5, %v4708_v30 }
 0xd27   : > { %v2434_v62 = vadd.f32 %v2426_v40, %v4708_v30  ;;  %v4746_v63 = vadd.f32 %v4666_v43, %v2386_v35  ;;  %v4770_v30 = vld [vmem:[%s5186_s6 + $0x7] ss:$0 sm:$0xff] }
 0xd28   : > { %v2501_v17 = vsel %vm2499_vm11, 0.0, %v2482_v51  ;;  %v2510_v33 = vsel %vm2499_vm11, %v2482_v51, 0.0 }
 0xd29   : > { %v2540_v55 = vmul.f32 %v4677_v7, %v2501_v17  ;;  %v2541_v45 = vmul.f32 %v4677_v7, %v2510_v33  ;;  %v2615_v58 = vmul.f32 %v4694_v44, %v2501_v17  ;;  %v3751_v57 = vpop.eup %3750  ;;  %v2616_v59 = vmul.f32 %v4694_v44, %v2510_v33 }
 0xd2a   : > { %v2688_v22 = vmul.f32 %v4721_v13, %v2501_v17  ;;  %v2706_v39 = vmul.f32 %v4726_v14, %v2501_v17  ;;  %v2707_v23 = vmul.f32 %v4726_v14, %v2510_v33  ;;  %v2780_v9 = vmul.f32 %v4731_v50, %v2501_v17 }
 0xd2b   : > { %v2574_v29 = vrot.slane %v2540_v55, 1  ;;  %v2575_v32 = vrot.slane %v2541_v45, 1  ;;  %v2521_v38 = vmul.f32 %v4700_v52, %v2501_v17  ;;  %v2649_v42 = vrot.slane %v2615_v58, 2 }
 0xd2c   : > { %v2738_v5 = vrot.slane %v2706_v39, 1  ;;  %v2739_v20 = vrot.slane %v2707_v23, 1  ;;  %v2650_v2 = vrot.slane %v2616_v59, 2  ;;  %v2781_v6 = vmul.f32 %v4731_v50, %v2510_v33 }
 0xd2d   : > { %v2576_v49 = vsel %vm2570_vm0, %v2574_v29, %v2575_v32  ;;  %v2457_v21 = vadd.f32 1.0, %v3751_v57  ;;  %v2696_v25 = vadd.f32 %v2688_v22, %v2678_v12  ;;  %v2442_v47 = vmul.f32 0.7978846, %v2434_v62  ;;  %v4779_v62 = vld [vmem:[%s5186_s6 + $0x8] ss:$0 sm:$0xff]  ;;  %v3536_v57 = vld [vmem:[%s5188_s8 + $0x30] sm:$0xff] }
 0xd2e   : > { %v2604_v4 = vadd.f32 %v2576_v49, %v2521_v38  ;;  %v2740_v19 = vsel %vm2570_vm0, %v2738_v5, %v2739_v20  ;;  %v2812_v18 = vrot.slane %v2780_v9, 2  ;;  %v2813_v24 = vrot.slane %v2781_v6, 2  ;;  %3187 = vmatpush.bf16.msra.mxu2 %v3536_v57  ;;  %v4788_v5 = vld [vmem:[%s5186_s6 + $0x6] ss:$0 sm:$0xff]  ;;  %v3533_v57 = vld [vmem:[%s5188_s8 + $0x18] sm:$0xff] }
 0xd2f   : > { %v2465_v26 = vmul.f32 %v2457_v21, %v2401_v28  ;;  %v2411_v31 = vmul.f32 %v4746_v63, %v4746_v63  ;;  %v2651_v61 = vsel %vm2645_vm12, %v2649_v42, %v2650_v2  ;;  %3752 = vtanh.f32 %v2442_v47  ;;  %v3535_v21 = vld [vmem:[%s5188_s8 + $0x28] sm:$0xff] }
 0xd30   : > { %v2679_v53 = vadd.f32 %v2651_v61, %v2604_v4  ;;  %v2770_v15 = vadd.f32 %v2740_v19, %v2696_v25  ;;  %v2814_v56 = vsel %vm2645_vm12, %v2812_v18, %v2813_v24 }
 0xd31   : > { %v2483_v0 = vrot.slane %v2465_v26, 7  ;;  %v2419_v51 = vmul.f32 %v2411_v31, %v4746_v63 }
 0xd32   : > { %v2844_v20 = vadd.f32 %v2814_v56, %v2770_v15  ;;  %3188 = vmatpush.bf16.msra.mxu2 %v3535_v21 }
 0xd33   : > { %v2502_v37 = vsel %vm2499_vm11, 0.0, %v2483_v0  ;;  %v2511_v40 = vsel %vm2499_vm11, %v2483_v0, 0.0  ;;  %v2427_v0 = vmul.f32 0.044715, %v2419_v51 }
 0xd34   : > { %v2522_v35 = vmul.f32 %v4700_v52, %v2502_v37  ;;  %v2542_v17 = vmul.f32 %v4677_v7, %v2502_v37  ;;  %v2543_v33 = vmul.f32 %v4677_v7, %v2511_v40  ;;  %v2617_v12 = vmul.f32 %v4694_v44, %v2502_v37 }
 0xd35   : > { %v2618_v28 = vmul.f32 %v4694_v44, %v2511_v40  ;;  %v2689_v55 = vmul.f32 %v4721_v13, %v2502_v37  ;;  %v2708_v45 = vmul.f32 %v4726_v14, %v2502_v37  ;;  %v2709_v58 = vmul.f32 %v4726_v14, %v2511_v40  ;;  %v3753_v29 = vpop.eup %3752 }
 0xd36   : > { %v2577_v59 = vrot.slane %v2542_v17, 1  ;;  %v2578_v22 = vrot.slane %v2543_v33, 1  ;;  %v2652_v39 = vrot.slane %v2617_v12, 2  ;;  %v2782_v23 = vmul.f32 %v4731_v50, %v2502_v37  ;;  %3189 = vmatpush.bf16.msra.mxu2 %v3534_v10  ;;  %v4831_v10 = vld [vmem:[%s5186_s6 + $0x9] ss:$0 sm:$0xff] }
 0xd37   : > { %v2653_v32 = vrot.slane %v2618_v28, 2  ;;  %v2697_v9 = vadd.f32 %v2689_v55, %v2679_v53  ;;  %v2741_v38 = vrot.slane %v2708_v45, 1  ;;  %v2742_v42 = vrot.slane %v2709_v58, 1 }
 0xd38   : > { %v2579_v49 = vsel %vm2570_vm0, %v2577_v59, %v2578_v22  ;;  %v2783_v2 = vmul.f32 %v4731_v50, %v2511_v40  ;;  %v2873_v6 = vmul.f32 %v4770_v30, %v2511_v40  ;;  %v2947_v19 = vmul.f32 %v4779_v62, %v2511_v40 }
 0xd39   : > { %v2605_v4 = vadd.f32 %v2579_v49, %v2522_v35  ;;  %v2654_v25 = vsel %vm2645_vm12, %v2652_v39, %v2653_v32  ;;  %v2743_v47 = vsel %vm2570_vm0, %v2741_v38, %v2742_v42  ;;  %v2815_v24 = vrot.slane %v2782_v23, 2 }
 0xd3a   : > { %v2771_v18 = vadd.f32 %v2743_v47, %v2697_v9  ;;  %v2816_v26 = vrot.slane %v2783_v2, 2  ;;  %v2458_v31 = vadd.f32 1.0, %v3753_v29  ;;  %v2905_v61 = vrot.slane %v2873_v6, 1  ;;  %3190 = vmatpush.bf16.msra.mxu2 %v3533_v57  ;;  %v3532_v47 = vld [vmem:[%s5188_s8 + $0x10] sm:$0xff] }
 0xd3b   : > { %v2854_v53 = vmul.f32 %v4788_v5, %v2502_v37  ;;  %v2872_v15 = vmul.f32 %v4770_v30, %v2502_v37  ;;  %v2979_v56 = vrot.slane %v2947_v19, 2  ;;  %v2946_v17 = vmul.f32 %v4779_v62, %v2502_v37 }
 0xd3c   : > { %v2466_v35 = vmul.f32 %v2458_v31, %v2402_v60  ;;  %v2680_v40 = vadd.f32 %v2654_v25, %v2605_v4  ;;  %v2435_v33 = vadd.f32 %v2427_v0, %v4746_v63  ;;  %v2817_v51 = vsel %vm2645_vm12, %v2815_v24, %v2816_v26 }
 0xd3d   : > { %v2862_v12 = vadd.f32 %v2854_v53, %v2844_v20  ;;  %v2904_v28 = vrot.slane %v2872_v15, 1  ;;  %v2978_v45 = vrot.slane %v2946_v17, 2  ;;  %v2845_v59 = vadd.f32 %v2817_v51, %v2771_v18  ;;  %v3531_v17 = vld [vmem:[%s5188_s8 + $0x8] sm:$0xff] }
 0xd3e   : > { %v2484_v55 = vrot.slane %v2466_v35, 7  ;;  %v2443_v58 = vmul.f32 0.7978846, %v2435_v33  ;;  %3191 = vmatpush.bf16.msra.mxu2 %v3532_v47 }
 0xd3f   : > { %v2906_v60 = vsel %vm2570_vm0, %v2904_v28, %v2905_v61  ;;  %v2980_v23 = vsel %vm2645_vm12, %v2978_v45, %v2979_v56  ;;  %v4842_v28 = vld [vmem:[%s5186_s6 + $0xd] ss:$0 sm:$0xff] }
 0xd40   : > { %v2503_v37 = vsel %vm2499_vm11, 0.0, %v2484_v55  ;;  %v2512_v22 = vsel %vm2499_vm11, %v2484_v55, 0.0  ;;  %v2936_v39 = vadd.f32 %v2906_v60, %v2862_v12  ;;  %3754 = vtanh.f32 %v2443_v58 }
 0xd41   : > { %v2523_v29 = vmul.f32 %v4700_v52, %v2503_v37  ;;  %v2544_v32 = vmul.f32 %v4677_v7, %v2503_v37  ;;  %v2545_v9 = vmul.f32 %v4677_v7, %v2512_v22  ;;  %v2619_v38 = vmul.f32 %v4694_v44, %v2503_v37 }
 0xd42   : > { %v2620_v42 = vmul.f32 %v4694_v44, %v2512_v22  ;;  %v2711_v20 = vmul.f32 %v4726_v14, %v2512_v22  ;;  %v2785_v49 = vmul.f32 %v4731_v50, %v2512_v22  ;;  %v2875_v2 = vmul.f32 %v4770_v30, %v2512_v22  ;;  %3192 = vmatpush.bf16.msra.mxu2 %v3531_v17 }
 0xd43   : > { %v2580_v6 = vrot.slane %v2544_v32, 1  ;;  %v2581_v21 = vrot.slane %v2545_v9, 1  ;;  %v2655_v4 = vrot.slane %v2619_v38, 2  ;;  %v2949_v25 = vmul.f32 %v4779_v62, %v2512_v22 }
 0xd44   : > { %v2656_v19 = vrot.slane %v2620_v42, 2  ;;  %v2745_v18 = vrot.slane %v2711_v20, 1  ;;  %v2819_v24 = vrot.slane %v2785_v49, 2  ;;  %v2908_v26 = vrot.slane %v2875_v2, 1 }
 0xd45   : > { %v2582_v31 = vsel %vm2570_vm0, %v2580_v6, %v2581_v21  ;;  %v2982_v61 = vrot.slane %v2949_v25, 2  ;;  %v2855_v0 = vmul.f32 %v4788_v5, %v2503_v37  ;;  %v2874_v56 = vmul.f32 %v4770_v30, %v2503_v37 }
 0xd46   : > { %v2606_v53 = vadd.f32 %v2582_v31, %v2523_v29  ;;  %v2657_v15 = vsel %vm2645_vm12, %v2655_v4, %v2656_v19  ;;  %v2948_v35 = vmul.f32 %v4779_v62, %v2503_v37  ;;  %v3010_v12 = vadd.f32 %v2980_v23, %v2936_v39  ;;  %v3755_v9 = vpop.eup %3754 }
 0xd47   : > { %v2863_v33 = vadd.f32 %v2855_v0, %v2845_v59  ;;  %v2690_v51 = vmul.f32 %v4721_v13, %v2503_v37  ;;  %v2710_v55 = vmul.f32 %v4726_v14, %v2503_v37  ;;  %v2907_v45 = vrot.slane %v2874_v56, 1  ;;  %v4853_v59 = vld [vmem:[%s5186_s6 + $0xe] ss:$0 sm:$0xff] }
 0xd48   : > { %v2981_v58 = vrot.slane %v2948_v35, 2  ;;  %v4846_v57 = vadd.f32 %v2657_v15, %v2606_v53  ;;  %v2784_v60 = vmul.f32 %v4731_v50, %v2503_v37  ;;  %v3019_v22 = vadd.f32 %v4831_v10, %v3010_v12  ;;  %v3530_v37 = vld [vmem:[%s5188_s8] sm:$0xff] }
 0xd49   : > { %v2698_v39 = vadd.f32 %v2690_v51, %v2680_v40  ;;  %v2744_v23 = vrot.slane %v2710_v55, 1  ;;  %v2909_v29 = vsel %vm2570_vm0, %v2907_v45, %v2908_v26  ;;  %v2403_v38 = vmul.f32 0.5, %v4746_v63  ;;  %3193 = vmatpush.bf16.msra.mxu2 %v3530_v37 }
 0xd4a   : > { %v2818_v32 = vrot.slane %v2784_v60, 2  ;;  %v2937_v42 = vadd.f32 %v2909_v29, %v2863_v33  ;;  %v3028_v20 = vmul.f32 %v4842_v28, %v3019_v22  ;;  %v2459_v2 = vadd.f32 1.0, %v3755_v9 }
 0xd4b   : > { %v2746_v49 = vsel %vm2570_vm0, %v2744_v23, %v2745_v18  ;;  %v2983_v40 = vsel %vm2645_vm12, %v2981_v58, %v2982_v61 }
 0xd4c   : > { %v2772_v6 = vadd.f32 %v2746_v49, %v2698_v39  ;;  %v2820_v21 = vsel %vm2645_vm12, %v2818_v32, %v2819_v24  ;;  %v3011_v4 = vadd.f32 %v2983_v40, %v2937_v42  ;;  %v3037_v25 = vadd.f32 %v4853_v59, %v3028_v20 }
 0xd4d   : > { %v2467_v63 = vmul.f32 %v2459_v2, %v2403_v38 }
 0xd4e   : > { %v2846_v47 = vadd.f32 %v2820_v21, %v2772_v6  ;;  %v3020_v19 = vadd.f32 %v4831_v10, %v3011_v4  ;;  %v3053_v26 = vmul.f32 %v3037_v25, %v3037_v25  ;;  %v3045_v21 = vmul.f32 0.5, %v3037_v25 }
 0xd4f   : > { %v2485_v31 = vrot.slane %v2467_v63, 7 }
 0xd50   : > { %v3029_v0 = vmul.f32 %v4842_v28, %v3020_v19  ;;  %v3061_v53 = vmul.f32 %v3053_v26, %v3037_v25 }
 0xd51   : > { %v4868_v18 = vsel %vm2499_vm11, %v2485_v31, 0.0  ;;  %v4872_v24 = vsel %vm2499_vm11, 0.0, %v2485_v31 }
 0xd52   : > { %v3038_v61 = vadd.f32 %v4853_v59, %v3029_v0  ;;  %v2877_v15 = vmul.f32 %v4770_v30, %v4868_v18  ;;  %v3069_v35 = vmul.f32 0.044715, %v3061_v53  ;;  %v2856_v12 = vmul.f32 %v4788_v5, %v4872_v24 }
 0xd53   : > { %v2876_v55 = vmul.f32 %v4770_v30, %v4872_v24  ;;  %v2950_v22 = vmul.f32 %v4779_v62, %v4872_v24  ;;  %v2951_v39 = vmul.f32 %v4779_v62, %v4868_v18 }
 0xd54   : > { %v3054_v56 = vmul.f32 %v3038_v61, %v3038_v61  ;;  %v3077_v33 = vadd.f32 %v3069_v35, %v3037_v25  ;;  %v2911_v51 = vrot.slane %v2877_v15, 1  ;;  %v2864_v29 = vadd.f32 %v2856_v12, %v2846_v47 }
 0xd55   : > { %v2910_v60 = vrot.slane %v2876_v55, 1  ;;  %v2984_v38 = vrot.slane %v2950_v22, 2  ;;  %v2985_v37 = vrot.slane %v2951_v39, 2  ;;  %v3046_v4 = vmul.f32 0.5, %v3038_v61 }
 0xd56   : > { %v3062_v17 = vmul.f32 %v3054_v56, %v3038_v61  ;;  %v3085_v58 = vmul.f32 0.7978846, %v3077_v33  ;;  %v2546_v39 = vmul.f32 %v4677_v7, %v4872_v24 }
 0xd57   : > { %v2912_v32 = vsel %vm2570_vm0, %v2910_v60, %v2911_v51  ;;  %v2986_v49 = vsel %vm2645_vm12, %v2984_v38, %v2985_v37  ;;  %v2713_v38 = vmul.f32 %v4726_v14, %v4868_v18  ;;  %v2712_v37 = vmul.f32 %v4726_v14, %v4872_v24 }
 0xd58   : > { %v3070_v45 = vmul.f32 0.044715, %v3062_v17  ;;  %3756 = vtanh.f32 %v3085_v58  ;;  %v2938_v42 = vadd.f32 %v2912_v32, %v2864_v29  ;;  %v2547_v29 = vmul.f32 %v4677_v7, %v4868_v18 }
 0xd5a   : > { %v3078_v23 = vadd.f32 %v3070_v45, %v3038_v61  ;;  %v3012_v2 = vadd.f32 %v2986_v49, %v2938_v42  ;;  %v2583_v49 = vrot.slane %v2546_v39, 1 }
 0xd5c   : > { %v3086_v9 = vmul.f32 0.7978846, %v3078_v23  ;;  %v3021_v19 = vadd.f32 %v4831_v10, %v3012_v2  ;;  %v2584_v2 = vrot.slane %v2547_v29, 1 }
 0xd5e   : > { %3758 = vtanh.f32 %v3086_v9  ;;  %v3757_v20 = vpop.eup %3756  ;;  %v3030_v0 = vmul.f32 %v4842_v28, %v3021_v19  ;;  %v2622_v19 = vmul.f32 %v4694_v44, %v4868_v18 }
 0xd5f   : > { %v3101_v40 = vadd.f32 1.0, %v3757_v20 }
 0xd60   : > { %v3039_v53 = vadd.f32 %v4853_v59, %v3030_v0  ;;  %v2786_v0 = vmul.f32 %v4731_v50, %v4872_v24 }
 0xd61   : > { %v3109_v26 = vmul.f32 %v3101_v40, %v3045_v21  ;;  %v2621_v21 = vmul.f32 %v4694_v44, %v4872_v24 }
 0xd62   : > { %v3055_v15 = vmul.f32 %v3039_v53, %v3039_v53  ;;  %v2821_v29 = vrot.slane %v2786_v0, 2 }
 0xd64   : > { %v3759_v6 = vpop.eup %3758  ;;  %v3063_v35 = vmul.f32 %v3055_v15, %v3039_v53  ;;  %v2585_v15 = vsel %vm2570_vm0, %v2583_v49, %v2584_v2 }
 0xd65   : > { %v3102_v63 = vadd.f32 1.0, %v3759_v6  ;;  %v2691_v6 = vmul.f32 %v4721_v13, %v4872_v24 }
 0xd66   : > { %v3071_v25 = vmul.f32 0.044715, %v3063_v35 }
 0xd67   : > { %v3110_v47 = vmul.f32 %v3102_v63, %v3046_v4  ;;  %v2748_v4 = vrot.slane %v2713_v38, 1  ;;  %v2747_v63 = vrot.slane %v2712_v37, 1 }
 0xd68   : > { %v3079_v55 = vadd.f32 %v3071_v25, %v3039_v53  ;;  %v2524_v25 = vmul.f32 %v4700_v52, %v4872_v24 }
 0xd69   : > { %v3117_v31 = vpack.c.bf16 %v3110_v47, %v3109_v26  ;;  %v2787_v26 = vmul.f32 %v4731_v50, %v4868_v18 }
 0xd6a   : > { %v3087_v23 = vmul.f32 0.7978846, %v3079_v55  ;;  %v2659_v55 = vrot.slane %v2622_v19, 2 }
 0xd6b   : > { %3194 = vmatmul.bf16.vlgmr.msra.gmra.mxu2 %v3117_v31 }
 0xd6c   : > { %3760 = vtanh.f32 %v3087_v23 }
 0xd79   : > { %v2372_v56 = vpop.f32.mrf.mxu1 }
 0xd7a   : > { %v2373_v17 = vadd.f32 %v4652_v11, %v2372_v56 }
 0xd7c   : > { %v2387_v33 = vmul.f32 %v4659_v48, %v2373_v17  ;;  %v2699_v17 = vadd.f32 %v2691_v6, %v4846_v57 }
 0xd7e   : > { %v2396_v61 = vadd.f32 %v4666_v43, %v2387_v33  ;;  %v3761_v33 = vpop.eup %3760 }
 0xd7f   : > { %v3103_v38 = vadd.f32 1.0, %v3761_v33 }
 0xd80   : > { %v2412_v12 = vmul.f32 %v2396_v61, %v2396_v61  ;;  %v2404_v39 = vmul.f32 0.5, %v2396_v61 }
 0xd81   : > { %v2374_v51 = vpop.f32.mrf.mxu1 }
 0xd82   : > { %v2420_v45 = vmul.f32 %v2412_v12, %v2396_v61  ;;  %v2375_v58 = vadd.f32 %v4652_v11, %v2374_v51  ;;  %v2658_v12 = vrot.slane %v2621_v21, 2  ;;  %v2749_v51 = vsel %vm2570_vm0, %v2747_v63, %v2748_v4 }
 0xd84   : > { %v2428_v60 = vmul.f32 0.044715, %v2420_v45  ;;  %v2388_v22 = vmul.f32 %v4659_v48, %v2375_v58  ;;  %v2822_v45 = vrot.slane %v2787_v26, 2 }
 0xd86   : > { %v2436_v32 = vadd.f32 %v2428_v60, %v2396_v61  ;;  %v2397_v9 = vadd.f32 %v4666_v43, %v2388_v22  ;;  %v2607_v22 = vadd.f32 %v2585_v15, %v2524_v25 }
 0xd88   : > { %v2444_v42 = vmul.f32 0.7978846, %v2436_v32  ;;  %v2413_v20 = vmul.f32 %v2397_v9, %v2397_v9  ;;  %v2773_v32 = vadd.f32 %v2749_v51, %v2699_v17  ;;  %v2405_v19 = vmul.f32 0.5, %v2397_v9 }
 0xd8a   : > { %3762 = vtanh.f32 %v2444_v42  ;;  %v2421_v40 = vmul.f32 %v2413_v20, %v2397_v9  ;;  %v3047_v42 = vmul.f32 0.5, %v3039_v53  ;;  %v2660_v20 = vsel %vm2645_vm12, %v2658_v12, %v2659_v55 }
 0xd8b   : > { %v4925_v61 = vadd.f32 %v2660_v20, %v2607_v22 }
 0xd8c   : > { %v2429_v47 = vmul.f32 0.044715, %v2421_v40  ;;  %v2823_v40 = vsel %vm2645_vm12, %v2821_v29, %v2822_v45  ;;  %v4923_v21 = vmul.f32 %v3103_v38, %v3047_v42 }
 0xd8d   : > { %v2377_v31 = vpop.f32.mrf.mxu1  ;;  %v2847_v6 = vadd.f32 %v2823_v40, %v2773_v32 }
 0xd8e   : > { %v2437_v56 = vadd.f32 %v2429_v47, %v2397_v9  ;;  %v2378_v35 = vadd.f32 %v4652_v11, %v2377_v31 }
 0xd90   : > { %v3763_v18 = vpop.eup %3762  ;;  %v2445_v58 = vmul.f32 0.7978846, %v2437_v56  ;;  %v2389_v60 = vmul.f32 %v4659_v48, %v2378_v35 }
 0xd91   : > { %v2460_v23 = vadd.f32 1.0, %v3763_v18 }
 0xd92   : > { %3764 = vtanh.f32 %v2445_v58  ;;  %v2398_v57 = vadd.f32 %v4666_v43, %v2389_v60 }
 0xd93   : > { %v2468_v37 = vmul.f32 %v2460_v23, %v2404_v39 }
 0xd94   : > { %v2414_v24 = vmul.f32 %v2398_v57, %v2398_v57  ;;  %v4948_v45 = vmul.f32 0.5, %v2398_v57 }
 0xd95   : > { %v2486_v49 = vrot.slane %v2468_v37, 7  ;;  %v2379_v2 = vpop.f32.mrf.mxu1 }
 0xd96   : > { %v2422_v26 = vmul.f32 %v2414_v24, %v2398_v57  ;;  %v2380_v15 = vadd.f32 %v4652_v11, %v2379_v2 }
 0xd97   : > { %v4928_v4 = vsel %vm2499_vm11, 0.0, %v2486_v49  ;;  %v2514_v63 = vsel %vm2499_vm11, %v2486_v49, 0.0 }
 0xd98   : > { %v3765_v47 = vpop.eup %3764  ;;  %v2548_v53 = vmul.f32 %v4677_v7, %v4928_v4  ;;  %v2549_v31 = vmul.f32 %v4677_v7, %v2514_v63  ;;  %v2623_v0 = vmul.f32 %v4694_v44, %v4928_v4  ;;  %v2624_v56 = vmul.f32 %v4694_v44, %v2514_v63 }
 0xd99   : > { %v4939_v35 = vmul.f32 %v4726_v14, %v2514_v63  ;;  %v4942_v17 = vmul.f32 %v4731_v50, %v2514_v63  ;;  %v2879_v9 = vmul.f32 %v4770_v30, %v2514_v63  ;;  %v2461_v51 = vadd.f32 1.0, %v3765_v47 }
 0xd9a   : > { %v2586_v33 = vrot.slane %v2548_v53, 1  ;;  %v2587_v25 = vrot.slane %v2549_v31, 1  ;;  %v2661_v12 = vrot.slane %v2623_v0, 2  ;;  %v2525_v18 = vmul.f32 %v4700_v52, %v4928_v4 }
 0xd9b   : > { %v2662_v55 = vrot.slane %v2624_v56, 2  ;;  %v2751_v11 = vrot.slane %v4939_v35, 1  ;;  %v2469_v60 = vmul.f32 %v2461_v51, %v2405_v19  ;;  %v2430_v22 = vmul.f32 0.044715, %v2422_v26 }
 0xd9c   : > { %v2588_v58 = vsel %vm2570_vm0, %v2586_v33, %v2587_v25  ;;  %v2390_v39 = vmul.f32 %v4659_v48, %v2380_v15  ;;  %v2857_v32 = vmul.f32 %v4788_v5, %v4928_v4  ;;  %v2878_v38 = vmul.f32 %v4770_v30, %v4928_v4 }
 0xd9d   : > { %v2608_v23 = vadd.f32 %v2588_v58, %v2525_v18  ;;  %v2663_v37 = vsel %vm2645_vm12, %v2661_v12, %v2662_v55  ;;  %v2914_v24 = vrot.slane %v2879_v9, 1  ;;  %v2487_v42 = vrot.slane %v2469_v60, 7 }
 0xd9e   : > { %v2438_v20 = vadd.f32 %v2430_v22, %v2398_v57  ;;  %v2399_v49 = vadd.f32 %v4666_v43, %v2390_v39  ;;  %v2865_v2 = vadd.f32 %v2857_v32, %v2847_v6  ;;  %v2913_v40 = vrot.slane %v2878_v38, 1 }
 0xd9f   : > { %v2952_v48 = vmul.f32 %v4779_v62, %v4928_v4  ;;  %v4962_v19 = vsel %vm2499_vm11, 0.0, %v2487_v42  ;;  %v4965_v26 = vsel %vm2499_vm11, %v2487_v42, 0.0  ;;  %v2953_v53 = vmul.f32 %v4779_v62, %v2514_v63 }
 0xda0   : > { %v2446_v47 = vmul.f32 0.7978846, %v2438_v20  ;;  %v2550_v31 = vmul.f32 %v4677_v7, %v4962_v19  ;;  %v2551_v43 = vmul.f32 %v4677_v7, %v4965_v26  ;;  %v2625_v57 = vmul.f32 %v4694_v44, %v4962_v19 }
 0xda1   : > { %v2683_v6 = vadd.f32 %v2663_v37, %v2608_v23  ;;  %v2626_v0 = vmul.f32 %v4694_v44, %v4965_v26  ;;  %v2717_v15 = vmul.f32 %v4726_v14, %v4965_v26  ;;  %v2791_v56 = vmul.f32 %v4731_v50, %v4965_v26 }
 0xda2   : > { %v4982_v63 = vmul.f32 %v4770_v30, %v4965_v26  ;;  %v2589_v9 = vrot.slane %v2550_v31, 1  ;;  %v2590_v33 = vrot.slane %v2551_v43, 1  ;;  %3766 = vtanh.f32 %v2446_v47 }
 0xda3   : > { %v4984_v25 = vmul.f32 0.5, %v2399_v49  ;;  %v2526_v12 = vmul.f32 %v4700_v52, %v4962_v19  ;;  %v2664_v51 = vrot.slane %v2625_v57, 2  ;;  %v2665_v18 = vrot.slane %v2626_v0, 2 }
 0xda4   : > { %v2754_v55 = vrot.slane %v2717_v15, 1  ;;  %v2828_v58 = vrot.slane %v2791_v56, 2  ;;  %v2415_v60 = vmul.f32 %v2399_v49, %v2399_v49  ;;  %v2915_v22 = vsel %vm2570_vm0, %v2913_v40, %v2914_v24 }
 0xda5   : > { %v2987_v39 = vrot.slane %v2952_v48, 2  ;;  %v2591_v23 = vsel %vm2570_vm0, %v2589_v9, %v2590_v33  ;;  %v2939_v38 = vadd.f32 %v2915_v22, %v2865_v2  ;;  %v2988_v37 = vrot.slane %v2953_v53, 2 }
 0xda6   : > { %v2423_v42 = vmul.f32 %v2415_v60, %v2399_v49  ;;  %v2692_v20 = vmul.f32 %v4721_v13, %v4928_v4  ;;  %v2693_v47 = vmul.f32 %v4721_v13, %v4962_v19  ;;  %v2714_v31 = vmul.f32 %v4726_v14, %v4928_v4 }
 0xda7   : > { %v2989_v43 = vsel %vm2645_vm12, %v2987_v39, %v2988_v37  ;;  %v2716_v24 = vmul.f32 %v4726_v14, %v4962_v19  ;;  %v2788_v40 = vmul.f32 %v4731_v50, %v4928_v4  ;;  %v2790_v2 = vmul.f32 %v4731_v50, %v4962_v19 }
 0xda8   : > { %v3767_v48 = vpop.eup %3766  ;;  %v2431_v53 = vmul.f32 0.044715, %v2423_v42  ;;  %v3013_v57 = vadd.f32 %v2989_v43, %v2939_v38  ;;  %v2700_v0 = vadd.f32 %v2692_v20, %v4925_v61  ;;  %v2701_v15 = vadd.f32 %v2693_v47, %v2683_v6 }
 0xda9   : > { %v2462_v56 = vadd.f32 1.0, %v3767_v48  ;;  %v2750_v9 = vrot.slane %v2714_v31, 1  ;;  %v2753_v33 = vrot.slane %v2716_v24, 1  ;;  %v2824_v60 = vrot.slane %v2788_v40, 2 }
 0xdaa   : > { %v5005_v22 = vadd.f32 %v2591_v23, %v2526_v12  ;;  %v2439_v39 = vadd.f32 %v2431_v53, %v2399_v49  ;;  %v3022_v37 = vadd.f32 %v4831_v10, %v3013_v57  ;;  %v2827_v32 = vrot.slane %v2790_v2, 2 }
 0xdab   : > { %v5009_v4 = vsel %vm2645_vm12, %v2664_v51, %v2665_v18  ;;  %v2470_v29 = vmul.f32 %v2462_v56, %v4948_v45  ;;  %v2752_v61 = vsel %vm2570_vm0, %v2750_v9, %v2751_v11  ;;  %v2755_v6 = vsel %vm2570_vm0, %v2753_v33, %v2754_v55 }
 0xdac   : > { %v2447_v38 = vmul.f32 0.7978846, %v2439_v39  ;;  %v3031_v42 = vmul.f32 %v4842_v28, %v3022_v37  ;;  %v2774_v12 = vadd.f32 %v2752_v61, %v2700_v0  ;;  %v2775_v23 = vadd.f32 %v2755_v6, %v2701_v15 }
 0xdad   : > { %v2488_v49 = vrot.slane %v2470_v29, 7  ;;  %v5190_v20 = vrot.slane %v4942_v17, 2  ;;  %v2858_v51 = vmul.f32 %v4788_v5, %v4962_v19  ;;  %v2880_v35 = vmul.f32 %v4770_v30, %v4962_v19 }
 0xdae   : > { %3768 = vtanh.f32 %v2447_v38  ;;  %v3040_v11 = vadd.f32 %v4853_v59, %v3031_v42  ;;  %v2829_v45 = vsel %vm2645_vm12, %v2827_v32, %v2828_v58  ;;  %v2954_v18 = vmul.f32 %v4779_v62, %v4962_v19 }
 0xdaf   : > { %v2826_v47 = vsel %vm2645_vm12, %v2824_v60, %v5190_v20  ;;  %v5029_v29 = vsel %vm2499_vm11, 0.0, %v2488_v49  ;;  %v2516_v17 = vsel %vm2499_vm11, %v2488_v49, 0.0  ;;  %v2849_v31 = vadd.f32 %v2829_v45, %v2775_v23 }
 0xdb0   : > { %v2848_v55 = vadd.f32 %v2826_v47, %v2774_v12  ;;  %v2552_v43 = vmul.f32 %v4677_v7, %v5029_v29  ;;  %v2553_v24 = vmul.f32 %v4677_v7, %v2516_v17  ;;  %v2628_v40 = vmul.f32 %v4694_v44, %v2516_v17 }
 0xdb1   : > { %v5037_v2 = vmul.f32 %v4726_v14, %v2516_v17  ;;  %v5040_v58 = vmul.f32 %v4731_v50, %v2516_v17  ;;  %v2883_v19 = vmul.f32 %v4770_v30, %v2516_v17  ;;  %v2627_v32 = vmul.f32 %v4694_v44, %v5029_v29 }
 0xdb2   : > { %v2916_v48 = vrot.slane %v2880_v35, 1  ;;  %v2592_v53 = vrot.slane %v2552_v43, 1  ;;  %v2593_v57 = vrot.slane %v2553_v24, 1  ;;  %v2527_v0 = vmul.f32 %v4700_v52, %v5029_v29 }
 0xdb3   : > { %v2955_v7 = vmul.f32 %v4779_v62, %v4965_v26  ;;  %v2668_v15 = vrot.slane %v2628_v40, 2  ;;  %v2757_v56 = vrot.slane %v5037_v2, 1  ;;  %v2831_v9 = vrot.slane %v5040_v58, 2 }
 0xdb4   : > { %v2667_v33 = vrot.slane %v2627_v32, 2  ;;  %v3769_v60 = vpop.eup %3768  ;;  %v2594_v39 = vsel %vm2570_vm0, %v2592_v53, %v2593_v57  ;;  %v2920_v37 = vrot.slane %v2883_v19, 1  ;;  %v3056_v44 = vmul.f32 %v3040_v11, %v3040_v11 }
 0xdb5   : > { %v2866_v61 = vadd.f32 %v2858_v51, %v2848_v55  ;;  %v2463_v6 = vadd.f32 1.0, %v3769_v60  ;;  %v2610_v38 = vadd.f32 %v2594_v39, %v2527_v0  ;;  %v2859_v52 = vmul.f32 %v4788_v5, %v5029_v29 }
 0xdb6   : > { %v2882_v26 = vmul.f32 %v4770_v30, %v5029_v29  ;;  %v5056_v42 = vmul.f32 0.5, %v3040_v11  ;;  %v3064_v12 = vmul.f32 %v3056_v44, %v3040_v11  ;;  %v5191_v23 = vrot.slane %v4982_v63, 1 }
 0xdb7   : > { %v2956_v20 = vmul.f32 %v4779_v62, %v5029_v29  ;;  %v2471_v47 = vmul.f32 %v2463_v6, %v4984_v25  ;;  %v2669_v51 = vsel %vm2645_vm12, %v2667_v33, %v2668_v15  ;;  %v2957_v43 = vmul.f32 %v4779_v62, %v2516_v17 }
 0xdb8   : > { %v2918_v49 = vsel %vm2570_vm0, %v2916_v48, %v5191_v23  ;;  %v2919_v35 = vrot.slane %v2882_v26, 1  ;;  %v3072_v55 = vmul.f32 0.044715, %v3064_v12  ;;  %v2990_v24 = vrot.slane %v2954_v18, 2 }
 0xdb9   : > { %v2940_v45 = vadd.f32 %v2918_v49, %v2866_v61  ;;  %v2991_v40 = vrot.slane %v2955_v7, 2  ;;  %v2489_v19 = vrot.slane %v2471_v47, 7  ;;  %v2685_v32 = vadd.f32 %v2669_v51, %v2610_v38 }
 0xdba   : > { %v2867_v53 = vadd.f32 %v2859_v52, %v2849_v31  ;;  %v2921_v63 = vsel %vm2570_vm0, %v2919_v35, %v2920_v37  ;;  %v3080_v48 = vadd.f32 %v3072_v55, %v3040_v11  ;;  %v2993_v0 = vrot.slane %v2956_v20, 2 }
 0xdbb   : > { %v2992_v57 = vsel %vm2645_vm12, %v2990_v24, %v2991_v40  ;;  %v2684_v25 = vadd.f32 %v5009_v4, %v5005_v22  ;;  %v2508_v15 = vsel %vm2499_vm11, 0.0, %v2489_v19  ;;  %v2517_v33 = vsel %vm2499_vm11, %v2489_v19, 0.0 }
 0xdbc   : > { %v2994_v60 = vrot.slane %v2957_v43, 2  ;;  %v3014_v17 = vadd.f32 %v2992_v57, %v2940_v45  ;;  %v2695_v18 = vmul.f32 %v4721_v13, %v2508_v15  ;;  %v2720_v7 = vmul.f32 %v4726_v14, %v2508_v15 }
 0xdbd   : > { %v2721_v31 = vmul.f32 %v4726_v14, %v2517_v33  ;;  %v2794_v11 = vmul.f32 %v4731_v50, %v2508_v15  ;;  %v2795_v39 = vmul.f32 %v4731_v50, %v2517_v33  ;;  %v2884_v37 = vmul.f32 %v4770_v30, %v2508_v15 }
 0xdbe   : > { %v2885_v22 = vmul.f32 %v4770_v30, %v2517_v33  ;;  %v2941_v4 = vadd.f32 %v2921_v63, %v2867_v53  ;;  %v2703_v44 = vadd.f32 %v2695_v18, %v2685_v32  ;;  %v2759_v61 = vrot.slane %v2720_v7, 1 }
 0xdbf   : > { %v2760_v6 = vrot.slane %v2721_v31, 1  ;;  %v2833_v38 = vrot.slane %v2794_v11, 2  ;;  %v2834_v52 = vrot.slane %v2795_v39, 2  ;;  %v2922_v26 = vrot.slane %v2884_v37, 1 }
 0xdc0   : > { %v2959_v12 = vmul.f32 %v4779_v62, %v2517_v33  ;;  %v2694_v23 = vmul.f32 %v4721_v13, %v5029_v29  ;;  %v3088_v20 = vmul.f32 0.7978846, %v3080_v48  ;;  %v2995_v47 = vsel %vm2645_vm12, %v2993_v0, %v2994_v60 }
 0xdc1   : > { %v2761_v49 = vsel %vm2570_vm0, %v2759_v61, %v2760_v6  ;;  %v3023_v51 = vadd.f32 %v4831_v10, %v3014_v17  ;;  %v2835_v45 = vsel %vm2645_vm12, %v2833_v38, %v2834_v52  ;;  %v2923_v55 = vrot.slane %v2885_v22, 1 }
 0xdc2   : > { %v2777_v35 = vadd.f32 %v2761_v49, %v2703_v44  ;;  %v3015_v43 = vadd.f32 %v2995_v47, %v2941_v4  ;;  %3770 = vtanh.f32 %v3088_v20  ;;  %v2718_v40 = vmul.f32 %v4726_v14, %v5029_v29 }
 0xdc3   : > { %v3032_v24 = vmul.f32 %v4842_v28, %v3023_v51  ;;  %v2792_v13 = vmul.f32 %v4731_v50, %v5029_v29  ;;  %v2702_v32 = vadd.f32 %v2694_v23, %v2684_v25  ;;  %v2861_v63 = vmul.f32 %v4788_v5, %v4680_v16 }
 0xdc4   : > { %v3024_v19 = vadd.f32 %v4831_v10, %v3015_v43  ;;  %v2851_v53 = vadd.f32 %v2835_v45, %v2777_v35  ;;  %v2756_v57 = vrot.slane %v2718_v40, 1  ;;  %v2886_v33 = vmul.f32 %v4770_v30, %v4680_v16 }
 0xdc5   : > { %v3041_v48 = vadd.f32 %v4853_v59, %v3032_v24  ;;  %v2830_v0 = vrot.slane %v2792_v13, 2  ;;  %v2997_v60 = vrot.slane %v2959_v12, 2  ;;  %v2860_v17 = vmul.f32 %v4788_v5, %v2508_v15 }
 0xdc6   : > { %v3033_v14 = vmul.f32 %v4842_v28, %v3024_v19  ;;  %v2887_v50 = vmul.f32 %v4770_v30, %v4683_v36  ;;  %v2758_v25 = vsel %vm2570_vm0, %v2756_v57, %v2757_v56  ;;  %v2869_v7 = vadd.f32 %v2861_v63, %v2851_v53 }
 0xdc7   : > { %v3057_v29 = vmul.f32 %v3041_v48, %v3041_v48  ;;  %v2832_v18 = vsel %vm2645_vm12, %v2830_v0, %v2831_v9  ;;  %v2776_v11 = vadd.f32 %v2758_v25, %v2702_v32  ;;  %v2925_v39 = vrot.slane %v2886_v33, 1 }
 0xdc8   : > { %v3042_v31 = vadd.f32 %v4853_v59, %v3033_v14  ;;  %v2926_v37 = vrot.slane %v2887_v50, 1  ;;  %v3771_v22 = vpop.eup %3770  ;;  %v2958_v4 = vmul.f32 %v4779_v62, %v2508_v15  ;;  %v2960_v30 = vmul.f32 %v4779_v62, %v4680_v16 }
 0xdc9   : > { %v3065_v5 = vmul.f32 %v3057_v29, %v3041_v48  ;;  %v2961_v2 = vmul.f32 %v4779_v62, %v4683_v36  ;;  %v3104_v56 = vadd.f32 1.0, %v3771_v22  ;;  %v2850_v44 = vadd.f32 %v2832_v18, %v2776_v11 }
 0xdca   : > { %v3058_v58 = vmul.f32 %v3042_v31, %v3042_v31  ;;  %v2924_v9 = vsel %vm2570_vm0, %v2922_v26, %v2923_v55  ;;  %v2927_v6 = vsel %vm2570_vm0, %v2925_v39, %v2926_v37  ;;  %v2996_v38 = vrot.slane %v2958_v4, 2 }
 0xdcb   : > { %v3073_v61 = vmul.f32 0.044715, %v3065_v5  ;;  %v2999_v52 = vrot.slane %v2960_v30, 2  ;;  %v3112_v12 = vmul.f32 %v3104_v56, %v5056_v42  ;;  %v2868_v15 = vadd.f32 %v2860_v17, %v2850_v44 }
 0xdcc   : > { %v3066_v23 = vmul.f32 %v3058_v58, %v3042_v31  ;;  %v2943_v49 = vadd.f32 %v2927_v6, %v2869_v7  ;;  %v3000_v16 = vrot.slane %v2961_v2, 2  ;;  %v2998_v35 = vsel %vm2645_vm12, %v2996_v38, %v2997_v60  ;;  %v5128_v58 = vld [vmem:[%s5181_s1 + $0x5] ss:$0 sm:$0xff]  ;;  %v5139_v38 = vld [vmem:[%s5181_s1 + $0x7] ss:$0 sm:$0xff] }
 0xdcd   : > { %v3081_v20 = vadd.f32 %v3073_v61, %v3041_v48  ;;  %v3118_v47 = vpack.c.bf16 %v3112_v12, %v4923_v21  ;;  %v2942_v62 = vadd.f32 %v2924_v9, %v2868_v15  ;;  %v3049_v14 = vmul.f32 0.5, %v3041_v48  ;;  %v5133_v9 = vld [vmem:[%s5181_s1 + $0x6] ss:$0 sm:$0xff] }
 0xdce   : > { %v3074_v36 = vmul.f32 0.044715, %v3066_v23  ;;  %v3001_v26 = vsel %vm2645_vm12, %v2999_v52, %v3000_v16  ;;  %v3050_v17 = vmul.f32 0.5, %v3042_v31 }
 0xdcf   : > { %v3089_v51 = vmul.f32 0.7978846, %v3081_v20  ;;  %3199 = vmatmul.bf16.gmra.mxu2 %v3118_v47  ;;  %v3016_v55 = vadd.f32 %v2998_v35, %v2942_v62  ;;  %v3017_v43 = vadd.f32 %v3001_v26, %v2943_v49 }
 0xdd0   : > { %v3082_v45 = vadd.f32 %v3074_v36, %v3042_v31 }
 0xdd1   : > { %3772 = vtanh.f32 %v3089_v51  ;;  %v3025_v24 = vadd.f32 %v4831_v10, %v3016_v55  ;;  %v3026_v40 = vadd.f32 %v4831_v10, %v3017_v43 }
 0xdd2   : > { %v3090_v42 = vmul.f32 0.7978846, %v3082_v45 }
 0xdd3   : > { %v3034_v21 = vmul.f32 %v4842_v28, %v3025_v24  ;;  %v3035_v13 = vmul.f32 %v4842_v28, %v3026_v40 }
 0xdd4   : > { %3774 = vtanh.f32 %v3090_v42 }
 0xdd5   : > { %v3043_v19 = vadd.f32 %v4853_v59, %v3034_v21  ;;  %v3044_v32 = vadd.f32 %v4853_v59, %v3035_v13 }
 0xdd7   : > { %v3773_v53 = vpop.eup %3772  ;;  %v3059_v63 = vmul.f32 %v3043_v19, %v3043_v19  ;;  %v3060_v0 = vmul.f32 %v3044_v32, %v3044_v32  ;;  %v3052_v30 = vmul.f32 0.5, %v3044_v32  ;;  %v3051_v31 = vmul.f32 0.5, %v3043_v19 }
 0xdd8   : > { %v3105_v57 = vadd.f32 1.0, %v3773_v53 }
 0xdd9   : > { %v3067_v60 = vmul.f32 %v3059_v63, %v3043_v19  ;;  %v3068_v29 = vmul.f32 %v3060_v0, %v3044_v32 }
 0xdda   : > { %v3775_v33 = vpop.eup %3774  ;;  %v3113_v25 = vmul.f32 %v3105_v57, %v3049_v14 }
 0xddb   : > { %v3106_v50 = vadd.f32 1.0, %v3775_v33  ;;  %v3075_v10 = vmul.f32 0.044715, %v3067_v60  ;;  %v3076_v7 = vmul.f32 0.044715, %v3068_v29 }
 0xddd   : > { %v3114_v18 = vmul.f32 %v3106_v50, %v3050_v17  ;;  %v3083_v11 = vadd.f32 %v3075_v10, %v3043_v19  ;;  %v3084_v39 = vadd.f32 %v3076_v7, %v3044_v32 }
 0xddf   : > { %v3119_v28 = vpack.c.bf16 %v3114_v18, %v3113_v25  ;;  %v3091_v37 = vmul.f32 0.7978846, %v3083_v11  ;;  %v3092_v59 = vmul.f32 0.7978846, %v3084_v39 }
 0xde1   : > { %3204 = vmatmul.bf16.gmra.mxu2 %v3119_v28  ;;  %3776 = vtanh.f32 %v3091_v37 }
 0xde2   : > { %3778 = vtanh.f32 %v3092_v59 }
 0xde7   : > { %v3777_v22 = vpop.eup %3776 }
 0xde8   : > { %v3779_v5 = vpop.eup %3778  ;;  %v3107_v4 = vadd.f32 1.0, %v3777_v22 }
 0xde9   : > { %v3108_v48 = vadd.f32 1.0, %v3779_v5 }
 0xdea   : > { %v3115_v56 = vmul.f32 %v3107_v4, %v3051_v31 }
 0xdeb   : > { %v3116_v2 = vmul.f32 %v3108_v48, %v3052_v30 }
 0xded   : > { %v3120_v44 = vpack.c.bf16 %v3116_v2, %v3115_v56 }
 0xdee   : > { %v3195_v61 = vpop.f32.mrf.mxu2 }
 0xdef   : > { %v3196_v6 = vadd.f32 %v5128_v58, %v3195_v61 }
 0xdf1   : > { %3209 = vmatmul.bf16.gmra.mxu2 %v3120_v44  ;;  %v3216_v52 = vmul.f32 %v5133_v9, %v3196_v6 }
 0xdf3   : > { %v3225_v12 = vadd.f32 %v5139_v38, %v3216_v52 }
 0xdf5   : > { %v3241_v23 = vmul.f32 %v3225_v12, %v3225_v12  ;;  %v3233_v24 = vmul.f32 0.5, %v3225_v12 }
 0xdf6   : > { %v3197_v15 = vpop.f32.mrf.mxu2 }
 0xdf7   : > { %v3249_v49 = vmul.f32 %v3241_v23, %v3225_v12  ;;  %v3198_v20 = vadd.f32 %v5128_v58, %v3197_v15 }
 0xdf9   : > { %v3217_v16 = vmul.f32 %v5133_v9, %v3198_v20  ;;  %v3257_v47 = vmul.f32 0.044715, %v3249_v49 }
 0xdfb   : > { %v3226_v36 = vadd.f32 %v5139_v38, %v3217_v16  ;;  %v3265_v62 = vadd.f32 %v3257_v47, %v3225_v12 }
 0xdfd   : > { %v3242_v51 = vmul.f32 %v3226_v36, %v3226_v36  ;;  %v3273_v35 = vmul.f32 0.7978846, %v3265_v62  ;;  %v3234_v32 = vmul.f32 0.5, %v3226_v36 }
 0xdff   : > { %v3250_v26 = vmul.f32 %v3242_v51, %v3226_v36  ;;  %3780 = vtanh.f32 %v3273_v35 }
 0xe01   : > { %v3258_v45 = vmul.f32 0.044715, %v3250_v26 }
 0xe03   : > { %v3266_v55 = vadd.f32 %v3258_v45, %v3226_v36 }
 0xe05   : > { %v3781_v43 = vpop.eup %3780  ;;  %v3274_v42 = vmul.f32 0.7978846, %v3266_v55 }
 0xe06   : > { %v3289_v40 = vadd.f32 1.0, %v3781_v43 }
 0xe07   : > { %3782 = vtanh.f32 %v3274_v42 }
 0xe08   : > { %v3297_v21 = vmul.f32 %v3289_v40, %v3233_v24 }
 0xe0a   : > { %v3305_v13 = vadd.f32 %v3297_v21, %v4507_v54 }
 0xe0c   : > { %3313 = vxpose.xlu1.b32.start [1/8] (short) (narrow) %v3305_v13, 32 }
 0xe0d   : > { %v3783_v19 = vpop.eup %3782 }
 0xe0e   : > { %v3290_v53 = vadd.f32 1.0, %v3783_v19 }
 0xe10   : > { %v3298_v63 = vmul.f32 %v3290_v53, %v3234_v32 }
 0xe12   : > { %v3306_v57 = vadd.f32 %v3298_v63, %v4501_v46 }
 0xe14   : > { %3314 = vxpose.xlu1.b32.cont [2/8] (short) (narrow) %v3306_v57, 32 }
 0xe52   : > { %v3200_v0 = vpop.f32.mrf.mxu2 }
 0xe53   : > { %v3201_v33 = vadd.f32 %v5128_v58, %v3200_v0 }
 0xe55   : > { %v3218_v60 = vmul.f32 %v5133_v9, %v3201_v33 }
 0xe57   : > { %v3227_v14 = vadd.f32 %v5139_v38, %v3218_v60 }
 0xe59   : > { %v3243_v17 = vmul.f32 %v3227_v14, %v3227_v14  ;;  %v3235_v2 = vmul.f32 0.5, %v3227_v14 }
 0xe5a   : > { %v3202_v50 = vpop.f32.mrf.mxu2 }
 0xe5b   : > { %v3251_v29 = vmul.f32 %v3243_v17, %v3227_v14  ;;  %v3203_v54 = vadd.f32 %v5128_v58, %v3202_v50 }
 0xe5d   : > { %v3219_v10 = vmul.f32 %v5133_v9, %v3203_v54  ;;  %v3259_v25 = vmul.f32 0.044715, %v3251_v29 }
 0xe5f   : > { %v3228_v18 = vadd.f32 %v5139_v38, %v3219_v10  ;;  %v3267_v7 = vadd.f32 %v3259_v25, %v3227_v14 }
 0xe61   : > { %v3244_v46 = vmul.f32 %v3228_v18, %v3228_v18  ;;  %v3275_v11 = vmul.f32 0.7978846, %v3267_v7  ;;  %v3236_v36 = vmul.f32 0.5, %v3228_v18 }
 0xe63   : > { %v3252_v28 = vmul.f32 %v3244_v46, %v3228_v18  ;;  %3784 = vtanh.f32 %v3275_v11 }
 0xe64   : > { %v3205_v39 = vpop.f32.mrf.mxu2 }
 0xe65   : > { %v3206_v37 = vadd.f32 %v5128_v58, %v3205_v39  ;;  %v3260_v59 = vmul.f32 0.044715, %v3252_v28 }
 0xe67   : > { %v3220_v22 = vmul.f32 %v5133_v9, %v3206_v37  ;;  %v3268_v5 = vadd.f32 %v3260_v59, %v3228_v18 }
 0xe69   : > { %v3229_v4 = vadd.f32 %v5139_v38, %v3220_v22  ;;  %v3785_v30 = vpop.eup %3784  ;;  %v3276_v48 = vmul.f32 0.7978846, %v3268_v5 }
 0xe6a   : > { %v3291_v56 = vadd.f32 1.0, %v3785_v30 }
 0xe6b   : > { %v3245_v31 = vmul.f32 %v3229_v4, %v3229_v4  ;;  %3786 = vtanh.f32 %v3276_v48  ;;  %v3237_v53 = vmul.f32 0.5, %v3229_v4 }
 0xe6c   : > { %v3207_v44 = vpop.f32.mrf.mxu2  ;;  %v3299_v52 = vmul.f32 %v3291_v56, %v3235_v2 }
 0xe6d   : > { %v3253_v61 = vmul.f32 %v3245_v31, %v3229_v4  ;;  %v3208_v6 = vadd.f32 %v5128_v58, %v3207_v44 }
 0xe6e   : > { %v3307_v23 = vadd.f32 %v3299_v52, %v4517_v1 }
 0xe6f   : > { %v3221_v12 = vmul.f32 %v5133_v9, %v3208_v6  ;;  %v3261_v15 = vmul.f32 0.044715, %v3253_v61 }
 0xe70   : > { %3315 = vxpose.xlu1.b32.cont [3/8] (short) (narrow) %v3307_v23, 32 }
 0xe71   : > { %v3230_v49 = vadd.f32 %v5139_v38, %v3221_v12  ;;  %v3269_v20 = vadd.f32 %v3261_v15, %v3229_v4  ;;  %v3787_v16 = vpop.eup %3786 }
 0xe72   : > { %v3292_v62 = vadd.f32 1.0, %v3787_v16 }
 0xe73   : > { %v3246_v47 = vmul.f32 %v3230_v49, %v3230_v49  ;;  %v3277_v51 = vmul.f32 0.7978846, %v3269_v20  ;;  %v3238_v25 = vmul.f32 0.5, %v3230_v49 }
 0xe74   : > { %v3210_v35 = vpop.f32.mrf.mxu2  ;;  %v3300_v55 = vmul.f32 %v3292_v62, %v3236_v36 }
 0xe75   : > { %v3254_v26 = vmul.f32 %v3246_v47, %v3230_v49  ;;  %v3211_v45 = vadd.f32 %v5128_v58, %v3210_v35  ;;  %3788 = vtanh.f32 %v3277_v51 }
 0xe76   : > { %v3308_v1 = vadd.f32 %v3300_v55, %v4513_v27 }
 0xe77   : > { %v3222_v43 = vmul.f32 %v5133_v9, %v3211_v45  ;;  %v3262_v42 = vmul.f32 0.044715, %v3254_v26 }
 0xe78   : > { %3316 = vxpose.xlu1.b32.cont [4/8] (short) (narrow) %v3308_v1, 32 }
 0xe79   : > { %v3231_v24 = vadd.f32 %v5139_v38, %v3222_v43  ;;  %v3270_v40 = vadd.f32 %v3262_v42, %v3230_v49 }
 0xe7b   : > { %v3789_v21 = vpop.eup %3788  ;;  %v3247_v13 = vmul.f32 %v3231_v24, %v3231_v24  ;;  %v3278_v19 = vmul.f32 0.7978846, %v3270_v40  ;;  %v3239_v39 = vmul.f32 0.5, %v3231_v24 }
 0xe7c   : > { %v3212_v32 = vpop.f32.mrf.mxu2  ;;  %v3293_v63 = vadd.f32 1.0, %v3789_v21 }
 0xe7d   : > { %v3255_v57 = vmul.f32 %v3247_v13, %v3231_v24  ;;  %v3213_v0 = vadd.f32 %v5128_v58, %v3212_v32  ;;  %3790 = vtanh.f32 %v3278_v19 }
 0xe7e   : > { %v3301_v33 = vmul.f32 %v3293_v63, %v3237_v53 }
 0xe7f   : > { %v3223_v60 = vmul.f32 %v5133_v9, %v3213_v0  ;;  %v3263_v14 = vmul.f32 0.044715, %v3255_v57 }
 0xe80   : > { %v3309_v27 = vadd.f32 %v3301_v33, %v4531_v41 }
 0xe81   : > { %v3232_v17 = vadd.f32 %v5139_v38, %v3223_v60  ;;  %v3271_v50 = vadd.f32 %v3263_v14, %v3231_v24 }
 0xe82   : > { %3317 = vxpose.xlu1.b32.cont [5/8] (short) (narrow) %v3309_v27, 32 }
 0xe83   : > { %v3791_v29 = vpop.eup %3790  ;;  %v3248_v54 = vmul.f32 %v3232_v17, %v3232_v17  ;;  %v3279_v10 = vmul.f32 0.7978846, %v3271_v50  ;;  %v3240_v5 = vmul.f32 0.5, %v3232_v17 }
 0xe84   : > { %v3294_v18 = vadd.f32 1.0, %v3791_v29 }
 0xe85   : > { %v3256_v7 = vmul.f32 %v3248_v54, %v3232_v17  ;;  %3792 = vtanh.f32 %v3279_v10 }
 0xe86   : > { %v3302_v46 = vmul.f32 %v3294_v18, %v3238_v25 }
 0xe87   : > { %v3264_v58 = vmul.f32 0.044715, %v3256_v7 }
 0xe88   : > { %v3310_v11 = vadd.f32 %v3302_v46, %v4525_v8 }
 0xe89   : > { %v3272_v28 = vadd.f32 %v3264_v58, %v3232_v17 }
 0xe8a   : > { %3318 = vxpose.xlu1.b32.cont [6/8] (short) (narrow) %v3310_v11, 32 }
 0xe8b   : > { %v3793_v9 = vpop.eup %3792  ;;  %v3280_v41 = vmul.f32 0.7978846, %v3272_v28 }
 0xe8c   : > { %v3295_v38 = vadd.f32 1.0, %v3793_v9 }
 0xe8d   : > { %3794 = vtanh.f32 %v3280_v41 }
 0xe8e   : > { %v3303_v37 = vmul.f32 %v3295_v38, %v3239_v39 }
 0xe90   : > { %v3311_v59 = vadd.f32 %v3303_v37, %v4542_v3 }
 0xe92   : > { %3319 = vxpose.xlu1.b32.cont [7/8] (short) (narrow) %v3311_v59, 32 }
 0xe93   : > { %v3795_v22 = vpop.eup %3794 }
 0xe94   : > { %v3296_v4 = vadd.f32 1.0, %v3795_v22 }
 0xe96   : > { %v3304_v30 = vmul.f32 %v3296_v4, %v3240_v5 }
 0xe98   : > { %v3312_v48 = vadd.f32 %v3304_v30, %v4559_v34 }
 0xe9a   : > { %3320 = vxpose.xlu1.b32.end [8/8] (short) (narrow) %v3312_v48, 32 }
 0xf06   : > { %v3329_v8 = vpop.trf.xlu1 }
 0xf07   : > { %3346 = vst.msk [vmem:[%s332_s15] sm:$0xff] %vm3345_vm13, %v3329_v8 }
 0xf0e   : > { %v3330_v31 = vpop.trf.xlu1 }
 0xf0f   : > { %3347 = vst.msk [vmem:[%s332_s15 + $0x8] sm:$0xff] %vm3345_vm13, %v3330_v31 }
 0xf16   : > { %v3331_v2 = vpop.trf.xlu1 }
 0xf17   : > { %3348 = vst.msk [vmem:[%s332_s15 + $0x10] sm:$0xff] %vm3345_vm13, %v3331_v2 }
 0xf1e   : > { %v3332_v3 = vpop.trf.xlu1 }
 0xf1f   : > { %3349 = vst.msk [vmem:[%s332_s15 + $0x18] sm:$0xff] %vm3345_vm13, %v3332_v3 }
 0xf20 PF: > { %s19_s30 = sadd.s32 1, %s3802_s30  }
 0xf21   : > { %p16_p4 = scmp.ge.s32.totalorder %s19_s30, 4  }
 0xf23   :  { %18 = sbr.rel (!%p16_p4) target bundleno = 1 (0x1), region = 89 }

</bundles_post_ra>
